<compile_context>
chip_gen: v5e
topology: v5e:2x2
jax: 0.10.0
libtpu: 0.0.40
codegen_flags: <defaults>
</compile_context>

<pallas_src>
import jax
import jax.numpy as jnp
from jax import lax
from jax.experimental import pallas as pl
from jax.experimental.pallas import tpu as pltpu


# ------------------------------------------------------------------ fused kernel

def _depth_halo_concat(src):
    """(NB, D, K) bf16 -> (NB*D, 3*K): row d holds [src[d-1] | src[d] | src[d+1]],
    with zero 'same' padding at each batch element's depth boundary."""
    NB, D, K = src.shape
    zero = jnp.zeros((NB, 1, K), src.dtype)
    up = jnp.concatenate([zero, src[:, :D - 1, :]], axis=1)   # row d -> src[d-1]
    dn = jnp.concatenate([src[:, 1:, :], zero], axis=1)       # row d -> src[d+1]
    return jnp.concatenate([up, src, dn], axis=-1).reshape(NB * D, 3 * K)


def _fused_body(x_ref, w1_ref, w2_ref, b1_ref, b2_ref, o_ref,
                wsc_ref=None, bsc_ref=None):
    """NB batch elements of the BasicBlock, entirely in VMEM/vregs.

    x_ref : (NB, D, H*W*Cin)         bf16, packed channels-last
    w*_ref: (3*H*W*Cin|out, H*W*Cout) bf16, H/W-unfolded banded weights, BN scale folded in
    b*_ref: (1, H*W*Cout)            f32, folded BN bias tiled over (H, W)
    o_ref : (NB, D, H*W*Cout)        bf16, lane-dense output
    """
    NB, D, hwci = x_ref.shape
    hwco = o_ref.shape[2]
    M = NB * D

    x = x_ref[...]                                           # (NB, D, hwci) bf16
    lhs_x = _depth_halo_concat(x)                            # (M, 3*hwci)  bf16

    # out1 = relu(bn1(conv1(x)))  -- one MXU matmul, bias-only epilogue
    out1 = jnp.dot(lhs_x, w1_ref[...], preferred_element_type=jnp.float32)
    out1 = jnp.maximum(out1 + b1_ref[...], 0.0)              # (M, hwco) f32

    # shortcut(x): projection conv+bn reuses the SAME concatenated LHS; identity otherwise.
    if wsc_ref is not None:
        shortcut = (jnp.dot(lhs_x, wsc_ref[...], preferred_element_type=jnp.float32)
                    + bsc_ref[...])
    else:
        shortcut = x.reshape(M, hwci).astype(jnp.float32)    # Cin == Cout

    # out = relu(bn2(conv2(out1)) + shortcut)
    lhs_1 = _depth_halo_concat(out1.astype(jnp.bfloat16).reshape(NB, D, hwco))
    out = jnp.dot(lhs_1, w2_ref[...], preferred_element_type=jnp.float32) + b2_ref[...]
    out = jnp.maximum(out + shortcut, 0.0)

    o_ref[...] = out.astype(o_ref.dtype).reshape(NB, D, hwco)  # unmasked lane-dense store


def _fused_block_sc_kernel(x_ref, w1_ref, w2_ref, wsc_ref, b1_ref, b2_ref, bsc_ref, o_ref):
    _fused_body(x_ref, w1_ref, w2_ref, b1_ref, b2_ref, o_ref,
                wsc_ref=wsc_ref, bsc_ref=bsc_ref)


def _fused_block_id_kernel(x_ref, w1_ref, w2_ref, b1_ref, b2_ref, o_ref):
    _fused_body(x_ref, w1_ref, w2_ref, b1_ref, b2_ref, o_ref)


# ------------------------------------------------------------------ one-time weight prep

def _fold_bn(conv_bias, gamma, beta, running_mean, running_var, eps=1e-5):
    """Fold conv bias + inference BatchNorm into per-channel scale/bias."""
    scale = gamma / jnp.sqrt(running_var + eps)
    bias = beta + (conv_bias - running_mean) * scale
    return scale, bias


def _unfold_weight_hw(w, H, W):
    """(3,3,3,Ci,Co) DHWIO conv weight -> (3*H*W*Ci, H*W*Co) banded matrix.

    Row block kd, row (hi*W+wi)*Ci+ci, col (ho*W+wo)*Co+co holds
    w[kd, hi-ho+1, wi-wo+1, ci, co] (zero outside the 3x3 window), i.e. the H/W taps
    and their 'same' zero padding are folded into the weight so a packed (H, W, C) slab
    contracts in a single MXU matmul (depth taps stacked along K).
    """
    KD, KH, KW, Ci, Co = w.shape
    mh = (jnp.arange(H)[:, None, None]
          == jnp.arange(H)[None, :, None] + jnp.arange(KH)[None, None, :] - 1)
    mw = (jnp.arange(W)[:, None, None]
          == jnp.arange(W)[None, :, None] + jnp.arange(KW)[None, None, :] - 1)
    big = jnp.einsum("hpa,wqb,dabio->dhwipqo",
                     mh.astype(w.dtype), mw.astype(w.dtype), w)
    return big.reshape(KD * H * W * Ci, H * W * Co)


def _prep_conv_bn(w, conv_bias, gamma, beta, rm, rv, H, W):
    """BN-scale-folded, H/W-unfolded bf16 weight + tiled f32 bias (hoisted, run once)."""
    scale, bias = _fold_bn(conv_bias, gamma, beta, rm, rv)
    Co = w.shape[-1]
    w_scaled = (w * scale.reshape(1, 1, 1, 1, Co)).astype(jnp.float32)
    w_big = _unfold_weight_hw(w_scaled, H, W).astype(jnp.bfloat16)
    bias_tiled = jnp.tile(bias.astype(jnp.float32), H * W).reshape(1, H * W * Co)
    return w_big, bias_tiled


def prepare_basic_block(params, H, W):
    """Call once; reuse the returned dict across every forward call."""
    prep = {"in_planes": params["in_planes"], "planes": params["planes"], "H": H, "W": W}
    prep["w1"], prep["b1"] = _prep_conv_bn(params["w1"], params["cb1"], params["g1"],
                                           params["be1"], params["rm1"], params["rv1"], H, W)
    prep["w2"], prep["b2"] = _prep_conv_bn(params["w2"], params["cb2"], params["g2"],
                                           params["be2"], params["rm2"], params["rv2"], H, W)
    if params["in_planes"] != params["planes"]:
        prep["wsc"], prep["bsc"] = _prep_conv_bn(params["wsc"], params["cbsc"], params["gsc"],
                                                 params["besc"], params["rmsc"], params["rvsc"],
                                                 H, W)
    return prep


# ------------------------------------------------------------------ forward wrapper

def _pick_batch_block(N, D, target_rows):
    """Fold batch into matmul rows: NB*D >= target_rows when N allows, NB divides N."""
    if N * D <= target_rows:
        return N                               # small batch: fold everything (grid = 1)
    return next(nb for nb in range(1, N + 1) if N % nb == 0 and nb * D >= target_rows)


def basic_block_forward(x_ncdhw, prepared, *, batch_block=None, target_rows=256):
    """PyTorch BasicBlock.forward, NCDHW in / NCDHW out (bf16), one fused pallas_call."""
    N, Cin, D, H, W = x_ncdhw.shape
    assert Cin == prepared["in_planes"] and H == prepared["H"] and W == prepared["W"]
    Cout = prepared["planes"]
    hwci, hwco = H * W * Cin, H * W * Cout
    has_sc = prepared["in_planes"] != prepared["planes"]

    # Batch folding: NB*D matmul rows per grid step (>=128 fills v5e's MXU, >=256 v6e/v7x).
    # Note (v7x): prefer keeping N // NB a multiple of 2 so both TensorCores stay busy.
    NB = batch_block if batch_block is not None else _pick_batch_block(N, D, target_rows)
    assert N % NB == 0
    grid = (N // NB,)

    # bf16 cast BEFORE the NCDHW -> packed (N, D, H*W*Cin) transpose (halves its traffic).
    x = jnp.transpose(x_ncdhw.astype(jnp.bfloat16), (0, 2, 3, 4, 1)).reshape(N, D, hwci)

    x_spec = pl.BlockSpec((NB, D, hwci), lambda n: (n, 0, 0))
    out_spec = pl.BlockSpec((NB, D, hwco), lambda n: (n, 0, 0))
    w1_spec = pl.BlockSpec((3 * hwci, hwco), lambda n: (0, 0))     # grid-invariant
    w2_spec = pl.BlockSpec((3 * hwco, hwco), lambda n: (0, 0))     # grid-invariant
    vec_spec = pl.BlockSpec((1, hwco), lambda n: (0, 0))           # grid-invariant

    if has_sc:
        args = [x, prepared["w1"], prepared["w2"], prepared["wsc"],
                prepared["b1"], prepared["b2"], prepared["bsc"]]
        in_specs = [x_spec, w1_spec, w2_spec, w1_spec, vec_spec, vec_spec, vec_spec]
        kernel = _fused_block_sc_kernel
    else:
        args = [x, prepared["w1"], prepared["w2"], prepared["b1"], prepared["b2"]]
        in_specs = [x_spec, w1_spec, w2_spec, vec_spec, vec_spec]
        kernel = _fused_block_id_kernel

    out = pl.pallas_call(
        kernel,
        out_shape=jax.ShapeDtypeStruct((N, D, hwco), jnp.bfloat16),
        grid=grid,
        in_specs=in_specs,
        out_specs=out_spec,
        compiler_params=pltpu.CompilerParams(
            dimension_semantics=("parallel",),          # batch blocks are independent
            vmem_limit_bytes=32 * 1024 * 1024),         # fits v5e/v6e/v7x scoped budgets
    )(*args)

    # packed (N, D, H*W*Cout) -> NCDHW (kept bf16; halves writeback/transpose traffic).
    return jnp.transpose(out.reshape(N, D, H, W, Cout), (0, 4, 1, 2, 3))


# ------------------------------------------------------------------ reference
# Mirrors the kernel's numerics contract: BN scale folded into the bf16 conv weights,
# bf16 MXU operands, f32 accumulation, f32 bias/ReLU epilogue, bf16 identity residual.

def _ref_conv_bn(x_ndhwc, w, conv_bias, gamma, beta, rm, rv):
    scale, bias = _fold_bn(conv_bias, gamma, beta, rm, rv)
    w_s = (w * scale.reshape(1, 1, 1, 1, -1)).astype(jnp.bfloat16)
    y = lax.conv_general_dilated(
        x_ndhwc.astype(jnp.bfloat16), w_s,
        window_strides=(1, 1, 1), padding=[(1, 1)] * 3,
        dimension_numbers=("NDHWC", "DHWIO", "NDHWC"),
        preferred_element_type=jnp.float32)
    return y + bias


def basic_block_reference(x_ncdhw, params):
    x = jnp.transpose(x_ncdhw, (0, 2, 3, 4, 1))
    out1 = jnp.maximum(_ref_conv_bn(x, params["w1"], params["cb1"], params["g1"],
                                    params["be1"], params["rm1"], params["rv1"]), 0.0)
    if params["in_planes"] != params["planes"]:
        shortcut = _ref_conv_bn(x, params["wsc"], params["cbsc"], params["gsc"],
                                params["besc"], params["rmsc"], params["rvsc"])
    else:
        shortcut = x.astype(jnp.bfloat16).astype(jnp.float32)   # kernel residual uses bf16 x
    out = jnp.maximum(_ref_conv_bn(out1, params["w2"], params["cb2"], params["g2"],
                                   params["be2"], params["rm2"], params["rv2"]) + shortcut, 0.0)
    return jnp.transpose(out, (0, 4, 1, 2, 3))


# ------------------------------------------------------------------ main

def _init_params(key, in_planes, planes):
    ks = jax.random.split(key, 16)
    p = {"in_planes": in_planes, "planes": planes}
    p["w1"] = 0.1 * jax.random.normal(ks[0], (3, 3, 3, in_planes, planes), jnp.float32)
    p["cb1"] = 0.1 * jax.random.normal(ks[1], (planes,), jnp.float32)
    p["g1"] = 1.0 + 0.1 * jax.random.normal(ks[2], (planes,), jnp.float32)
    p["be1"] = 0.1 * jax.random.normal(ks[3], (planes,), jnp.float32)
    p["rm1"] = 0.1 * jax.random.normal(ks[4], (planes,), jnp.float32)
    p["rv1"] = jax.random.uniform(ks[5], (planes,), jnp.float32, 0.5, 1.5)
    p["w2"] = 0.1 * jax.random.normal(ks[6], (3, 3, 3, planes, planes), jnp.float32)
    p["cb2"] = 0.1 * jax.random.normal(ks[7], (planes,), jnp.float32)
    p["g2"] = 1.0 + 0.1 * jax.random.normal(ks[8], (planes,), jnp.float32)
    p["be2"] = 0.1 * jax.random.normal(ks[9], (planes,), jnp.float32)
    p["rm2"] = 0.1 * jax.random.normal(ks[10], (planes,), jnp.float32)
    p["rv2"] = jax.random.uniform(ks[11], (planes,), jnp.float32, 0.5, 1.5)
    if in_planes != planes:
        p["wsc"] = 0.1 * jax.random.normal(ks[12], (3, 3, 3, in_planes, planes), jnp.float32)
        p["cbsc"] = 0.1 * jax.random.normal(ks[13], (planes,), jnp.float32)
        p["gsc"] = 1.0 + 0.1 * jax.random.normal(ks[14], (planes,), jnp.float32)
        p["besc"] = 0.1 * jax.random.normal(ks[15], (planes,), jnp.float32)
        p["rmsc"] = jnp.zeros((planes,), jnp.float32)
        p["rvsc"] = jnp.ones((planes,), jnp.float32)
    return p


def _check(out, ref, name):
    out_f32 = out.astype(jnp.float32)
    if not jnp.allclose(out_f32, ref, atol=2e-2, rtol=2e-2):
        err = float(jnp.max(jnp.abs(out_f32 - ref)))
        raise AssertionError(f"{name}: Pallas BasicBlock mismatch (max abs err {err})")


if __name__ == "__main__":
    D = H = W = 8
    key = jax.random.PRNGKey(0)
    k1, k2, k3, k4 = jax.random.split(key, 4)

    # case 1: projection shortcut (in_planes != planes)
    x1 = jax.random.normal(k1, (2, 4, D, H, W), jnp.float32)      # NCDHW like PyTorch
    p1 = _init_params(k2, 4, 8)
    prep1 = prepare_basic_block(p1, H, W)                         # one-time weight prep
    out1 = jax.block_until_ready(basic_block_forward(x1, prep1))
    ref1 = jax.block_until_ready(basic_block_reference(x1, p1))
    assert out1.shape == (2, 8, D, H, W), out1.shape
    _check(out1, ref1, "projection-shortcut")

    # case 2: identity shortcut (in_planes == planes)
    x2 = jax.random.normal(k3, (2, 8, D, H, W), jnp.float32)
    p2 = _init_params(k4, 8, 8)
    prep2 = prepare_basic_block(p2, H, W)
    out2 = jax.block_until_ready(basic_block_forward(x2, prep2))
    ref2 = jax.block_until_ready(basic_block_reference(x2, p2))
    assert out2.shape == (2, 8, D, H, W), out2.shape
    _check(out2, ref2, "identity-shortcut")

    print("KERNEL_OK")
</pallas_src>

<mosaic_0001>
module attributes {stable_mosaic.version = 11 : i64} {
  func.func @_fused_block_sc_kernel(%arg0: i32, %arg1: memref<2x8x256xbf16, #tpu.memory_space<vmem>>, %arg2: memref<768x512xbf16, #tpu.memory_space<vmem>>, %arg3: memref<1536x512xbf16, #tpu.memory_space<vmem>>, %arg4: memref<768x512xbf16, #tpu.memory_space<vmem>>, %arg5: memref<1x512xf32, #tpu.memory_space<vmem>>, %arg6: memref<1x512xf32, #tpu.memory_space<vmem>>, %arg7: memref<1x512xf32, #tpu.memory_space<vmem>>, %arg8: memref<2x8x512xbf16, #tpu.memory_space<vmem>>) attributes {dimension_semantics = [#tpu.dimension_semantics<parallel>], iteration_bounds = array<i64: 1>, scalar_prefetch = 0 : i64, scratch_operands = 0 : i64, tpu.core_type = #tpu.core_type<tc>, window_params = [{transform_indices = @transform_0, window_bounds = array<i64: 2, 8, 256>}, {pipeline_mode = #tpu.pipeline_mode<synchronous>, transform_indices = @transform_1, window_bounds = array<i64: 768, 512>}, {pipeline_mode = #tpu.pipeline_mode<synchronous>, transform_indices = @transform_2, window_bounds = array<i64: 1536, 512>}, {pipeline_mode = #tpu.pipeline_mode<synchronous>, transform_indices = @transform_3, window_bounds = array<i64: 768, 512>}, {pipeline_mode = #tpu.pipeline_mode<synchronous>, transform_indices = @transform_4, window_bounds = array<i64: 1, 512>}, {pipeline_mode = #tpu.pipeline_mode<synchronous>, transform_indices = @transform_5, window_bounds = array<i64: 1, 512>}, {pipeline_mode = #tpu.pipeline_mode<synchronous>, transform_indices = @transform_6, window_bounds = array<i64: 1, 512>}, {transform_indices = @transform_7, window_bounds = array<i64: 2, 8, 512>}]} {
    %c0 = arith.constant 0 : index
    %c0_0 = arith.constant 0 : index
    %c0_1 = arith.constant 0 : index
    %0 = vector.load %arg1[%c0, %c0_0, %c0_1] : memref<2x8x256xbf16, #tpu.memory_space<vmem>>, vector<2x8x256xbf16>
    %cst = arith.constant 0.000000e+00 : bf16
    %1 = vector.broadcast %cst : bf16 to vector<2x1x256xbf16>
    %2 = vector.extract_strided_slice %0 {offsets = [0, 0, 0], sizes = [2, 7, 256], strides = [1, 1, 1]} : vector<2x8x256xbf16> to vector<2x7x256xbf16>
    %3 = tpu.concatenate %1, %2 in 1 : vector<2x1x256xbf16>, vector<2x7x256xbf16> -> vector<2x8x256xbf16>
    %4 = vector.extract_strided_slice %0 {offsets = [0, 1, 0], sizes = [2, 7, 256], strides = [1, 1, 1]} : vector<2x8x256xbf16> to vector<2x7x256xbf16>
    %5 = tpu.concatenate %4, %1 in 1 : vector<2x7x256xbf16>, vector<2x1x256xbf16> -> vector<2x8x256xbf16>
    %6 = tpu.concatenate %3, %0, %5 in 2 : vector<2x8x256xbf16>, vector<2x8x256xbf16>, vector<2x8x256xbf16> -> vector<2x8x768xbf16>
    %7 = vector.shape_cast %6 : vector<2x8x768xbf16> to vector<16x768xbf16>
    %c0_2 = arith.constant 0 : index
    %c0_3 = arith.constant 0 : index
    %8 = vector.load %arg2[%c0_2, %c0_3] : memref<768x512xbf16, #tpu.memory_space<vmem>>, vector<768x512xbf16>
    %cst_4 = arith.constant dense<0.000000e+00> : vector<16x512xf32>
    %9 = tpu.matmul %7, %8, %cst_4 {dimension_numbers = #tpu.dot_dimension_numbers<[1], [0], [0], [1], [0, 0, 1, 1], [], []>} : vector<16x768xbf16>, vector<768x512xbf16>, vector<16x512xf32> -> vector<16x512xf32>
    %c0_5 = arith.constant 0 : index
    %c0_6 = arith.constant 0 : index
    %10 = vector.load %arg5[%c0_5, %c0_6] : memref<1x512xf32, #tpu.memory_space<vmem>>, vector<1x512xf32>
    %11 = vector.broadcast %10 : vector<1x512xf32> to vector<16x512xf32>
    %12 = arith.addf %9, %11 : vector<16x512xf32>
    %cst_7 = arith.constant 0.000000e+00 : f32
    %13 = vector.broadcast %cst_7 : f32 to vector<16x512xf32>
    %14 = arith.maximumf %12, %13 : vector<16x512xf32>
    %c0_8 = arith.constant 0 : index
    %c0_9 = arith.constant 0 : index
    %15 = vector.load %arg4[%c0_8, %c0_9] : memref<768x512xbf16, #tpu.memory_space<vmem>>, vector<768x512xbf16>
    %cst_10 = arith.constant dense<0.000000e+00> : vector<16x512xf32>
    %16 = tpu.matmul %7, %15, %cst_10 {dimension_numbers = #tpu.dot_dimension_numbers<[1], [0], [0], [1], [0, 0, 1, 1], [], []>} : vector<16x768xbf16>, vector<768x512xbf16>, vector<16x512xf32> -> vector<16x512xf32>
    %c0_11 = arith.constant 0 : index
    %c0_12 = arith.constant 0 : index
    %17 = vector.load %arg7[%c0_11, %c0_12] : memref<1x512xf32, #tpu.memory_space<vmem>>, vector<1x512xf32>
    %18 = vector.broadcast %17 : vector<1x512xf32> to vector<16x512xf32>
    %19 = arith.addf %16, %18 : vector<16x512xf32>
    %20 = arith.truncf %14 : vector<16x512xf32> to vector<16x512xbf16>
    %21 = vector.shape_cast %20 : vector<16x512xbf16> to vector<2x8x512xbf16>
    %cst_13 = arith.constant 0.000000e+00 : bf16
    %22 = vector.broadcast %cst_13 : bf16 to vector<2x1x512xbf16>
    %23 = vector.extract_strided_slice %21 {offsets = [0, 0, 0], sizes = [2, 7, 512], strides = [1, 1, 1]} : vector<2x8x512xbf16> to vector<2x7x512xbf16>
    %24 = tpu.concatenate %22, %23 in 1 : vector<2x1x512xbf16>, vector<2x7x512xbf16> -> vector<2x8x512xbf16>
    %25 = vector.extract_strided_slice %21 {offsets = [0, 1, 0], sizes = [2, 7, 512], strides = [1, 1, 1]} : vector<2x8x512xbf16> to vector<2x7x512xbf16>
    %26 = tpu.concatenate %25, %22 in 1 : vector<2x7x512xbf16>, vector<2x1x512xbf16> -> vector<2x8x512xbf16>
    %27 = tpu.concatenate %24, %21, %26 in 2 : vector<2x8x512xbf16>, vector<2x8x512xbf16>, vector<2x8x512xbf16> -> vector<2x8x1536xbf16>
    %28 = vector.shape_cast %27 : vector<2x8x1536xbf16> to vector<16x1536xbf16>
    %c0_14 = arith.constant 0 : index
    %c0_15 = arith.constant 0 : index
    %29 = vector.load %arg3[%c0_14, %c0_15] : memref<1536x512xbf16, #tpu.memory_space<vmem>>, vector<1536x512xbf16>
    %cst_16 = arith.constant dense<0.000000e+00> : vector<16x512xf32>
    %30 = tpu.matmul %28, %29, %cst_16 {dimension_numbers = #tpu.dot_dimension_numbers<[1], [0], [0], [1], [0, 0, 1, 1], [], []>} : vector<16x1536xbf16>, vector<1536x512xbf16>, vector<16x512xf32> -> vector<16x512xf32>
    %c0_17 = arith.constant 0 : index
    %c0_18 = arith.constant 0 : index
    %31 = vector.load %arg6[%c0_17, %c0_18] : memref<1x512xf32, #tpu.memory_space<vmem>>, vector<1x512xf32>
    %32 = vector.broadcast %31 : vector<1x512xf32> to vector<16x512xf32>
    %33 = arith.addf %30, %32 : vector<16x512xf32>
    %34 = arith.addf %33, %19 : vector<16x512xf32>
    %cst_19 = arith.constant 0.000000e+00 : f32
    %35 = vector.broadcast %cst_19 : f32 to vector<16x512xf32>
    %36 = arith.maximumf %34, %35 : vector<16x512xf32>
    %37 = arith.truncf %36 : vector<16x512xf32> to vector<16x512xbf16>
    %38 = vector.shape_cast %37 : vector<16x512xbf16> to vector<2x8x512xbf16>
    %c0_20 = arith.constant 0 : index
    %c0_21 = arith.constant 0 : index
    %c0_22 = arith.constant 0 : index
    %39 = vector.load %arg8[%c0_20, %c0_21, %c0_22] : memref<2x8x512xbf16, #tpu.memory_space<vmem>>, vector<2x8x512xbf16>
    tpu.vector_store %arg8[%c0_20, %c0_21, %c0_22], %38 {strides = array<i32>} : memref<2x8x512xbf16, #tpu.memory_space<vmem>>, vector<2x8x512xbf16>,
    return
  }
  func.func @transform_0(%arg0: i32) -> (i32, i32, i32) {
    %c0_i32 = arith.constant 0 : i32
    %c0_i32_0 = arith.constant 0 : i32
    %c0_i32_1 = arith.constant 0 : i32
    return %arg0, %c0_i32, %c0_i32_0 : i32, i32, i32
  }
  func.func @transform_1(%arg0: i32) -> (i32, i32) {
    %c0_i32 = arith.constant 0 : i32
    %c0_i32_0 = arith.constant 0 : i32
    %c0_i32_1 = arith.constant 0 : i32
    return %c0_i32, %c0_i32_0 : i32, i32
  }
  func.func @transform_2(%arg0: i32) -> (i32, i32) {
    %c0_i32 = arith.constant 0 : i32
    %c0_i32_0 = arith.constant 0 : i32
    %c0_i32_1 = arith.constant 0 : i32
    return %c0_i32, %c0_i32_0 : i32, i32
  }
  func.func @transform_3(%arg0: i32) -> (i32, i32) {
    %c0_i32 = arith.constant 0 : i32
    %c0_i32_0 = arith.constant 0 : i32
    %c0_i32_1 = arith.constant 0 : i32
    return %c0_i32, %c0_i32_0 : i32, i32
  }
  func.func @transform_4(%arg0: i32) -> (i32, i32) {
    %c0_i32 = arith.constant 0 : i32
    %c0_i32_0 = arith.constant 0 : i32
    %c0_i32_1 = arith.constant 0 : i32
    return %c0_i32, %c0_i32_0 : i32, i32
  }
  func.func @transform_5(%arg0: i32) -> (i32, i32) {
    %c0_i32 = arith.constant 0 : i32
    %c0_i32_0 = arith.constant 0 : i32
    %c0_i32_1 = arith.constant 0 : i32
    return %c0_i32, %c0_i32_0 : i32, i32
  }
  func.func @transform_6(%arg0: i32) -> (i32, i32) {
    %c0_i32 = arith.constant 0 : i32
    %c0_i32_0 = arith.constant 0 : i32
    %c0_i32_1 = arith.constant 0 : i32
    return %c0_i32, %c0_i32_0 : i32, i32
  }
  func.func @transform_7(%arg0: i32) -> (i32, i32, i32) {
    %c0_i32 = arith.constant 0 : i32
    %c0_i32_0 = arith.constant 0 : i32
    %c0_i32_1 = arith.constant 0 : i32
    return %arg0, %c0_i32, %c0_i32_0 : i32, i32, i32
  }
}

</mosaic_0001>

<bundles_post_ra>
// kernel: tpu_custom_call.1
= control target key start
LH: loop header
LB: loop body
LE: loop exit
PB: predicated region body
PF: predicated region fallthrough
CT: control target
= control target key end

     0   :  { %12 = vsyncpa [#allocation3], 0  ;;  %s11393_s0 = inlined_call_operand.hbm [shape: bf16[2,8,256], index: 0, kind: input, shape index: {}]   ;;  %s11394_s1 = inlined_call_operand.hbm [shape: bf16[768,512], index: 1, kind: input, shape index: {}]   ;;  %s11395_s2 = inlined_call_operand.hbm [shape: bf16[1536,512], index: 2, kind: input, shape index: {}]   ;;  %s11396_s3 = inlined_call_operand.hbm [shape: bf16[768,512], index: 3, kind: input, shape index: {}]   ;;  %s11397_s4 = inlined_call_operand.hbm [shape: f32[1,512], index: 4, kind: input, shape index: {}]   ;;  %s11398_s5 = inlined_call_operand.hbm [shape: f32[1,512], index: 5, kind: input, shape index: {}]   ;;  %s11399_s6 = inlined_call_operand.hbm [shape: f32[1,512], index: 6, kind: input, shape index: {}]   ;;  %s11400_s7 = inlined_call_operand.hbm [shape: bf16[2,8,512], index: 7, kind: output, shape index: {}]  }
   0x1   :  { %13 = vsyncpa [#allocation6], 0 }
   0x2   :  { %14 = vsyncpa [#allocation9], 0 }
   0x3   :  { %15 = vsyncpa [#allocation12], 0  ;;  %s34_s26 = sshll.u32 %s11394_s1, 4  ;;  %s35_s26 = int_to_ptr.hbm [resolvable:$true] %s34_s26 }
   0x4   :  { %16 = vsyncpa [#allocation4], 0  ;;  %s10506_s27 = smov [#allocation5]   ;;  %s60_s8 = sshll.u32 %s11396_s3, 4  ;;  %s61_s8 = int_to_ptr.hbm [resolvable:$true] %s60_s8 }
   0x5   :  { %s36_s28 = sshll.u32 %s10506_s27, 4  ;;  %s10507_s9 = smov 256   ;;  %s37_s28 = int_to_ptr.vmem [resolvable:$true] %s36_s28 }
   0x6   :  { %s10508_s10 = smov 16   ;;  %s10509_s11 = smov [#allocation8]  }
   0x7   :  { %42 = dma.hbm_to_vmem [thread:$0]  %s35_s26, 24576, %s37_s28, [#allocation6], %s10507_s9, %s10507_s9, %s10508_s10  }
   0x8   :  { %s62_s12 = sshll.u32 %s10509_s11, 4  ;;  %s85_s14 = sshll.u32 %s11398_s5, 4  ;;  %s63_s12 = int_to_ptr.vmem [resolvable:$true] %s62_s12  ;;  %s86_s14 = int_to_ptr.hbm [resolvable:$true] %s85_s14 }
   0x9   :  { %68 = dma.hbm_to_vmem [thread:$0]  %s61_s8, 24576, %s63_s12, [#allocation9], %s10507_s9, %s10507_s9, %s10508_s10  }
   0xa   :  { %s21_s16 = sshll.u32 %s11393_s0, 4  ;;  %s10510_s17 = smov [#allocation11]   ;;  %s22_s16 = int_to_ptr.hbm [resolvable:$true] %s21_s16 }
   0xb   :  { %s87_s18 = sshll.u32 %s10510_s17, 4  ;;  %s10511_s19 = smov [#allocation2]   ;;  %s88_s18 = int_to_ptr.vmem [resolvable:$true] %s87_s18 }
   0xc   :  { %90 = dma.hbm_to_vmem [thread:$0]  %s86_s14, 64, %s88_s18, [#allocation12]  }
   0xd   :  { %s23_s20 = sshll.u32 %s10511_s19, 4  ;;  %s10512_s21 = smov 128   ;;  %s24_s20 = int_to_ptr.vmem [resolvable:$true] %s23_s20 }
   0xe   :  { %s10513_s5 = smov 8   ;;  %s47_s24 = sshll.u32 %s11395_s2, 4  ;;  %s48_s24 = int_to_ptr.hbm [resolvable:$true] %s47_s24 }
   0xf   :  { %29 = dma.hbm_to_vmem [thread:$0]  %s22_s16, 256, %s24_s20, [#allocation3], %s10512_s21, %s10512_s21, %s10513_s5  }
  0x10   :  { %s10514_s25 = smov [#allocation7]   ;;  %s74_s28 = sshll.u32 %s11397_s4, 4  ;;  %s75_s28 = int_to_ptr.hbm [resolvable:$true] %s74_s28 }
  0x11   :  { %s49_s26 = sshll.u32 %s10514_s25, 4  ;;  %s10515_s29 = smov [#allocation10]   ;;  %s50_s26 = int_to_ptr.vmem [resolvable:$true] %s49_s26 }
  0x12   :  { %55 = dma.hbm_to_vmem [thread:$0]  %s48_s24, 49152, %s50_s26, [#allocation6], %s10507_s9, %s10507_s9, %s10508_s10  }
  0x13   :  { %s76_s30 = sshll.u32 %s10515_s29, 4  ;;  %s96_s12 = sshll.u32 %s11399_s6, 4  ;;  %s77_s30 = int_to_ptr.vmem [resolvable:$true] %s76_s30  ;;  %s97_s12 = int_to_ptr.hbm [resolvable:$true] %s96_s12 }
  0x14   :  { %79 = dma.hbm_to_vmem [thread:$0]  %s75_s28, 64, %s77_s30, [#allocation9]  }
  0x15   :  { %s10516_s2 = smov [#allocation13]  }
  0x16   :  { %s98_s13 = sshll.u32 %s10516_s2, 4  ;;  %s99_s13 = int_to_ptr.vmem [resolvable:$true] %s98_s13 }
  0x17   :  { %101 = dma.hbm_to_vmem [thread:$0]  %s97_s12, 64, %s99_s13, [#allocation12]  }
  0x18   :  { %10496 = dma.done.wait [#allocation3], 256  }
  0x19   :  { %10497 = vsyncadd [#allocation3], 4294967040 }
  0x1a   :  { %10498 = dma.done.wait [#allocation6], 73728  }
  0x1b   :  { %10499 = vsyncadd [#allocation6], 4294893568 }
  0x1c   :  { %10500 = dma.done.wait [#allocation9], 24640  }
  0x1d   :  { %10501 = vsyncadd [#allocation9], 4294942656 }
  0x1e   :  { %10502 = dma.done.wait [#allocation12], 128  }
  0x1f   :  { %10503 = vsyncadd [#allocation12], 4294967168  ;;  %v6563_v0 = vld [vmem:[#allocation5 + $0xe0] sm:$0xf]  ;;  %v9551_v1 = vld [vmem:[#allocation5 + $0xec] sm:$0xf0] }
  0x20   :  { %v6691_v2 = vld [vmem:[#allocation5 + $0x1e0] sm:$0xf]  ;;  %v6564_v3 = vor.u32 %v9551_v1, %v6563_v0  ;;  %v9583_v4 = vld [vmem:[#allocation5 + $0x1ec] sm:$0xf0]  ;;  %vm175_vm0 = vcmask 1040384   ;;  %vm194_vm3 = vcmask 1043456  }
  0x21   :  { %v6819_v5 = vld [vmem:[#allocation5 + $0x2e0] sm:$0xf]  ;;  %v9615_v6 = vld [vmem:[#allocation5 + $0x2ec] sm:$0xf0]  ;;  %v6692_v7 = vor.u32 %v9583_v4, %v6691_v2  ;;  %vm176_vm1 = vsmask.f32 256 }
  0x22   :  { %v6820_v8 = vor.u32 %v9615_v6, %v6819_v5  ;;  %v6947_v9 = vld [vmem:[#allocation5 + $0x3e0] sm:$0xf]  ;;  %v9647_v10 = vld [vmem:[#allocation5 + $0x3ec] sm:$0xf0]  ;;  %1391 = vmatpush.bf16.msra.mxu0 %v6564_v3  ;;  %vm10628_vm2 = vmand %vm175_vm0, %vm176_vm1  ;;  %vm195_vm4 = vsmask.f32 3328 }
  0x23   :  { %v6547_v11 = vld [vmem:[#allocation5 + $0xc0] sm:$0xf]  ;;  %v6948_v12 = vor.u32 %v9647_v10, %v6947_v9  ;;  %v9547_v13 = vld [vmem:[#allocation5 + $0xcc] sm:$0xf0]  ;;  %1405 = vmatpush.bf16.msra.mxu1 %v6692_v7  ;;  %vm10673_vm5 = vmand %vm194_vm3, %vm195_vm4  ;;  %s10517_s4 = smov [#allocation14]   ;;  %s6433_s3 = sshll.u32 %s11400_s7, 4  ;;  %s6434_s3 = int_to_ptr.hbm [resolvable:$true] %s6433_s3 }
  0x24   :  { %v6675_v14 = vld [vmem:[#allocation5 + $0x1c0] sm:$0xf]  ;;  %v9579_v15 = vld [vmem:[#allocation5 + $0x1cc] sm:$0xf0]  ;;  %1419 = vmatpush.bf16.msra.mxu2 %v6820_v8  ;;  %v6548_v16 = vor.u32 %v9547_v13, %v6547_v11  ;;  %s6431_s6 = sshll.u32 %s10517_s4, 4  ;;  %s6432_s6 = int_to_ptr.vmem [resolvable:$true] %s6431_s6 }
  0x25   :  { %v6676_v17 = vor.u32 %v9579_v15, %v6675_v14  ;;  %v6803_v18 = vld [vmem:[#allocation5 + $0x2c0] sm:$0xf]  ;;  %v9611_v19 = vld [vmem:[#allocation5 + $0x2cc] sm:$0xf0]  ;;  %1433 = vmatpush.bf16.msra.mxu3 %v6948_v12 }
  0x26   :  { %v6931_v20 = vld [vmem:[#allocation5 + $0x3c0] sm:$0xf]  ;;  %v6804_v21 = vor.u32 %v9611_v19, %v6803_v18  ;;  %v9643_v22 = vld [vmem:[#allocation5 + $0x3cc] sm:$0xf0]  ;;  %1392 = vmatpush.bf16.msra.mxu0 %v6548_v16 }
  0x27   :  { %v6531_v23 = vld [vmem:[#allocation5 + $0xa0] sm:$0xf]  ;;  %v9543_v24 = vld [vmem:[#allocation5 + $0xac] sm:$0xf0]  ;;  %v6932_v25 = vor.u32 %v9643_v22, %v6931_v20  ;;  %1406 = vmatpush.bf16.msra.mxu1 %v6676_v17 }
  0x28   :  { %v6659_v26 = vld [vmem:[#allocation5 + $0x1a0] sm:$0xf]  ;;  %v9575_v27 = vld [vmem:[#allocation5 + $0x1ac] sm:$0xf0]  ;;  %v6532_v29 = vor.u32 %v9543_v24, %v6531_v23  ;;  %1420 = vmatpush.bf16.msra.mxu2 %v6804_v21 }
  0x29   :  { %v6787_v28 = vld [vmem:[#allocation5 + $0x2a0] sm:$0xf]  ;;  %v9607_v30 = vld [vmem:[#allocation5 + $0x2ac] sm:$0xf0]  ;;  %v6660_v33 = vor.u32 %v9575_v27, %v6659_v26  ;;  %1434 = vmatpush.bf16.msra.mxu3 %v6932_v25 }
  0x2a   :  { %v6915_v31 = vld [vmem:[#allocation5 + $0x3a0] sm:$0xf]  ;;  %v9639_v32 = vld [vmem:[#allocation5 + $0x3ac] sm:$0xf0]  ;;  %v6788_v34 = vor.u32 %v9607_v30, %v6787_v28  ;;  %1393 = vmatpush.bf16.msra.mxu0 %v6532_v29 }
  0x2b   :  { %v6515_v35 = vld [vmem:[#allocation5 + $0x80] sm:$0xf]  ;;  %v9539_v36 = vld [vmem:[#allocation5 + $0x8c] sm:$0xf0]  ;;  %v6916_v38 = vor.u32 %v9639_v32, %v6915_v31  ;;  %1407 = vmatpush.bf16.msra.mxu1 %v6660_v33  ;;  %v9549_v32 = vld [vmem:[#allocation5 + $0xe4] sm:$0xf] }
  0x2c   :  { %v6643_v37 = vld [vmem:[#allocation5 + $0x180] sm:$0xf]  ;;  %v9571_v39 = vld [vmem:[#allocation5 + $0x18c] sm:$0xf0]  ;;  %v6516_v44 = vor.u32 %v9539_v36, %v6515_v35  ;;  %1421 = vmatpush.bf16.msra.mxu2 %v6788_v34  ;;  %v6565_v33 = vld [vmem:[#allocation5 + $0xf0] sm:$0xf0] }
  0x2d   :  { %v6771_v40 = vld [vmem:[#allocation5 + $0x280] sm:$0xf]  ;;  %v9603_v41 = vld [vmem:[#allocation5 + $0x28c] sm:$0xf0]  ;;  %v6644_v45 = vor.u32 %v9571_v39, %v6643_v37  ;;  %1435 = vmatpush.bf16.msra.mxu3 %v6916_v38  ;;  %v9581_v35 = vld [vmem:[#allocation5 + $0x1e4] sm:$0xf] }
  0x2e   :  { %v6899_v42 = vld [vmem:[#allocation5 + $0x380] sm:$0xf]  ;;  %v9635_v43 = vld [vmem:[#allocation5 + $0x38c] sm:$0xf0]  ;;  %v6772_v46 = vor.u32 %v9603_v41, %v6771_v40  ;;  %1394 = vmatpush.bf16.msra.mxu0 %v6516_v44  ;;  %v6693_v36 = vld [vmem:[#allocation5 + $0x1f0] sm:$0xf0] }
  0x2f   :  { %v6499_v47 = vld [vmem:[#allocation5 + $0x60] sm:$0xf]  ;;  %v9535_v48 = vld [vmem:[#allocation5 + $0x6c] sm:$0xf0]  ;;  %v6900_v50 = vor.u32 %v9635_v43, %v6899_v42  ;;  %1408 = vmatpush.bf16.msra.mxu1 %v6644_v45  ;;  %v9545_v45 = vld [vmem:[#allocation5 + $0xc4] sm:$0xf] }
  0x30   :  { %v6627_v49 = vld [vmem:[#allocation5 + $0x160] sm:$0xf]  ;;  %v9567_v51 = vld [vmem:[#allocation5 + $0x16c] sm:$0xf0]  ;;  %v6500_v56 = vor.u32 %v9535_v48, %v6499_v47  ;;  %1422 = vmatpush.bf16.msra.mxu2 %v6772_v46  ;;  %v6549_v46 = vld [vmem:[#allocation5 + $0xd0] sm:$0xf0] }
  0x31   :  { %v6755_v52 = vld [vmem:[#allocation5 + $0x260] sm:$0xf]  ;;  %v9599_v53 = vld [vmem:[#allocation5 + $0x26c] sm:$0xf0]  ;;  %v6628_v57 = vor.u32 %v9567_v51, %v6627_v49  ;;  %1436 = vmatpush.bf16.msra.mxu3 %v6900_v50  ;;  %v9577_v47 = vld [vmem:[#allocation5 + $0x1c4] sm:$0xf]  ;;  %v6568_v49 = vor.u32 %v9549_v32, %v6565_v33 }
  0x32   :  { %v6883_v54 = vld [vmem:[#allocation5 + $0x360] sm:$0xf]  ;;  %v9631_v55 = vld [vmem:[#allocation5 + $0x36c] sm:$0xf0]  ;;  %v6756_v58 = vor.u32 %v9599_v53, %v6755_v52  ;;  %1395 = vmatpush.bf16.msra.mxu0 %v6500_v56  ;;  %v6677_v50 = vld [vmem:[#allocation5 + $0x1d0] sm:$0xf0]  ;;  %v6696_v53 = vor.u32 %v9581_v35, %v6693_v36 }
  0x33   :  { %v6483_v59 = vld [vmem:[#allocation5 + $0x40] sm:$0xf]  ;;  %v9531_v60 = vld [vmem:[#allocation5 + $0x4c] sm:$0xf0]  ;;  %v6884_v62 = vor.u32 %v9631_v55, %v6883_v54  ;;  %1409 = vmatpush.bf16.msra.mxu1 %v6628_v57  ;;  %v10596_v56 = vld [vmem:[#allocation5 + $0xa4] sm:$0xf] }
  0x34   :  { %v6611_v61 = vld [vmem:[#allocation5 + $0x140] sm:$0xf]  ;;  %v9563_v63 = vld [vmem:[#allocation5 + $0x14c] sm:$0xf0]  ;;  %v6484_v4 = vor.u32 %v9531_v60, %v6483_v59  ;;  %1423 = vmatpush.bf16.msra.mxu2 %v6756_v58  ;;  %v6552_v59 = vor.u32 %v9545_v45, %v6549_v46  ;;  %v6533_v60 = vld [vmem:[#allocation5 + $0xb0] sm:$0xf0] }
  0x35   :  { %v6739_v0 = vld [vmem:[#allocation5 + $0x240] sm:$0xf]  ;;  %v9595_v1 = vld [vmem:[#allocation5 + $0x24c] sm:$0xf0]  ;;  %v6612_v6 = vor.u32 %v9563_v63, %v6611_v61  ;;  %1437 = vmatpush.bf16.msra.mxu3 %v6884_v62  ;;  %v132_v62 = vld [vmem:[#allocation2 + $0x8] sm:$0xff] }
  0x36   :  { %v6867_v2 = vld [vmem:[#allocation5 + $0x340] sm:$0xf]  ;;  %v9627_v3 = vld [vmem:[#allocation5 + $0x34c] sm:$0xf0]  ;;  %v6740_v7 = vor.u32 %v9595_v1, %v6739_v0  ;;  %1396 = vmatpush.bf16.msra.mxu0 %v6484_v4  ;;  %v137_v0 = vunpack.c.l.b16 %v132_v62  ;;  %v6645_v32 = vld [vmem:[#allocation5 + $0x190] sm:$0xf0] }
  0x37   :  { %v6467_v5 = vld [vmem:[#allocation5 + $0x20] sm:$0xf]  ;;  %v9527_v8 = vld [vmem:[#allocation5 + $0x2c] sm:$0xf0]  ;;  %v6868_v11 = vor.u32 %v9627_v3, %v6867_v2  ;;  %1410 = vmatpush.bf16.msra.mxu1 %v6612_v6  ;;  %v138_v2 = vunpack.c.h.b16 %v132_v62  ;;  %v6680_v3 = vor.u32 %v9577_v47, %v6677_v50  ;;  %v6536_v6 = vor.u32 %v10596_v56, %v6533_v60  ;;  %v6629_v56 = vld [vmem:[#allocation5 + $0x170] sm:$0xf0] }
  0x38   :  { %v6595_v9 = vld [vmem:[#allocation5 + $0x120] sm:$0xf]  ;;  %v9559_v10 = vld [vmem:[#allocation5 + $0x12c] sm:$0xf0]  ;;  %v6468_v18 = vor.u32 %v9527_v8, %v6467_v5  ;;  %1424 = vmatpush.bf16.msra.mxu2 %v6740_v7  ;;  %v9573_v7 = vld [vmem:[#allocation5 + $0x1a4] sm:$0xf] }
  0x39   :  { %v6723_v12 = vld [vmem:[#allocation5 + $0x220] sm:$0xf]  ;;  %v9591_v13 = vld [vmem:[#allocation5 + $0x22c] sm:$0xf0]  ;;  %v6596_v22 = vor.u32 %v9559_v10, %v6595_v9  ;;  %1438 = vmatpush.bf16.msra.mxu3 %v6868_v11  ;;  %v6661_v8 = vld [vmem:[#allocation5 + $0x1b0] sm:$0xf0]  ;;  %v10605_v10 = vpack.c.b16 %v137_v0, %v137_v0 }
  0x3a   :  { %v6851_v14 = vld [vmem:[#allocation5 + $0x320] sm:$0xf]  ;;  %v9623_v15 = vld [vmem:[#allocation5 + $0x32c] sm:$0xf0]  ;;  %v6724_v23 = vor.u32 %v9591_v13, %v6723_v12  ;;  %1397 = vmatpush.bf16.msra.mxu0 %v6468_v18 }
  0x3b   :  { %v6451_v16 = vld [vmem:[#allocation5] sm:$0xf]  ;;  %v9523_v17 = vld [vmem:[#allocation5 + $0xc] sm:$0xf0]  ;;  %v6852_v27 = vor.u32 %v9623_v15, %v6851_v14  ;;  %1411 = vmatpush.bf16.msra.mxu1 %v6596_v22  ;;  %v10609_v14 = vpack.c.b16 %v138_v2, %v138_v2 }
  0x3c   :  { %v6579_v19 = vld [vmem:[#allocation5 + $0x100] sm:$0xf]  ;;  %v9555_v20 = vld [vmem:[#allocation5 + $0x10c] sm:$0xf0]  ;;  %v6452_v34 = vor.u32 %v9523_v17, %v6451_v16  ;;  %1425 = vmatpush.bf16.msra.mxu2 %v6724_v23 }
  0x3d   :  { %v6707_v21 = vld [vmem:[#allocation5 + $0x200] sm:$0xf]  ;;  %v9587_v24 = vld [vmem:[#allocation5 + $0x20c] sm:$0xf0]  ;;  %v6580_v38 = vor.u32 %v9555_v20, %v6579_v19  ;;  %1439 = vmatpush.bf16.msra.mxu3 %v6852_v27  ;;  %v158_v19 = vshrl.u32 %v10605_v10, 16  ;;  %v161_v20 = vshll.u32 %v10605_v10, 16 }
  0x3e   :  { %v6835_v25 = vld [vmem:[#allocation5 + $0x300] sm:$0xf]  ;;  %v9619_v26 = vld [vmem:[#allocation5 + $0x30c] sm:$0xf0]  ;;  %v6708_v39 = vor.u32 %v9587_v24, %v6707_v21  ;;  %1398 = vmatpush.bf16.msra.mxu0 %v6452_v34  ;;  %v165_v24 = vshrl.u32 %v10609_v14, 16 }
  0x3f   :  { %v7075_v28 = vld [vmem:[#allocation5 + $0x4e0] sm:$0xf]  ;;  %v9679_v29 = vld [vmem:[#allocation5 + $0x4ec] sm:$0xf0]  ;;  %v6836_v43 = vor.u32 %v9619_v26, %v6835_v25  ;;  %1412 = vmatpush.bf16.msra.mxu1 %v6580_v38  ;;  %v168_v25 = vshll.u32 %v10609_v14, 16  ;;  %v6664_v26 = vor.u32 %v9573_v7, %v6661_v8 }
  0x40   :  { %v7203_v30 = vld [vmem:[#allocation5 + $0x5e0] sm:$0xf]  ;;  %v9711_v31 = vld [vmem:[#allocation5 + $0x5ec] sm:$0xf0]  ;;  %v7076_v44 = vor.u32 %v9679_v29, %v7075_v28  ;;  %1426 = vmatpush.bf16.msra.mxu2 %v6708_v39  ;;  %v9537_v27 = vld [vmem:[#allocation5 + $0x84] sm:$0xf] }
  0x41   :  { %v7059_v37 = vld [vmem:[#allocation5 + $0x4c0] sm:$0xf]  ;;  %v9675_v40 = vld [vmem:[#allocation5 + $0x4cc] sm:$0xf0]  ;;  %v7204_v48 = vor.u32 %v9711_v31, %v7203_v30  ;;  %1440 = vmatpush.bf16.msra.mxu3 %v6836_v43  ;;  %v6517_v28 = vld [vmem:[#allocation5 + $0x90] sm:$0xf0] }
  0x42   :  { %v7187_v41 = vld [vmem:[#allocation5 + $0x5c0] sm:$0xf]  ;;  %v9707_v42 = vld [vmem:[#allocation5 + $0x5cc] sm:$0xf0]  ;;  %v7060_v57 = vor.u32 %v9675_v40, %v7059_v37  ;;  %1447 = vmatpush.bf16.msrb.mxu0 %v7076_v44  ;;  %v160_v30 = vrot.slane %v158_v19, 7  ;;  %v167_v35 = vrot.slane %v165_v24, 7 }
  0x43   :  { %v10588_v51 = vld [vmem:[#allocation5 + $0x4a0] sm:$0xf]  ;;  %v10590_v52 = vld [vmem:[#allocation5 + $0x4ac] sm:$0xf0]  ;;  %v7188_v58 = vor.u32 %v9707_v42, %v7187_v41  ;;  %1461 = vmatpush.bf16.msrb.mxu1 %v7204_v48  ;;  %v9569_v31 = vld [vmem:[#allocation5 + $0x184] sm:$0xf]  ;;  %v6520_v42 = vor.u32 %v9537_v27, %v6517_v28 }
  0x44   :  { %v10592_v54 = vld [vmem:[#allocation5 + $0x5a0] sm:$0xf]  ;;  %v10594_v55 = vld [vmem:[#allocation5 + $0x5ac] sm:$0xf0]  ;;  %1475 = vmatpush.bf16.msrb.mxu2 %v6568_v49  ;;  %v7044_v4 = vor.u32 %v10590_v52, %v10588_v51  ;;  %v163_v40 = vor.u32 %v161_v20, %v160_v30  ;;  %v170_v47 = vor.u32 %v168_v25, %v167_v35  ;;  %v6648_v48 = vor.u32 %v9569_v31, %v6645_v32  ;;  %v9533_v51 = vld [vmem:[#allocation5 + $0x64] sm:$0xf] }
  0x45   :  { %v131_v61 = vld [vmem:[#allocation2] sm:$0xff]  ;;  %v7172_v5 = vor.u32 %v10594_v55, %v10592_v54  ;;  %1489 = vmatpush.bf16.msrb.mxu3 %v6696_v53  ;;  %v7027_v12 = vld [vmem:[#allocation5 + $0x480] sm:$0xf]  ;;  %v9565_v55 = vld [vmem:[#allocation5 + $0x164] sm:$0xf]  ;;  %v186_v30 = vrot.slane %v161_v20, 1 }
  0x46   :  { %v135_v63 = vunpack.c.l.b16 %v131_v61  ;;  %v136_v1 = vunpack.c.h.b16 %v131_v61  ;;  %v9667_v13 = vld [vmem:[#allocation5 + $0x48c] sm:$0xf0]  ;;  %1448 = vmatpush.bf16.msrb.mxu0 %v7060_v57  ;;  %v7155_v16 = vld [vmem:[#allocation5 + $0x580] sm:$0xf]  ;;  %v180_v50 = vsel %vm10628_vm2, 0, %v163_v40  ;;  %v188_v35 = vrot.slane %v168_v25, 1 }
  0x47   :  { %1462 = vmatpush.bf16.msrb.mxu1 %v7188_v58  ;;  %v9699_v21 = vld [vmem:[#allocation5 + $0x58c] sm:$0xf0]  ;;  %v7028_v37 = vor.u32 %v9667_v13, %v7027_v12  ;;  %v7011_v41 = vld [vmem:[#allocation5 + $0x460] sm:$0xf]  ;;  %v6501_v52 = vld [vmem:[#allocation5 + $0x70] sm:$0xf0]  ;;  %v213_v54 = vunpack.c.l.b16 %v180_v50  ;;  %v187_v20 = vor.u32 %v186_v30, %v158_v19 }
  0x48   :  { %v10603_v9 = vpack.c.b16 %v135_v63, %v135_v63  ;;  %v10607_v11 = vpack.c.b16 %v136_v1, %v136_v1  ;;  %v10611_v15 = vpack.c.b16 %v137_v0, %v135_v63  ;;  %1476 = vmatpush.bf16.msrb.mxu2 %v6552_v59  ;;  %v10636_v36 = vpack.c.b16 %v138_v2, %v136_v1  ;;  %v9663_v43 = vld [vmem:[#allocation5 + $0x46c] sm:$0xf0]  ;;  %v7139_v44 = vld [vmem:[#allocation5 + $0x560] sm:$0xf]  ;;  %v9529_v7 = vld [vmem:[#allocation5 + $0x44] sm:$0xf] }
  0x49   :  { %1490 = vmatpush.bf16.msrb.mxu3 %v6680_v3  ;;  %v7156_v38 = vor.u32 %v9699_v21, %v7155_v16  ;;  %v9695_v45 = vld [vmem:[#allocation5 + $0x56c] sm:$0xf0]  ;;  %v181_v58 = vsel %vm10628_vm2, 0, %v170_v47  ;;  %v7012_v59 = vor.u32 %v9663_v43, %v7011_v41  ;;  %v6995_v62 = vld [vmem:[#allocation5 + $0x440] sm:$0xf]  ;;  %v6504_v2 = vor.u32 %v9533_v51, %v6501_v52 }
  0x4a   :  { %v144_v17 = vshrl.u32 %v10603_v9, 16  ;;  %v147_v18 = vshll.u32 %v10603_v9, 16  ;;  %v151_v22 = vshrl.u32 %v10607_v11, 16  ;;  %v154_v23 = vshll.u32 %v10607_v11, 16  ;;  %1427 = vmatmul.bf16.vlgmr.msra.gmra.mxu2 %v10611_v15  ;;  %1449 = vmatpush.bf16.msrb.mxu0 %v7044_v4  ;;  %v9659_v63 = vld [vmem:[#allocation5 + $0x44c] sm:$0xf0] }
  0x4b   :  { %1463 = vmatpush.bf16.msrb.mxu1 %v7172_v5  ;;  %1441 = vmatmul.bf16.vlgmr.msra.gmra.mxu3 %v10636_v36  ;;  %v214_v61 = vunpack.c.l.b16 %v181_v58  ;;  %v7140_v1 = vor.u32 %v9695_v45, %v7139_v44  ;;  %v7123_v3 = vld [vmem:[#allocation5 + $0x540] sm:$0xf]  ;;  %v9691_v4 = vld [vmem:[#allocation5 + $0x54c] sm:$0xf0]  ;;  %v6632_v5 = vor.u32 %v9565_v55, %v6629_v56  ;;  %v6485_v8 = vld [vmem:[#allocation5 + $0x50] sm:$0xf0]  ;;  %v6996_v13 = vor.u32 %v9659_v63, %v6995_v62 }
  0x4c   :  { %v146_v29 = vrot.slane %v144_v17, 7  ;;  %v153_v34 = vrot.slane %v151_v22, 7  ;;  %1477 = vmatpush.bf16.msrb.mxu2 %v6536_v6  ;;  %v9561_v12 = vld [vmem:[#allocation5 + $0x144] sm:$0xf]  ;;  %v6613_v16 = vld [vmem:[#allocation5 + $0x150] sm:$0xf0]  ;;  %v7124_v27 = vor.u32 %v9691_v4, %v7123_v3  ;;  %v6488_v31 = vor.u32 %v9529_v7, %v6485_v8 }
  0x4d   :  { %1491 = vmatpush.bf16.msrb.mxu3 %v6664_v26  ;;  %v6979_v21 = vld [vmem:[#allocation5 + $0x420] sm:$0xf]  ;;  %v9655_v26 = vld [vmem:[#allocation5 + $0x42c] sm:$0xf0]  ;;  %v9557_v41 = vld [vmem:[#allocation5 + $0x124] sm:$0xf]  ;;  %v189_v43 = vor.u32 %v188_v35, %v165_v24 }
  0x4e   :  { %v149_v39 = vor.u32 %v147_v18, %v146_v29  ;;  %v156_v46 = vor.u32 %v154_v23, %v153_v34  ;;  %1450 = vmatpush.bf16.msrb.mxu0 %v7028_v37  ;;  %v7107_v28 = vld [vmem:[#allocation5 + $0x520] sm:$0xf]  ;;  %v182_v29 = vrot.slane %v147_v18, 1  ;;  %v9687_v32 = vld [vmem:[#allocation5 + $0x52c] sm:$0xf0]  ;;  %v184_v34 = vrot.slane %v154_v23, 1 }
  0x4f   :  { %1464 = vmatpush.bf16.msrb.mxu1 %v7156_v38  ;;  %v6616_v37 = vor.u32 %v9561_v12, %v6613_v16  ;;  %v9525_v38 = vld [vmem:[#allocation5 + $0x24] sm:$0xf]  ;;  %v6963_v23 = vld [vmem:[#allocation5 + $0x400] sm:$0xf]  ;;  %v6980_v44 = vor.u32 %v9655_v26, %v6979_v21  ;;  %v9651_v9 = vld [vmem:[#allocation5 + $0x40c] sm:$0xf0]  ;;  %v7108_v10 = vor.u32 %v9687_v32, %v7107_v28 }
  0x50   :  { %v178_v49 = vsel %vm10628_vm2, 0, %v149_v39  ;;  %v179_v57 = vsel %vm10628_vm2, 0, %v156_v46  ;;  %1478 = vmatpush.bf16.msrb.mxu2 %v6520_v42  ;;  %v6469_v39 = vld [vmem:[#allocation5 + $0x30] sm:$0xf0]  ;;  %v183_v18 = vor.u32 %v182_v29, %v144_v17  ;;  %v185_v25 = vor.u32 %v184_v34, %v151_v22  ;;  %v7091_v17 = vld [vmem:[#allocation5 + $0x500] sm:$0xf] }
  0x51   :  { %v209_v53 = vunpack.c.l.b16 %v178_v49  ;;  %v210_v60 = vunpack.c.l.b16 %v179_v57  ;;  %1492 = vmatpush.bf16.msrb.mxu3 %v6648_v48  ;;  %v6597_v42 = vld [vmem:[#allocation5 + $0x130] sm:$0xf0]  ;;  %v9683_v45 = vld [vmem:[#allocation5 + $0x50c] sm:$0xf0]  ;;  %v6472_v19 = vor.u32 %v9525_v38, %v6469_v39  ;;  %v9521_v46 = vld [vmem:[#allocation5 + $0x4] sm:$0xf] }
  0x52   :  { %1451 = vmatpush.bf16.msrb.mxu0 %v7012_v59  ;;  %v6453_v47 = vld [vmem:[#allocation5 + $0x10] sm:$0xf0]  ;;  %v197_v48 = vsel %vm10673_vm5, %v183_v18, 0  ;;  %v199_v11 = vsel %vm10673_vm5, %v187_v20, 0  ;;  %v6600_v14 = vor.u32 %v9557_v41, %v6597_v42  ;;  %v9553_v22 = vld [vmem:[#allocation5 + $0x104] sm:$0xf] }
  0x53   :  { %v10655_v0 = vpack.c.b16 %v213_v54, %v209_v53  ;;  %v10657_v6 = vpack.c.b16 %v214_v61, %v210_v60  ;;  %1465 = vmatpush.bf16.msrb.mxu1 %v7140_v1  ;;  %v6581_v24 = vld [vmem:[#allocation5 + $0x110] sm:$0xf0]  ;;  %v198_v49 = vsel %vm10673_vm5, %v185_v25, 0  ;;  %v200_v50 = vsel %vm10673_vm5, %v189_v43, 0  ;;  %v9613_v51 = vld [vmem:[#allocation5 + $0x2e4] sm:$0xf] }
  0x54   :  { %1479 = vmatpush.bf16.msrb.mxu2 %v6504_v2  ;;  %v6821_v52 = vld [vmem:[#allocation5 + $0x2f0] sm:$0xf0]  ;;  %v9645_v53 = vld [vmem:[#allocation5 + $0x3e4] sm:$0xf]  ;;  %v6964_v54 = vor.u32 %v9651_v9, %v6963_v23  ;;  %v211_v58 = vunpack.c.l.b16 %v197_v48  ;;  %v215_v59 = vunpack.c.l.b16 %v199_v11  ;;  %v7092_v60 = vor.u32 %v9683_v45, %v7091_v17 }
  0x55   :  { %1399 = vmatmul.bf16.vlgmr.msra.gmra.mxu0 %v10655_v0  ;;  %1413 = vmatmul.bf16.vlgmr.msra.gmra.mxu1 %v10657_v6  ;;  %v6949_v55 = vld [vmem:[#allocation5 + $0x3f0] sm:$0xf0]  ;;  %v9677_v56 = vld [vmem:[#allocation5 + $0x4e4] sm:$0xf]  ;;  %v6456_v61 = vor.u32 %v9521_v46, %v6453_v47  ;;  %v212_v1 = vunpack.c.l.b16 %v198_v49  ;;  %v216_v2 = vunpack.c.l.b16 %v200_v50  ;;  %v6584_v3 = vor.u32 %v9553_v22, %v6581_v24 }
  0x56   :  { %1493 = vmatpush.bf16.msrb.mxu3 %v6632_v5  ;;  %1452 = vmatpush.bf16.msrb.mxu0 %v6996_v13  ;;  %v7077_v57 = vld [vmem:[#allocation5 + $0x4f0] sm:$0xf0]  ;;  %v9709_v62 = vld [vmem:[#allocation5 + $0x5e4] sm:$0xf]  ;;  %v6824_v4 = vor.u32 %v9613_v51, %v6821_v52  ;;  %v6952_v5 = vor.u32 %v9645_v53, %v6949_v55  ;;  %v10689_v21 = vpack.c.b16 %v215_v59, %v211_v58 }
  0x57   :  { %1466 = vmatpush.bf16.msrb.mxu1 %v7124_v27  ;;  %v7205_v63 = vld [vmem:[#allocation5 + $0x5f0] sm:$0xf0]  ;;  %v7080_v7 = vor.u32 %v9677_v56, %v7077_v57  ;;  %v9609_v8 = vld [vmem:[#allocation5 + $0x2c4] sm:$0xf]  ;;  %v10691_v29 = vpack.c.b16 %v216_v2, %v212_v1 }
  0x58   :  { %1480 = vmatpush.bf16.msrb.mxu2 %v6488_v31  ;;  %v6805_v12 = vld [vmem:[#allocation5 + $0x2d0] sm:$0xf0]  ;;  %v9641_v13 = vld [vmem:[#allocation5 + $0x3c4] sm:$0xf]  ;;  %v7208_v16 = vor.u32 %v9709_v62, %v7205_v63 }
  0x59   :  { %v6933_v26 = vld [vmem:[#allocation5 + $0x3d0] sm:$0xf0]  ;;  %v9673_v27 = vld [vmem:[#allocation5 + $0x4c4] sm:$0xf]  ;;  %v6808_v32 = vor.u32 %v9609_v8, %v6805_v12 }
  0x5a   :  { %1494 = vmatpush.bf16.msrb.mxu3 %v6616_v37  ;;  %1453 = vmatpush.bf16.msrb.mxu0 %v6980_v44  ;;  %v7061_v28 = vld [vmem:[#allocation5 + $0x4d0] sm:$0xf0]  ;;  %v9705_v30 = vld [vmem:[#allocation5 + $0x5c4] sm:$0xf]  ;;  %v6936_v34 = vor.u32 %v9641_v13, %v6933_v26 }
  0x5b   :  { %1467 = vmatpush.bf16.msrb.mxu1 %v7108_v10  ;;  %v7189_v31 = vld [vmem:[#allocation5 + $0x5d0] sm:$0xf0]  ;;  %v7064_v35 = vor.u32 %v9673_v27, %v7061_v28  ;;  %v9605_v37 = vld [vmem:[#allocation5 + $0x2a4] sm:$0xf] }
  0x5c   :  { %1481 = vmatpush.bf16.msrb.mxu2 %v6472_v19  ;;  %v6789_v38 = vld [vmem:[#allocation5 + $0x2b0] sm:$0xf0]  ;;  %v9637_v39 = vld [vmem:[#allocation5 + $0x3a4] sm:$0xf]  ;;  %v7192_v18 = vor.u32 %v9705_v30, %v7189_v31 }
  0x5d   :  { %v6917_v20 = vld [vmem:[#allocation5 + $0x3b0] sm:$0xf0]  ;;  %v9669_v41 = vld [vmem:[#allocation5 + $0x4a4] sm:$0xf]  ;;  %v6792_v43 = vor.u32 %v9605_v37, %v6789_v38 }
  0x5e   :  { %1495 = vmatpush.bf16.msrb.mxu3 %v6600_v14  ;;  %1454 = vmatpush.bf16.msrb.mxu0 %v6964_v54  ;;  %v7045_v42 = vld [vmem:[#allocation5 + $0x4b0] sm:$0xf0]  ;;  %v9701_v23 = vld [vmem:[#allocation5 + $0x5a4] sm:$0xf]  ;;  %v6920_v44 = vor.u32 %v9637_v39, %v6917_v20 }
  0x5f   :  { %1468 = vmatpush.bf16.msrb.mxu1 %v7092_v60  ;;  %v7173_v25 = vld [vmem:[#allocation5 + $0x5b0] sm:$0xf0]  ;;  %v7048_v9 = vor.u32 %v9669_v41, %v7045_v42  ;;  %v9601_v17 = vld [vmem:[#allocation5 + $0x284] sm:$0xf] }
  0x60   :  { %1482 = vmatpush.bf16.msrb.mxu2 %v6456_v61  ;;  %v6773_v45 = vld [vmem:[#allocation5 + $0x290] sm:$0xf0]  ;;  %v9633_v10 = vld [vmem:[#allocation5 + $0x384] sm:$0xf]  ;;  %v7176_v19 = vor.u32 %v9701_v23, %v7173_v25 }
  0x61   :  { %v6901_v46 = vld [vmem:[#allocation5 + $0x390] sm:$0xf0]  ;;  %v9665_v47 = vld [vmem:[#allocation5 + $0x484] sm:$0xf]  ;;  %v6776_v22 = vor.u32 %v9601_v17, %v6773_v45  ;;  %v6571_v45 = vld [vmem:[#allocation5 + $0xe8] sm:$0xf] }
  0x62   :  { %1496 = vmatpush.bf16.msrb.mxu3 %v6584_v3  ;;  %1503 = vmatpush.bf16.msra.mxu0 %v6824_v4  ;;  %v7029_v48 = vld [vmem:[#allocation5 + $0x490] sm:$0xf0]  ;;  %v9697_v11 = vld [vmem:[#allocation5 + $0x584] sm:$0xf]  ;;  %v6904_v24 = vor.u32 %v9633_v10, %v6901_v46  ;;  %v9552_v10 = vld [vmem:[#allocation5 + $0xf4] sm:$0xf0] }
  0x63   :  { %1517 = vmatpush.bf16.msra.mxu1 %v6952_v5  ;;  %1483 = vmatmul.bf16.vlgmr.msrb.gmra.mxu2 %v10655_v0  ;;  %v7157_v14 = vld [vmem:[#allocation5 + $0x590] sm:$0xf0]  ;;  %v7032_v49 = vor.u32 %v9665_v47, %v7029_v48  ;;  %v9597_v50 = vld [vmem:[#allocation5 + $0x264] sm:$0xf]  ;;  %v9584_v47 = vld [vmem:[#allocation5 + $0x1f4] sm:$0xf0] }
  0x64   :  { %1531 = vmatpush.bf16.msra.mxu2 %v7080_v7  ;;  %v6757_v51 = vld [vmem:[#allocation5 + $0x270] sm:$0xf0]  ;;  %v9629_v52 = vld [vmem:[#allocation5 + $0x364] sm:$0xf]  ;;  %v7160_v53 = vor.u32 %v9697_v11, %v7157_v14  ;;  %v6827_v48 = vld [vmem:[#allocation5 + $0x2e8] sm:$0xf] }
  0x65   :  { %1455 = vmatmul.bf16.vlgmr.msrb.gmra.mxu0 %v10689_v21  ;;  %1469 = vmatmul.bf16.vlgmr.msrb.gmra.mxu1 %v10691_v29  ;;  %v6885_v54 = vld [vmem:[#allocation5 + $0x370] sm:$0xf0]  ;;  %v9661_v55 = vld [vmem:[#allocation5 + $0x464] sm:$0xf]  ;;  %v6760_v59 = vor.u32 %v9597_v50, %v6757_v51  ;;  %v9616_v11 = vld [vmem:[#allocation5 + $0x2f4] sm:$0xf0]  ;;  %v6572_v51 = vor.u32 %v9552_v10, %v6571_v45 }
  0x66   :  { %1545 = vmatpush.bf16.msra.mxu3 %v7208_v16  ;;  %1504 = vmatpush.bf16.msra.mxu0 %v6808_v32  ;;  %v7013_v56 = vld [vmem:[#allocation5 + $0x470] sm:$0xf0]  ;;  %v9693_v57 = vld [vmem:[#allocation5 + $0x564] sm:$0xf]  ;;  %v6888_v60 = vor.u32 %v9629_v52, %v6885_v54  ;;  %v6555_v54 = vld [vmem:[#allocation5 + $0xc8] sm:$0xf] }
  0x67   :  { %1497 = vmatmul.bf16.vlgmr.msrb.gmra.mxu3 %v10657_v6  ;;  %1518 = vmatpush.bf16.msra.mxu1 %v6936_v34  ;;  %v7141_v58 = vld [vmem:[#allocation5 + $0x570] sm:$0xf0]  ;;  %v7016_v61 = vor.u32 %v9661_v55, %v7013_v56  ;;  %v9593_v62 = vld [vmem:[#allocation5 + $0x244] sm:$0xf]  ;;  %v9548_v55 = vld [vmem:[#allocation5 + $0xd4] sm:$0xf0] }
  0x68   :  { %1532 = vmatpush.bf16.msra.mxu2 %v7064_v35  ;;  %v6741_v63 = vld [vmem:[#allocation5 + $0x250] sm:$0xf0]  ;;  %v9625_v1 = vld [vmem:[#allocation5 + $0x344] sm:$0xf]  ;;  %v7144_v2 = vor.u32 %v9693_v57, %v7141_v58  ;;  %v6683_v56 = vld [vmem:[#allocation5 + $0x1c8] sm:$0xf] }
  0x69   :  { %v6869_v3 = vld [vmem:[#allocation5 + $0x350] sm:$0xf0]  ;;  %v9657_v4 = vld [vmem:[#allocation5 + $0x444] sm:$0xf]  ;;  %v6744_v12 = vor.u32 %v9593_v62, %v6741_v63  ;;  %v9580_v58 = vld [vmem:[#allocation5 + $0x1d4] sm:$0xf0]  ;;  %v6556_v63 = vor.u32 %v9548_v55, %v6555_v54 }
  0x6a   :  { %1546 = vmatpush.bf16.msra.mxu3 %v7192_v18  ;;  %1505 = vmatpush.bf16.msra.mxu0 %v6792_v43  ;;  %v6997_v5 = vld [vmem:[#allocation5 + $0x450] sm:$0xf0]  ;;  %v9689_v7 = vld [vmem:[#allocation5 + $0x544] sm:$0xf]  ;;  %v6872_v13 = vor.u32 %v9625_v1, %v6869_v3  ;;  %v9644_v62 = vld [vmem:[#allocation5 + $0x3d4] sm:$0xf0]  ;;  %v6684_v1 = vor.u32 %v9580_v58, %v6683_v56 }
  0x6b   :  { %1519 = vmatpush.bf16.msra.mxu1 %v6920_v44  ;;  %v7125_v8 = vld [vmem:[#allocation5 + $0x550] sm:$0xf0]  ;;  %v7000_v16 = vor.u32 %v9657_v4, %v6997_v5  ;;  %v9589_v26 = vld [vmem:[#allocation5 + $0x224] sm:$0xf]  ;;  %v6539_v3 = vld [vmem:[#allocation5 + $0xa8] sm:$0xf] }
  0x6c   :  { %1533 = vmatpush.bf16.msra.mxu2 %v7048_v9  ;;  %v6725_v27 = vld [vmem:[#allocation5 + $0x230] sm:$0xf0]  ;;  %v9621_v28 = vld [vmem:[#allocation5 + $0x324] sm:$0xf]  ;;  %v7128_v30 = vor.u32 %v9689_v7, %v7125_v8  ;;  %v9544_v4 = vld [vmem:[#allocation5 + $0xb4] sm:$0xf0] }
  0x6d   :  { %v6853_v31 = vld [vmem:[#allocation5 + $0x330] sm:$0xf0]  ;;  %v9653_v32 = vld [vmem:[#allocation5 + $0x424] sm:$0xf]  ;;  %v6728_v38 = vor.u32 %v9589_v26, %v6725_v27  ;;  %v6667_v5 = vld [vmem:[#allocation5 + $0x1a8] sm:$0xf]  ;;  %v6540_v27 = vor.u32 %v9544_v4, %v6539_v3 }
  0x6e   :  { %1547 = vmatpush.bf16.msra.mxu3 %v7176_v19  ;;  %1506 = vmatpush.bf16.msra.mxu0 %v6776_v22  ;;  %v6981_v34 = vld [vmem:[#allocation5 + $0x430] sm:$0xf0]  ;;  %v9685_v35 = vld [vmem:[#allocation5 + $0x524] sm:$0xf]  ;;  %v6856_v20 = vor.u32 %v9621_v28, %v6853_v31  ;;  %v6699_v19 = vld [vmem:[#allocation5 + $0x1e8] sm:$0xf] }
  0x6f   :  { %1520 = vmatpush.bf16.msra.mxu1 %v6904_v24  ;;  %v7109_v37 = vld [vmem:[#allocation5 + $0x530] sm:$0xf0]  ;;  %v9585_v39 = vld [vmem:[#allocation5 + $0x204] sm:$0xf]  ;;  %v6984_v41 = vor.u32 %v9653_v32, %v6981_v34  ;;  %v6955_v24 = vld [vmem:[#allocation5 + $0x3e8] sm:$0xf]  ;;  %v6700_v52 = vor.u32 %v9584_v47, %v6699_v19 }
  0x70   :  { %1534 = vmatpush.bf16.msra.mxu2 %v7032_v49  ;;  %v6709_v18 = vld [vmem:[#allocation5 + $0x210] sm:$0xf0]  ;;  %v9617_v42 = vld [vmem:[#allocation5 + $0x304] sm:$0xf]  ;;  %v7112_v43 = vor.u32 %v9685_v35, %v7109_v37  ;;  %v9648_v49 = vld [vmem:[#allocation5 + $0x3f4] sm:$0xf0] }
  0x71   :  { %v6837_v23 = vld [vmem:[#allocation5 + $0x310] sm:$0xf0]  ;;  %v9649_v25 = vld [vmem:[#allocation5 + $0x404] sm:$0xf]  ;;  %v6712_v46 = vor.u32 %v9585_v39, %v6709_v18  ;;  %v6956_v57 = vor.u32 %v9648_v49, %v6955_v24  ;;  %v9576_v8 = vld [vmem:[#allocation5 + $0x1b4] sm:$0xf0] }
  0x72   :  { %1548 = vmatpush.bf16.msra.mxu3 %v7160_v53  ;;  %1507 = vmatpush.bf16.msra.mxu0 %v6760_v59  ;;  %v6965_v44 = vld [vmem:[#allocation5 + $0x410] sm:$0xf0]  ;;  %v9681_v9 = vld [vmem:[#allocation5 + $0x504] sm:$0xf]  ;;  %v6840_v14 = vor.u32 %v9617_v42, %v6837_v23  ;;  %v6828_v53 = vor.u32 %v9616_v11, %v6827_v48  ;;  %v6811_v59 = vld [vmem:[#allocation5 + $0x2c8] sm:$0xf]  ;;  %v6668_v28 = vor.u32 %v9576_v8, %v6667_v5 }
  0x73   :  { %1521 = vmatpush.bf16.msra.mxu1 %v6888_v60  ;;  %v7093_v17 = vld [vmem:[#allocation5 + $0x510] sm:$0xf0]  ;;  %v6968_v22 = vor.u32 %v9649_v25, %v6965_v44  ;;  %v9612_v60 = vld [vmem:[#allocation5 + $0x2d4] sm:$0xf0]  ;;  %v6523_v31 = vld [vmem:[#allocation5 + $0x88] sm:$0xf] }
  0x74   :  { %1535 = vmatpush.bf16.msra.mxu2 %v7016_v61  ;;  %v7096_v50 = vor.u32 %v9681_v9, %v7093_v17  ;;  %v6939_v61 = vld [vmem:[#allocation5 + $0x3c8] sm:$0xf]  ;;  %v9640_v26 = vld [vmem:[#allocation5 + $0x3b4] sm:$0xf0] }
  0x75   :  { %v6940_v7 = vor.u32 %v9644_v62, %v6939_v61  ;;  %v9540_v32 = vld [vmem:[#allocation5 + $0x94] sm:$0xf0]  ;;  %v6651_v34 = vld [vmem:[#allocation5 + $0x188] sm:$0xf] }
  0x76   :  { %1549 = vmatpush.bf16.msra.mxu3 %v7144_v2  ;;  %1508 = vmatpush.bf16.msra.mxu0 %v6744_v12  ;;  %v6812_v2 = vor.u32 %v9612_v60, %v6811_v59  ;;  %v6795_v12 = vld [vmem:[#allocation5 + $0x2a8] sm:$0xf]  ;;  %v9572_v37 = vld [vmem:[#allocation5 + $0x194] sm:$0xf0] }
  0x77   :  { %1522 = vmatpush.bf16.msra.mxu1 %v6872_v13  ;;  %v9608_v13 = vld [vmem:[#allocation5 + $0x2b4] sm:$0xf0]  ;;  %v6907_v18 = vld [vmem:[#allocation5 + $0x388] sm:$0xf]  ;;  %v6652_v42 = vor.u32 %v9572_v37, %v6651_v34 }
  0x78   :  { %1536 = vmatpush.bf16.msra.mxu2 %v7000_v16  ;;  %v6923_v16 = vld [vmem:[#allocation5 + $0x3a8] sm:$0xf]  ;;  %v9604_v39 = vld [vmem:[#allocation5 + $0x294] sm:$0xf0] }
  0x79   :  { %v6924_v35 = vor.u32 %v9640_v26, %v6923_v16  ;;  %v6507_v25 = vld [vmem:[#allocation5 + $0x68] sm:$0xf]  ;;  %v9568_v17 = vld [vmem:[#allocation5 + $0x174] sm:$0xf0] }
  0x7a   :  { %1550 = vmatpush.bf16.msra.mxu3 %v7128_v30  ;;  %1509 = vmatpush.bf16.msra.mxu0 %v6728_v38  ;;  %v6796_v30 = vor.u32 %v9608_v13, %v6795_v12  ;;  %v6779_v38 = vld [vmem:[#allocation5 + $0x288] sm:$0xf]  ;;  %v9600_v10 = vld [vmem:[#allocation5 + $0x274] sm:$0xf0] }
  0x7b   :  { %1523 = vmatpush.bf16.msra.mxu1 %v6856_v20  ;;  %v9636_v20 = vld [vmem:[#allocation5 + $0x394] sm:$0xf0]  ;;  %v6780_v23 = vor.u32 %v9604_v39, %v6779_v38  ;;  %v6635_v44 = vld [vmem:[#allocation5 + $0x168] sm:$0xf]  ;;  %v9550_v39 = vld [vmem:[#allocation5 + $0xec] sm:$0xf] }
  0x7c   :  { %1537 = vmatpush.bf16.msra.mxu2 %v6984_v41  ;;  %v6524_v41 = vor.u32 %v9540_v32, %v6523_v31  ;;  %v6908_v9 = vor.u32 %v9636_v20, %v6907_v18  ;;  %v6763_v45 = vld [vmem:[#allocation5 + $0x268] sm:$0xf]  ;;  %v6636_v48 = vor.u32 %v9568_v17, %v6635_v44  ;;  %v9628_v54 = vld [vmem:[#allocation5 + $0x354] sm:$0xf0]  ;;  %v6573_v18 = vld [vmem:[#allocation5 + $0xf8] sm:$0xf0] }
  0x7d   :  { %v6891_v19 = vld [vmem:[#allocation5 + $0x368] sm:$0xf]  ;;  %v6764_v11 = vor.u32 %v9600_v10, %v6763_v45  ;;  %v9528_v59 = vld [vmem:[#allocation5 + $0x34] sm:$0xf0] }
  0x7e   :  { %1551 = vmatpush.bf16.msra.mxu3 %v7112_v43  ;;  %1510 = vmatpush.bf16.msra.mxu0 %v6712_v46  ;;  %v9536_v43 = vld [vmem:[#allocation5 + $0x74] sm:$0xf0]  ;;  %v6619_v24 = vld [vmem:[#allocation5 + $0x148] sm:$0xf] }
  0x7f   :  { %1524 = vmatpush.bf16.msra.mxu1 %v6840_v14  ;;  %v9632_v46 = vld [vmem:[#allocation5 + $0x374] sm:$0xf0]  ;;  %v6508_v47 = vor.u32 %v9536_v43, %v6507_v25  ;;  %v6491_v14 = vld [vmem:[#allocation5 + $0x48] sm:$0xf] }
  0x80   :  { %1538 = vmatpush.bf16.msra.mxu2 %v6968_v22  ;;  %v9532_v22 = vld [vmem:[#allocation5 + $0x54] sm:$0xf0]  ;;  %v6892_v49 = vor.u32 %v9632_v46, %v6891_v19  ;;  %v6475_v58 = vld [vmem:[#allocation5 + $0x28] sm:$0xf] }
  0x81   :  { %1511 = vmatmul.bf16.vlgmr.msra.gmra.mxu0 %v10611_v15  ;;  %v6492_v55 = vor.u32 %v9532_v22, %v6491_v14  ;;  %v6603_v60 = vld [vmem:[#allocation5 + $0x128] sm:$0xf]  ;;  %v9560_v62 = vld [vmem:[#allocation5 + $0x134] sm:$0xf0]  ;;  %v6476_v4 = vor.u32 %v9528_v59, %v6475_v58  ;;  %v6685_v14 = vld [vmem:[#allocation5 + $0x1d8] sm:$0xf0] }
  0x82   :  { %1552 = vmatpush.bf16.msra.mxu3 %v7096_v50  ;;  %1559 = vmatpush.bf16.msrb.mxu0 %v6572_v51  ;;  %v9564_v50 = vld [vmem:[#allocation5 + $0x154] sm:$0xf0]  ;;  %v6747_v51 = vld [vmem:[#allocation5 + $0x248] sm:$0xf]  ;;  %v6604_v8 = vor.u32 %v9560_v62, %v6603_v60  ;;  %v6669_v58 = vld [vmem:[#allocation5 + $0x1b8] sm:$0xf0] }
  0x83   :  { %1573 = vmatpush.bf16.msrb.mxu1 %v6700_v52  ;;  %1539 = vmatmul.bf16.vlgmr.msra.gmra.mxu2 %v10689_v21  ;;  %v9596_v52 = vld [vmem:[#allocation5 + $0x254] sm:$0xf0]  ;;  %v6620_v56 = vor.u32 %v9564_v50, %v6619_v24  ;;  %v6459_v5 = vld [vmem:[#allocation5 + $0x8] sm:$0xf] }
  0x84   :  { %1587 = vmatpush.bf16.msrb.mxu2 %v6828_v53  ;;  %1525 = vmatmul.bf16.vlgmr.msra.gmra.mxu1 %v10636_v36  ;;  %v6875_v53 = vld [vmem:[#allocation5 + $0x348] sm:$0xf]  ;;  %v9624_v3 = vld [vmem:[#allocation5 + $0x334] sm:$0xf0] }
  0x85   :  { %1553 = vmatmul.bf16.vlgmr.msra.gmra.mxu3 %v10691_v29  ;;  %v6876_v61 = vor.u32 %v9628_v54, %v6875_v53  ;;  %v6587_v13 = vld [vmem:[#allocation5 + $0x108] sm:$0xf]  ;;  %v9556_v16 = vld [vmem:[#allocation5 + $0x114] sm:$0xf0] }
  0x86   :  { %1601 = vmatpush.bf16.msrb.mxu3 %v6956_v57  ;;  %1560 = vmatpush.bf16.msrb.mxu0 %v6556_v63  ;;  %v6748_v57 = vor.u32 %v9596_v52, %v6747_v51  ;;  %v6731_v63 = vld [vmem:[#allocation5 + $0x228] sm:$0xf]  ;;  %v9620_v31 = vld [vmem:[#allocation5 + $0x314] sm:$0xf0]  ;;  %v6588_v20 = vor.u32 %v9556_v16, %v6587_v13 }
  0x87   :  { %1574 = vmatpush.bf16.msrb.mxu1 %v6684_v1  ;;  %v9592_v1 = vld [vmem:[#allocation5 + $0x234] sm:$0xf0]  ;;  %v6715_v26 = vld [vmem:[#allocation5 + $0x208] sm:$0xf] }
  0x88   :  { %1588 = vmatpush.bf16.msrb.mxu2 %v6812_v2  ;;  %v6859_v2 = vld [vmem:[#allocation5 + $0x328] sm:$0xf]  ;;  %v6732_v12 = vor.u32 %v9592_v1, %v6731_v63  ;;  %v9680_v34 = vld [vmem:[#allocation5 + $0x4f4] sm:$0xf0] }
  0x89   :  { %v7083_v32 = vld [vmem:[#allocation5 + $0x4e8] sm:$0xf]  ;;  %v9712_v38 = vld [vmem:[#allocation5 + $0x5f4] sm:$0xf0] }
  0x8a   :  { %1602 = vmatpush.bf16.msrb.mxu3 %v6940_v7  ;;  %1561 = vmatpush.bf16.msrb.mxu0 %v6540_v27  ;;  %v9524_v7 = vld [vmem:[#allocation5 + $0x14] sm:$0xf0]  ;;  %v6860_v27 = vor.u32 %v9624_v3, %v6859_v2  ;;  %v7084_v43 = vor.u32 %v9680_v34, %v7083_v32  ;;  %v7067_v17 = vld [vmem:[#allocation5 + $0x4c8] sm:$0xf]  ;;  %v9534_v32 = vld [vmem:[#allocation5 + $0x6c] sm:$0xf] }
  0x8b   :  { %1575 = vmatpush.bf16.msrb.mxu1 %v6668_v28  ;;  %v9588_v28 = vld [vmem:[#allocation5 + $0x214] sm:$0xf0]  ;;  %v6460_v37 = vor.u32 %v9524_v7, %v6459_v5  ;;  %v7195_v10 = vld [vmem:[#allocation5 + $0x5c8] sm:$0xf]  ;;  %v6525_v5 = vld [vmem:[#allocation5 + $0x98] sm:$0xf0] }
  0x8c   :  { %1589 = vmatpush.bf16.msrb.mxu2 %v6796_v30  ;;  %v6843_v30 = vld [vmem:[#allocation5 + $0x308] sm:$0xf]  ;;  %v9676_v45 = vld [vmem:[#allocation5 + $0x4d4] sm:$0xf0]  ;;  %v9570_v7 = vld [vmem:[#allocation5 + $0x18c] sm:$0xf] }
  0x8d   :  { %v6844_v25 = vor.u32 %v9620_v31, %v6843_v30  ;;  %v9708_v46 = vld [vmem:[#allocation5 + $0x5d4] sm:$0xf0]  ;;  %v7068_v22 = vor.u32 %v9676_v45, %v7067_v17  ;;  %v7051_v50 = vld [vmem:[#allocation5 + $0x4a8] sm:$0xf]  ;;  %v6509_v34 = vld [vmem:[#allocation5 + $0x78] sm:$0xf0] }
  0x8e   :  { %1603 = vmatpush.bf16.msrb.mxu3 %v6924_v35  ;;  %1562 = vmatpush.bf16.msrb.mxu0 %v6524_v41  ;;  %v7211_v35 = vld [vmem:[#allocation5 + $0x5e8] sm:$0xf]  ;;  %v6716_v41 = vor.u32 %v9588_v28, %v6715_v26  ;;  %v7196_v24 = vor.u32 %v9708_v46, %v7195_v10  ;;  %v9672_v51 = vld [vmem:[#allocation5 + $0x4b4] sm:$0xf0]  ;;  %v6621_v17 = vld [vmem:[#allocation5 + $0x158] sm:$0xf0] }
  0x8f   :  { %1576 = vmatpush.bf16.msrb.mxu1 %v6652_v42  ;;  %v9582_v42 = vld [vmem:[#allocation5 + $0x1ec] sm:$0xf]  ;;  %v7212_v44 = vor.u32 %v9712_v38, %v7211_v35  ;;  %v7179_v52 = vld [vmem:[#allocation5 + $0x5a8] sm:$0xf]  ;;  %v9704_v54 = vld [vmem:[#allocation5 + $0x5b4] sm:$0xf0]  ;;  %v7052_v59 = vor.u32 %v9672_v51, %v7051_v50 }
  0x90   :  { %1590 = vmatpush.bf16.msrb.mxu2 %v6780_v23  ;;  %v6701_v23 = vld [vmem:[#allocation5 + $0x1f8] sm:$0xf0]  ;;  %v7180_v60 = vor.u32 %v9704_v54, %v7179_v52  ;;  %v7035_v62 = vld [vmem:[#allocation5 + $0x488] sm:$0xf]  ;;  %v9668_v63 = vld [vmem:[#allocation5 + $0x494] sm:$0xf0] }
  0x91   :  { %v6704_v19 = vor.u32 %v9582_v42, %v6701_v23  ;;  %v7163_v1 = vld [vmem:[#allocation5 + $0x588] sm:$0xf]  ;;  %v9700_v3 = vld [vmem:[#allocation5 + $0x594] sm:$0xf0]  ;;  %v9566_v35 = vld [vmem:[#allocation5 + $0x16c] sm:$0xf] }
  0x92   :  { %1604 = vmatpush.bf16.msrb.mxu3 %v6908_v9  ;;  %1563 = vmatpush.bf16.msrb.mxu0 %v6508_v47  ;;  %v6576_v9 = vor.u32 %v9550_v39, %v6573_v18  ;;  %v9546_v47 = vld [vmem:[#allocation5 + $0xcc] sm:$0xf]  ;;  %v7164_v13 = vor.u32 %v9700_v3, %v7163_v1  ;;  %v7019_v26 = vld [vmem:[#allocation5 + $0x468] sm:$0xf]  ;;  %v9696_v31 = vld [vmem:[#allocation5 + $0x574] sm:$0xf0]  ;;  %v6512_v18 = vor.u32 %v9534_v32, %v6509_v34 }
  0x93   :  { %1577 = vmatpush.bf16.msrb.mxu1 %v6636_v48  ;;  %v6557_v48 = vld [vmem:[#allocation5 + $0xd8] sm:$0xf0]  ;;  %v7147_v28 = vld [vmem:[#allocation5 + $0x568] sm:$0xf]  ;;  %v9642_v34 = vld [vmem:[#allocation5 + $0x3cc] sm:$0xf] }
  0x94   :  { %1591 = vmatpush.bf16.msrb.mxu2 %v6764_v11  ;;  %v9578_v11 = vld [vmem:[#allocation5 + $0x1cc] sm:$0xf]  ;;  %v7148_v39 = vor.u32 %v9696_v31, %v7147_v28  ;;  %v7131_v42 = vld [vmem:[#allocation5 + $0x548] sm:$0xf]  ;;  %v6605_v50 = vld [vmem:[#allocation5 + $0x138] sm:$0xf0] }
  0x95   :  { %v6688_v53 = vor.u32 %v9578_v11, %v6685_v14  ;;  %v6987_v46 = vld [vmem:[#allocation5 + $0x428] sm:$0xf]  ;;  %v9688_v14 = vld [vmem:[#allocation5 + $0x534] sm:$0xf0]  ;;  %v6829_v1 = vld [vmem:[#allocation5 + $0x2f8] sm:$0xf0] }
  0x96   :  { %1605 = vmatpush.bf16.msrb.mxu3 %v6892_v49  ;;  %1564 = vmatpush.bf16.msrb.mxu0 %v6492_v55  ;;  %v6560_v49 = vor.u32 %v9546_v47, %v6557_v48  ;;  %v9542_v55 = vld [vmem:[#allocation5 + $0xac] sm:$0xf]  ;;  %v9656_v47 = vld [vmem:[#allocation5 + $0x434] sm:$0xf0]  ;;  %v7115_v48 = vld [vmem:[#allocation5 + $0x528] sm:$0xf] }
  0x97   :  { %1578 = vmatpush.bf16.msrb.mxu1 %v6620_v56  ;;  %v6541_v56 = vld [vmem:[#allocation5 + $0xb8] sm:$0xf0]  ;;  %v6988_v51 = vor.u32 %v9656_v47, %v6987_v46  ;;  %v6971_v52 = vld [vmem:[#allocation5 + $0x408] sm:$0xf]  ;;  %v7116_v54 = vor.u32 %v9688_v14, %v7115_v48  ;;  %v9610_v31 = vld [vmem:[#allocation5 + $0x2cc] sm:$0xf] }
  0x98   :  { %1592 = vmatpush.bf16.msrb.mxu2 %v6748_v57  ;;  %v9574_v57 = vld [vmem:[#allocation5 + $0x1ac] sm:$0xf]  ;;  %v6813_v32 = vld [vmem:[#allocation5 + $0x2d8] sm:$0xf0] }
  0x99   :  { %v6672_v2 = vor.u32 %v9574_v57, %v6669_v58  ;;  %v9684_v57 = vld [vmem:[#allocation5 + $0x514] sm:$0xf0]  ;;  %v9522_v58 = vld [vmem:[#allocation5 + $0xc] sm:$0xf]  ;;  %v7181_v46 = vld [vmem:[#allocation5 + $0x5b8] sm:$0xf0] }
  0x9a   :  { %1606 = vmatpush.bf16.msrb.mxu3 %v6876_v61  ;;  %1565 = vmatpush.bf16.msrb.mxu0 %v6476_v4  ;;  %v6544_v61 = vor.u32 %v9542_v55, %v6541_v56  ;;  %v9538_v4 = vld [vmem:[#allocation5 + $0x8c] sm:$0xf]  ;;  %v7099_v56 = vld [vmem:[#allocation5 + $0x508] sm:$0xf] }
  0x9b   :  { %1579 = vmatpush.bf16.msrb.mxu1 %v6604_v8  ;;  %v6653_v8 = vld [vmem:[#allocation5 + $0x198] sm:$0xf0]  ;;  %v6528_v16 = vor.u32 %v9538_v4, %v6525_v5  ;;  %v9678_v5 = vld [vmem:[#allocation5 + $0x4ec] sm:$0xf] }
  0x9c   :  { %1593 = vmatpush.bf16.msrb.mxu2 %v6732_v12  ;;  %v7036_v12 = vor.u32 %v9668_v63, %v7035_v62  ;;  %v6656_v30 = vor.u32 %v9570_v7, %v6653_v8  ;;  %v6589_v62 = vld [vmem:[#allocation5 + $0x118] sm:$0xf0]  ;;  %v9614_v63 = vld [vmem:[#allocation5 + $0x2ec] sm:$0xf]  ;;  %v7100_v8 = vor.u32 %v9684_v57, %v7099_v56 }
  0x9d   :  { %v6957_v4 = vld [vmem:[#allocation5 + $0x3f8] sm:$0xf0]  ;;  %v9602_v14 = vld [vmem:[#allocation5 + $0x28c] sm:$0xf] }
  0x9e   :  { %1607 = vmatpush.bf16.msrb.mxu3 %v6860_v27  ;;  %1566 = vmatpush.bf16.msrb.mxu0 %v6460_v37  ;;  %v9664_v27 = vld [vmem:[#allocation5 + $0x474] sm:$0xf0]  ;;  %v6637_v37 = vld [vmem:[#allocation5 + $0x178] sm:$0xf0] }
  0x9f   :  { %1580 = vmatpush.bf16.msrb.mxu1 %v6588_v20  ;;  %v7020_v38 = vor.u32 %v9664_v27, %v7019_v26  ;;  %v7003_v20 = vld [vmem:[#allocation5 + $0x448] sm:$0xf]  ;;  %v6640_v23 = vor.u32 %v9566_v35, %v6637_v37  ;;  %v7085_v7 = vld [vmem:[#allocation5 + $0x4f8] sm:$0xf0]  ;;  %v6832_v27 = vor.u32 %v9614_v63, %v6829_v1  ;;  %v9662_v63 = vld [vmem:[#allocation5 + $0x46c] sm:$0xf] }
  0xa0   :  { %1594 = vmatpush.bf16.msrb.mxu2 %v6716_v41  ;;  %v9660_v41 = vld [vmem:[#allocation5 + $0x454] sm:$0xf0]  ;;  %v6941_v37 = vld [vmem:[#allocation5 + $0x3d8] sm:$0xf0] }
  0xa1   :  { %1567 = vmatmul.bf16.vlgmr.msrb.gmra.mxu0 %v10655_v0  ;;  %v7004_v45 = vor.u32 %v9660_v41, %v7003_v20  ;;  %v7197_v20 = vld [vmem:[#allocation5 + $0x5d8] sm:$0xf0]  ;;  %v6816_v41 = vor.u32 %v9610_v31, %v6813_v32  ;;  %v9690_v31 = vld [vmem:[#allocation5 + $0x54c] sm:$0xf] }
  0xa2   :  { %1608 = vmatpush.bf16.msrb.mxu3 %v6844_v25  ;;  %1615 = vmatpush.bf16.msra.mxu0 %v7084_v43  ;;  %v9692_v25 = vld [vmem:[#allocation5 + $0x554] sm:$0xf0]  ;;  %v9530_v43 = vld [vmem:[#allocation5 + $0x4c] sm:$0xf]  ;;  %v7021_v1 = vld [vmem:[#allocation5 + $0x478] sm:$0xf0] }
  0xa3   :  { %1629 = vmatpush.bf16.msra.mxu1 %v7212_v44  ;;  %1595 = vmatmul.bf16.vlgmr.msrb.gmra.mxu2 %v10611_v15  ;;  %v6493_v44 = vld [vmem:[#allocation5 + $0x58] sm:$0xf0]  ;;  %v7132_v10 = vor.u32 %v9692_v25, %v7131_v42  ;;  %v6944_v42 = vor.u32 %v9642_v34, %v6941_v37  ;;  %v9606_v25 = vld [vmem:[#allocation5 + $0x2ac] sm:$0xf] }
  0xa4   :  { %1643 = vmatpush.bf16.msra.mxu2 %v6576_v9  ;;  %1581 = vmatmul.bf16.vlgmr.msrb.gmra.mxu1 %v10657_v6  ;;  %v9562_v9 = vld [vmem:[#allocation5 + $0x14c] sm:$0xf]  ;;  %v7133_v32 = vld [vmem:[#allocation5 + $0x558] sm:$0xf0] }
  0xa5   :  { %1609 = vmatmul.bf16.vlgmr.msrb.gmra.mxu3 %v10636_v36  ;;  %v6624_v11 = vor.u32 %v9562_v9, %v6621_v17  ;;  %v6925_v17 = vld [vmem:[#allocation5 + $0x3b8] sm:$0xf0] }
  0xa6   :  { %1657 = vmatpush.bf16.msra.mxu3 %v6704_v19  ;;  %1616 = vmatpush.bf16.msra.mxu0 %v7068_v22  ;;  %v6496_v19 = vor.u32 %v9530_v43, %v6493_v44  ;;  %v9526_v22 = vld [vmem:[#allocation5 + $0x2c] sm:$0xf]  ;;  %v6797_v43 = vld [vmem:[#allocation5 + $0x2b8] sm:$0xf0] }
  0xa7   :  { %1630 = vmatpush.bf16.msra.mxu1 %v7196_v24  ;;  %v6477_v24 = vld [vmem:[#allocation5 + $0x38] sm:$0xf0]  ;;  %v9638_v44 = vld [vmem:[#allocation5 + $0x3ac] sm:$0xf]  ;;  %v6800_v47 = vor.u32 %v9606_v25, %v6797_v43 }
  0xa8   :  { %1644 = vmatpush.bf16.msra.mxu2 %v6560_v49  ;;  %v9558_v49 = vld [vmem:[#allocation5 + $0x12c] sm:$0xf]  ;;  %v6480_v55 = vor.u32 %v9526_v22, %v6477_v24  ;;  %v6928_v48 = vor.u32 %v9638_v44, %v6925_v17  ;;  %v6781_v22 = vld [vmem:[#allocation5 + $0x298] sm:$0xf0] }
  0xa9   :  { %v9634_v24 = vld [vmem:[#allocation5 + $0x38c] sm:$0xf]  ;;  %v6989_v25 = vld [vmem:[#allocation5 + $0x438] sm:$0xf0] }
  0xaa   :  { %1658 = vmatpush.bf16.msra.mxu3 %v6688_v53  ;;  %1617 = vmatpush.bf16.msra.mxu0 %v7052_v59  ;;  %v9652_v53 = vld [vmem:[#allocation5 + $0x414] sm:$0xf0]  ;;  %v6608_v59 = vor.u32 %v9558_v49, %v6605_v50  ;;  %v6909_v50 = vld [vmem:[#allocation5 + $0x398] sm:$0xf0]  ;;  %v9686_v43 = vld [vmem:[#allocation5 + $0x52c] sm:$0xf] }
  0xab   :  { %1631 = vmatpush.bf16.msra.mxu1 %v7180_v60  ;;  %v6461_v60 = vld [vmem:[#allocation5 + $0x18] sm:$0xf0]  ;;  %v6972_v3 = vor.u32 %v9652_v53, %v6971_v52  ;;  %v9698_v53 = vld [vmem:[#allocation5 + $0x58c] sm:$0xf]  ;;  %v6912_v56 = vor.u32 %v9634_v24, %v6909_v50 }
  0xac   :  { %1645 = vmatpush.bf16.msra.mxu2 %v6544_v61  ;;  %v9554_v61 = vld [vmem:[#allocation5 + $0x10c] sm:$0xf]  ;;  %v7037_v52 = vld [vmem:[#allocation5 + $0x498] sm:$0xf0] }
  0xad   :  { %v6592_v26 = vor.u32 %v9554_v61, %v6589_v62  ;;  %v6893_v62 = vld [vmem:[#allocation5 + $0x378] sm:$0xf0]  ;;  %v9682_v50 = vld [vmem:[#allocation5 + $0x50c] sm:$0xf] }
  0xae   :  { %1659 = vmatpush.bf16.msra.mxu3 %v6672_v2  ;;  %1618 = vmatpush.bf16.msra.mxu0 %v7036_v12  ;;  %v9646_v2 = vld [vmem:[#allocation5 + $0x3ec] sm:$0xf]  ;;  %v6464_v12 = vor.u32 %v9522_v58, %v6461_v60  ;;  %v7117_v44 = vld [vmem:[#allocation5 + $0x538] sm:$0xf0] }
  0xaf   :  { %1632 = vmatpush.bf16.msra.mxu1 %v7164_v13  ;;  %v9710_v13 = vld [vmem:[#allocation5 + $0x5ec] sm:$0xf]  ;;  %v6960_v28 = vor.u32 %v9646_v2, %v6957_v4  ;;  %v7120_v24 = vor.u32 %v9686_v43, %v7117_v44  ;;  %v9767_v44 = vld [vmem:[#allocation8 + $0x1ac] sm:$0xf0] }
  0xb0   :  { %1646 = vmatpush.bf16.msra.mxu2 %v6528_v16  ;;  %v7213_v16 = vld [vmem:[#allocation5 + $0x5f8] sm:$0xf0]  ;;  %v9598_v58 = vld [vmem:[#allocation5 + $0x26c] sm:$0xf] }
  0xb1   :  { %v7216_v35 = vor.u32 %v9710_v13, %v7213_v16  ;;  %v9630_v60 = vld [vmem:[#allocation5 + $0x36c] sm:$0xf]  ;;  %v6877_v16 = vld [vmem:[#allocation5 + $0x358] sm:$0xf0] }
  0xb2   :  { %1660 = vmatpush.bf16.msra.mxu3 %v6656_v30  ;;  %1619 = vmatpush.bf16.msra.mxu0 %v7020_v38  ;;  %v7088_v30 = vor.u32 %v9678_v5, %v7085_v7  ;;  %v9674_v38 = vld [vmem:[#allocation5 + $0x4cc] sm:$0xf]  ;;  %v6896_v7 = vor.u32 %v9630_v60, %v6893_v62 }
  0xb3   :  { %1633 = vmatpush.bf16.msra.mxu1 %v7148_v39  ;;  %v7069_v39 = vld [vmem:[#allocation5 + $0x4d8] sm:$0xf0]  ;;  %v9694_v2 = vld [vmem:[#allocation5 + $0x56c] sm:$0xf] }
  0xb4   :  { %1647 = vmatpush.bf16.msra.mxu2 %v6512_v18  ;;  %v9706_v18 = vld [vmem:[#allocation5 + $0x5cc] sm:$0xf] }
  0xb5   :  { %v7200_v9 = vor.u32 %v9706_v18, %v7197_v20  ;;  %v9594_v5 = vld [vmem:[#allocation5 + $0x24c] sm:$0xf]  ;;  %v6733_v18 = vld [vmem:[#allocation5 + $0x238] sm:$0xf0] }
  0xb6   :  { %1661 = vmatpush.bf16.msra.mxu3 %v6640_v23  ;;  %1620 = vmatpush.bf16.msra.mxu0 %v7004_v45  ;;  %v7072_v23 = vor.u32 %v9674_v38, %v7069_v39  ;;  %v9670_v45 = vld [vmem:[#allocation5 + $0x4ac] sm:$0xf] }
  0xb7   :  { %1634 = vmatpush.bf16.msra.mxu1 %v7132_v10  ;;  %v7053_v10 = vld [vmem:[#allocation5 + $0x4b8] sm:$0xf0]  ;;  %v9626_v13 = vld [vmem:[#allocation5 + $0x34c] sm:$0xf] }
  0xb8   :  { %1648 = vmatpush.bf16.msra.mxu2 %v6496_v19  ;;  %v9702_v19 = vld [vmem:[#allocation5 + $0x5ac] sm:$0xf]  ;;  %v6880_v37 = vor.u32 %v9626_v13, %v6877_v16  ;;  %v9739_v13 = vld [vmem:[#allocation8 + $0xcc] sm:$0xf0]  ;;  %v7443_v16 = vld [vmem:[#allocation8 + $0x1c0] sm:$0xf] }
  0xb9   :  { %v7184_v49 = vor.u32 %v9702_v19, %v7181_v46  ;;  %v9622_v20 = vld [vmem:[#allocation5 + $0x32c] sm:$0xf] }
  0xba   :  { %1662 = vmatpush.bf16.msra.mxu3 %v6624_v11  ;;  %1621 = vmatpush.bf16.msra.mxu0 %v6988_v51  ;;  %v7056_v11 = vor.u32 %v9670_v45, %v7053_v10  ;;  %v9666_v51 = vld [vmem:[#allocation5 + $0x48c] sm:$0xf]  ;;  %v6717_v10 = vld [vmem:[#allocation5 + $0x218] sm:$0xf0] }
  0xbb   :  { %1635 = vmatpush.bf16.msra.mxu1 %v7116_v54  ;;  %v7165_v54 = vld [vmem:[#allocation5 + $0x598] sm:$0xf0]  ;;  %v7040_v57 = vor.u32 %v9666_v51, %v7037_v52  ;;  %v9586_v45 = vld [vmem:[#allocation5 + $0x20c] sm:$0xf] }
  0xbc   :  { %1649 = vmatpush.bf16.msra.mxu2 %v6480_v55  ;;  %v6784_v55 = vor.u32 %v9602_v14, %v6781_v22  ;;  %v7168_v61 = vor.u32 %v9698_v53, %v7165_v54  ;;  %v6845_v14 = vld [vmem:[#allocation5 + $0x318] sm:$0xf0]  ;;  %v9650_v22 = vld [vmem:[#allocation5 + $0x40c] sm:$0xf]  ;;  %v7331_v53 = vld [vmem:[#allocation8 + $0xe0] sm:$0xf] }
  0xbd   :  { %v7101_v51 = vld [vmem:[#allocation5 + $0x518] sm:$0xf0]  ;;  %v9743_v54 = vld [vmem:[#allocation8 + $0xec] sm:$0xf0] }
  0xbe   :  { %1663 = vmatpush.bf16.msra.mxu3 %v6608_v59  ;;  %1622 = vmatpush.bf16.msra.mxu0 %v6972_v3  ;;  %v6765_v59 = vld [vmem:[#allocation5 + $0x278] sm:$0xf0] }
  0xbf   :  { %1636 = vmatpush.bf16.msra.mxu1 %v7100_v8  ;;  %v7149_v3 = vld [vmem:[#allocation5 + $0x578] sm:$0xf0]  ;;  %v6768_v4 = vor.u32 %v9598_v58, %v6765_v59  ;;  %v7024_v8 = vor.u32 %v9662_v63, %v7021_v1  ;;  %v7587_v58 = vld [vmem:[#allocation8 + $0x2e0] sm:$0xf]  ;;  %v9807_v59 = vld [vmem:[#allocation8 + $0x2ec] sm:$0xf0] }
  0xc0   :  { %1650 = vmatpush.bf16.msra.mxu2 %v6464_v12  ;;  %v6749_v12 = vld [vmem:[#allocation5 + $0x258] sm:$0xf0]  ;;  %v7715_v63 = vld [vmem:[#allocation8 + $0x3e0] sm:$0xf]  ;;  %v9839_v1 = vld [vmem:[#allocation8 + $0x3ec] sm:$0xf0] }
  0xc1   :  { %1623 = vmatmul.bf16.vlgmr.msra.gmra.mxu0 %v10689_v21  ;;  %v6752_v34 = vor.u32 %v9594_v5, %v6749_v12  ;;  %v7315_v12 = vld [vmem:[#allocation8 + $0xc0] sm:$0xf] }
  0xc2   :  { %1664 = vmatpush.bf16.msra.mxu3 %v6592_v26  ;;  %1671 = vmatpush.bf16.msrb.mxu0 %v6832_v27  ;;  %v7152_v26 = vor.u32 %v9694_v2, %v7149_v3  ;;  %v9658_v27 = vld [vmem:[#allocation5 + $0x44c] sm:$0xf]  ;;  %v7104_v3 = vor.u32 %v9682_v50, %v7101_v51  ;;  %v9795_v50 = vld [vmem:[#allocation8 + $0x28c] sm:$0xf0] }
  0xc3   :  { %1685 = vmatpush.bf16.msrb.mxu1 %v6960_v28  ;;  %1651 = vmatmul.bf16.vlgmr.msra.gmra.mxu2 %v10655_v0  ;;  %v7005_v28 = vld [vmem:[#allocation5 + $0x458] sm:$0xf0] }
  0xc4   :  { %1699 = vmatpush.bf16.msrb.mxu2 %v7088_v30  ;;  %1637 = vmatmul.bf16.vlgmr.msra.gmra.mxu1 %v10691_v29  ;;  %v10709_v30 = vld [vmem:[#allocation10] sm:$0xf]  ;;  %v7008_v38 = vor.u32 %v9658_v27, %v7005_v28  ;;  %v7716_v27 = vor.u32 %v9839_v1, %v7715_v63  ;;  %v9759_v1 = vld [vmem:[#allocation8 + $0x16c] sm:$0xf0] }
  0xc5   :  { %1665 = vmatmul.bf16.vlgmr.msra.gmra.mxu3 %v10657_v6  ;;  %v411_v39 = vperm.slane %v10709_v30, 0 }
  0xc6   :  { %1713 = vmatpush.bf16.msrb.mxu3 %v7216_v35  ;;  %1672 = vmatpush.bf16.msrb.mxu0 %v6816_v41  ;;  %v9590_v35 = vld [vmem:[#allocation5 + $0x22c] sm:$0xf]  ;;  %v7136_v41 = vor.u32 %v9690_v31, %v7133_v32  ;;  %v9771_v31 = vld [vmem:[#allocation8 + $0x1cc] sm:$0xf0]  ;;  %v7571_v32 = vld [vmem:[#allocation8 + $0x2c0] sm:$0xf] }
  0xc7   :  { %1686 = vmatpush.bf16.msrb.mxu1 %v6944_v42  ;;  %v6861_v42 = vld [vmem:[#allocation5 + $0x338] sm:$0xf0]  ;;  %v6736_v17 = vor.u32 %v9590_v35, %v6733_v18  ;;  %v7699_v35 = vld [vmem:[#allocation8 + $0x3c0] sm:$0xf]  ;;  %v7316_v18 = vor.u32 %v9739_v13, %v7315_v12 }
  0xc8   :  { %1700 = vmatpush.bf16.msrb.mxu2 %v7072_v23  ;;  %v9654_v23 = vld [vmem:[#allocation5 + $0x42c] sm:$0xf]  ;;  %v6864_v46 = vor.u32 %v9622_v20, %v6861_v42  ;;  %v7444_v20 = vor.u32 %v9771_v31, %v7443_v16  ;;  %v7299_v42 = vld [vmem:[#allocation8 + $0xa0] sm:$0xf]  ;;  %v9723_v16 = vld [vmem:[#allocation8 + $0x4c] sm:$0xf0] }
  0xc9   :  { %v7251_v13 = vld [vmem:[#allocation8 + $0x40] sm:$0xf]  ;;  %v9755_v31 = vld [vmem:[#allocation8 + $0x14c] sm:$0xf0] }
  0xca   :  { %1714 = vmatpush.bf16.msrb.mxu3 %v7200_v9  ;;  %1673 = vmatpush.bf16.msrb.mxu0 %v6800_v47  ;;  %v6992_v47 = vor.u32 %v9654_v23, %v6989_v25  ;;  %v9735_v23 = vld [vmem:[#allocation8 + $0xac] sm:$0xf0]  ;;  %v7427_v25 = vld [vmem:[#allocation8 + $0x1a0] sm:$0xf] }
  0xcb   :  { %1687 = vmatpush.bf16.msrb.mxu1 %v6928_v48 }
  0xcc   :  { %1701 = vmatpush.bf16.msrb.mxu2 %v7056_v11  ;;  %v9618_v11 = vld [vmem:[#allocation5 + $0x30c] sm:$0xf] }
  0xcd   :  { %v1428_v60 = vpop.f32.mrf.mxu2 }
  0xce   :  { %1715 = vmatpush.bf16.msrb.mxu3 %v7184_v49  ;;  %1674 = vmatpush.bf16.msrb.mxu0 %v6784_v55  ;;  %v6973_v49 = vld [vmem:[#allocation5 + $0x418] sm:$0xf0]  ;;  %v7459_v55 = vld [vmem:[#allocation8 + $0x1e0] sm:$0xf]  ;;  %v1442_v5 = vpop.f32.mrf.mxu3 }
  0xcf   :  { %1688 = vmatpush.bf16.msrb.mxu1 %v6912_v56  ;;  %v6720_v56 = vor.u32 %v9586_v45, %v6717_v10  ;;  %v6976_v62 = vor.u32 %v9650_v22, %v6973_v49  ;;  %v7683_v45 = vld [vmem:[#allocation8 + $0x3a0] sm:$0xf]  ;;  %v9831_v10 = vld [vmem:[#allocation8 + $0x3ac] sm:$0xf0] }
  0xd0   :  { %1702 = vmatpush.bf16.msrb.mxu2 %v7040_v57  ;;  %v9775_v57 = vld [vmem:[#allocation8 + $0x1ec] sm:$0xf0]  ;;  %v7684_v22 = vor.u32 %v9831_v10, %v7683_v45  ;;  %v7539_v49 = vld [vmem:[#allocation8 + $0x280] sm:$0xf] }
  0xd1   :  { %v7619_v45 = vld [vmem:[#allocation8 + $0x320] sm:$0xf]  ;;  %v9815_v10 = vld [vmem:[#allocation8 + $0x32c] sm:$0xf0] }
  0xd2   :  { %1716 = vmatpush.bf16.msrb.mxu3 %v7168_v61  ;;  %1675 = vmatpush.bf16.msrb.mxu0 %v6768_v4  ;;  %v1400_v9 = vpop.f32.mrf.mxu0  ;;  %v1414_v48 = vpop.f32.mrf.mxu1  ;;  %v6848_v61 = vor.u32 %v9618_v11, %v6845_v14  ;;  %v7332_v4 = vor.u32 %v9743_v54, %v7331_v53  ;;  %v9731_v11 = vld [vmem:[#allocation8 + $0x8c] sm:$0xf0]  ;;  %v7411_v14 = vld [vmem:[#allocation8 + $0x180] sm:$0xf] }
  0xd3   :  { %1689 = vmatpush.bf16.msrb.mxu1 %v6896_v7  ;;  %v1401_v19 = vadd.f32 %v1400_v9, %v411_v39  ;;  %v7460_v7 = vor.u32 %v9775_v57, %v7459_v55  ;;  %v7555_v9 = vld [vmem:[#allocation8 + $0x2a0] sm:$0xf]  ;;  %v9827_v53 = vld [vmem:[#allocation8 + $0x38c] sm:$0xf0]  ;;  %v7540_v57 = vor.u32 %v9795_v50, %v7539_v49  ;;  %v7620_v49 = vor.u32 %v9815_v10, %v7619_v45 }
  0xd4   :  { %1703 = vmatpush.bf16.msrb.mxu2 %v7024_v8  ;;  %v7588_v8 = vor.u32 %v9807_v59, %v7587_v58  ;;  %v7267_v59 = vld [vmem:[#allocation8 + $0x60] sm:$0xf]  ;;  %v9779_v50 = vld [vmem:[#allocation8 + $0x20c] sm:$0xf0] }
  0xd5   :  { %v1415_v52 = vadd.f32 %v1414_v48, %v1401_v19  ;;  %v7300_v19 = vor.u32 %v9735_v23, %v7299_v42  ;;  %v7283_v48 = vld [vmem:[#allocation8 + $0x80] sm:$0xf]  ;;  %v9719_v23 = vld [vmem:[#allocation8 + $0x2c] sm:$0xf0] }
  0xd6   :  { %1717 = vmatpush.bf16.msrb.mxu3 %v7152_v26  ;;  %1676 = vmatpush.bf16.msrb.mxu0 %v6752_v34  ;;  %v9803_v34 = vld [vmem:[#allocation8 + $0x2cc] sm:$0xf0]  ;;  %v7284_v55 = vor.u32 %v9731_v11, %v7283_v48  ;;  %v7235_v42 = vld [vmem:[#allocation8 + $0x20] sm:$0xf] }
  0xd7   :  { %1690 = vmatpush.bf16.msrb.mxu1 %v6880_v37  ;;  %v1429_v2 = vadd.f32 %v1428_v60, %v1415_v52  ;;  %v9835_v37 = vld [vmem:[#allocation8 + $0x3cc] sm:$0xf0]  ;;  %v7667_v52 = vld [vmem:[#allocation8 + $0x380] sm:$0xf] }
  0xd8   :  { %1704 = vmatpush.bf16.msrb.mxu2 %v7008_v38  ;;  %v7700_v43 = vor.u32 %v9835_v37, %v7699_v35  ;;  %v9727_v60 = vld [vmem:[#allocation8 + $0x6c] sm:$0xf0]  ;;  %v7635_v35 = vld [vmem:[#allocation8 + $0x340] sm:$0xf] }
  0xd9   :  { %v1443_v26 = vadd.f32 %v1442_v5, %v1429_v2  ;;  %v7523_v2 = vld [vmem:[#allocation8 + $0x260] sm:$0xf]  ;;  %v9823_v5 = vld [vmem:[#allocation8 + $0x36c] sm:$0xf0] }
  0xda   :  { %1718 = vmatpush.bf16.msrb.mxu3 %v7136_v41  ;;  %1677 = vmatpush.bf16.msrb.mxu0 %v6736_v17  ;;  %v10714_v28 = vpop.f32.mrf.mxu0  ;;  %v10716_v38 = vpop.f32.mrf.mxu1  ;;  %v7572_v41 = vor.u32 %v9803_v34, %v7571_v32  ;;  %v9799_v17 = vld [vmem:[#allocation8 + $0x2ac] sm:$0xf0]  ;;  %v7507_v32 = vld [vmem:[#allocation8 + $0x240] sm:$0xf] }
  0xdb   :  { %1691 = vmatpush.bf16.msrb.mxu1 %v6864_v46  ;;  %v7428_v46 = vor.u32 %v9767_v44, %v7427_v25  ;;  %v9787_v34 = vld [vmem:[#allocation8 + $0x24c] sm:$0xf0]  ;;  %v7363_v25 = vld [vmem:[#allocation8 + $0x120] sm:$0xf] }
  0xdc   :  { %1705 = vmatpush.bf16.msrb.mxu2 %v6992_v47  ;;  %v7556_v47 = vor.u32 %v9799_v17, %v7555_v9  ;;  %v9819_v37 = vld [vmem:[#allocation8 + $0x34c] sm:$0xf0]  ;;  %v7491_v9 = vld [vmem:[#allocation8 + $0x220] sm:$0xf] }
  0xdd   :  { %v9751_v44 = vld [vmem:[#allocation8 + $0x12c] sm:$0xf0] }
  0xde   :  { %1719 = vmatpush.bf16.msrb.mxu3 %v7120_v24  ;;  %1678 = vmatpush.bf16.msrb.mxu0 %v6720_v56  ;;  %v9763_v24 = vld [vmem:[#allocation8 + $0x18c] sm:$0xf0]  ;;  %v7364_v48 = vor.u32 %v9751_v44, %v7363_v25  ;;  %v9733_v25 = vld [vmem:[#allocation8 + $0xa4] sm:$0xf] }
  0xdf   :  { %1692 = vmatpush.bf16.msrb.mxu1 %v6848_v61  ;;  %v7412_v56 = vor.u32 %v9763_v24, %v7411_v14  ;;  %v7395_v61 = vld [vmem:[#allocation8 + $0x160] sm:$0xf]  ;;  %v9783_v17 = vld [vmem:[#allocation8 + $0x22c] sm:$0xf0]  ;;  %v9765_v44 = vld [vmem:[#allocation8 + $0x1a4] sm:$0xf] }
  0xe0   :  { %1706 = vmatpush.bf16.msrb.mxu2 %v6976_v62  ;;  %v7668_v62 = vor.u32 %v9827_v53, %v7667_v52  ;;  %v7492_v11 = vor.u32 %v9783_v17, %v7491_v9  ;;  %v7347_v14 = vld [vmem:[#allocation8 + $0x100] sm:$0xf]  ;;  %v9811_v52 = vld [vmem:[#allocation8 + $0x30c] sm:$0xf0]  ;;  %v7429_v9 = vld [vmem:[#allocation8 + $0x1b0] sm:$0xf0] }
  0xe1   :  { %1679 = vmatmul.bf16.vlgmr.msrb.gmra.mxu0 %v10611_v15  ;;  %v7475_v24 = vld [vmem:[#allocation8 + $0x200] sm:$0xf] }
  0xe2   :  { %1720 = vmatpush.bf16.msrb.mxu3 %v7104_v3  ;;  %2897 = vmatpush.bf16.msra.mxu0 %v7332_v4  ;;  %v1456_v51 = vpop.f32.mrf.mxu0  ;;  %v1470_v58 = vpop.f32.mrf.mxu1  ;;  %v9791_v3 = vld [vmem:[#allocation8 + $0x26c] sm:$0xf0]  ;;  %v7651_v4 = vld [vmem:[#allocation8 + $0x360] sm:$0xf] }
  0xe3   :  { %2911 = vmatpush.bf16.msra.mxu1 %v7460_v7  ;;  %1707 = vmatmul.bf16.vlgmr.msrb.gmra.mxu2 %v10689_v21  ;;  %v1457_v54 = vadd.f32 %v1456_v51, %v1443_v26  ;;  %v7268_v7 = vor.u32 %v9727_v60, %v7267_v59  ;;  %v7524_v12 = vor.u32 %v9791_v3, %v7523_v2  ;;  %v7379_v26 = vld [vmem:[#allocation8 + $0x140] sm:$0xf]  ;;  %v7333_v59 = vld [vmem:[#allocation8 + $0xf0] sm:$0xf0] }
  0xe4   :  { %2925 = vmatpush.bf16.msra.mxu2 %v7588_v8  ;;  %1693 = vmatmul.bf16.vlgmr.msrb.gmra.mxu1 %v10636_v36  ;;  %v7396_v8 = vor.u32 %v9759_v1, %v7395_v61  ;;  %v7603_v51 = vld [vmem:[#allocation8 + $0x300] sm:$0xf]  ;;  %v7476_v61 = vor.u32 %v9779_v50, %v7475_v24  ;;  %v7461_v1 = vld [vmem:[#allocation8 + $0x1f0] sm:$0xf0]  ;;  %v9761_v24 = vld [vmem:[#allocation8 + $0x184] sm:$0xf] }
  0xe5   :  { %1721 = vmatmul.bf16.vlgmr.msrb.gmra.mxu3 %v10691_v29  ;;  %v10722_v63 = vadd.f32 %v1470_v58, %v1457_v54  ;;  %v7843_v53 = vld [vmem:[#allocation8 + $0x4e0] sm:$0xf]  ;;  %v9871_v54 = vld [vmem:[#allocation8 + $0x4ec] sm:$0xf0]  ;;  %v9741_v58 = vld [vmem:[#allocation8 + $0xe4] sm:$0xf]  ;;  %v7604_v2 = vor.u32 %v9811_v52, %v7603_v51 }
  0xe6   :  { %2939 = vmatpush.bf16.msra.mxu3 %v7716_v27  ;;  %2898 = vmatpush.bf16.msra.mxu0 %v7316_v18  ;;  %v7652_v27 = vor.u32 %v9823_v5, %v7651_v4  ;;  %v7252_v18 = vor.u32 %v9723_v16, %v7251_v13  ;;  %v7844_v3 = vor.u32 %v9871_v54, %v7843_v53  ;;  %v9899_v16 = vld [vmem:[#allocation8 + $0x5cc] sm:$0xf0]  ;;  %v7779_v53 = vld [vmem:[#allocation8 + $0x460] sm:$0xf] }
  0xe7   :  { %2912 = vmatpush.bf16.msra.mxu1 %v7444_v20  ;;  %v7380_v20 = vor.u32 %v9755_v31, %v7379_v26  ;;  %v7336_v5 = vor.u32 %v9741_v58, %v7333_v59  ;;  %v9737_v26 = vld [vmem:[#allocation8 + $0xc4] sm:$0xf]  ;;  %v9855_v54 = vld [vmem:[#allocation8 + $0x46c] sm:$0xf0]  ;;  %v7269_v59 = vld [vmem:[#allocation8 + $0x70] sm:$0xf0] }
  0xe8   :  { %2926 = vmatpush.bf16.msra.mxu2 %v7572_v41  ;;  %v7508_v41 = vor.u32 %v9787_v34, %v7507_v32  ;;  %v9769_v31 = vld [vmem:[#allocation8 + $0x1c4] sm:$0xf]  ;;  %v7445_v32 = vld [vmem:[#allocation8 + $0x1d0] sm:$0xf0] }
  0xe9   :  { %v9725_v58 = vld [vmem:[#allocation8 + $0x64] sm:$0xf] }
  0xea   :  { %2940 = vmatpush.bf16.msra.mxu3 %v7700_v43  ;;  %2899 = vmatpush.bf16.msra.mxu0 %v7300_v19  ;;  %v7636_v43 = vor.u32 %v9819_v37, %v7635_v35  ;;  %v7236_v19 = vor.u32 %v9719_v23, %v7235_v42  ;;  %v7448_v42 = vor.u32 %v9769_v31, %v7445_v32  ;;  %v9895_v23 = vld [vmem:[#allocation8 + $0x5ac] sm:$0xf0] }
  0xeb   :  { %2913 = vmatpush.bf16.msra.mxu1 %v7428_v46  ;;  %v7219_v46 = vld [vmem:[#allocation8] sm:$0xf] }
  0xec   :  { %2927 = vmatpush.bf16.msra.mxu2 %v7556_v47  ;;  %v9715_v47 = vld [vmem:[#allocation8 + $0xc] sm:$0xf0] }
  0xee   :  { %2941 = vmatpush.bf16.msra.mxu3 %v7684_v22  ;;  %2900 = vmatpush.bf16.msra.mxu0 %v7284_v55  ;;  %v9747_v22 = vld [vmem:[#allocation8 + $0x10c] sm:$0xf0]  ;;  %v7971_v55 = vld [vmem:[#allocation8 + $0x5e0] sm:$0xf] }
  0xef   :  { %2914 = vmatpush.bf16.msra.mxu1 %v7412_v56  ;;  %v7220_v56 = vor.u32 %v9715_v47, %v7219_v46  ;;  %v7348_v60 = vor.u32 %v9747_v22, %v7347_v14  ;;  %v9859_v46 = vld [vmem:[#allocation8 + $0x48c] sm:$0xf0]  ;;  %v7923_v47 = vld [vmem:[#allocation8 + $0x580] sm:$0xf]  ;;  %v9729_v14 = vld [vmem:[#allocation8 + $0x84] sm:$0xf] }
  0xf0   :  { %2928 = vmatpush.bf16.msra.mxu2 %v7540_v57  ;;  %v9903_v57 = vld [vmem:[#allocation8 + $0x5ec] sm:$0xf0]  ;;  %v7285_v22 = vld [vmem:[#allocation8 + $0x90] sm:$0xf0] }
  0xf1   :  { %v7972_v4 = vor.u32 %v9903_v57, %v7971_v55  ;;  %v7288_v52 = vor.u32 %v9729_v14, %v7285_v22  ;;  %v7907_v55 = vld [vmem:[#allocation8 + $0x560] sm:$0xf]  ;;  %v9887_v57 = vld [vmem:[#allocation8 + $0x56c] sm:$0xf0]  ;;  %v7349_v14 = vld [vmem:[#allocation8 + $0x110] sm:$0xf0] }
  0xf2   :  { %2942 = vmatpush.bf16.msra.mxu3 %v7668_v62  ;;  %2901 = vmatpush.bf16.msra.mxu0 %v7268_v7  ;;  %v9773_v62 = vld [vmem:[#allocation8 + $0x1e4] sm:$0xf]  ;;  %v7827_v7 = vld [vmem:[#allocation8 + $0x4c0] sm:$0xf] }
  0xf3   :  { %2915 = vmatpush.bf16.msra.mxu1 %v7396_v8  ;;  %v9867_v8 = vld [vmem:[#allocation8 + $0x4cc] sm:$0xf0]  ;;  %v7464_v13 = vor.u32 %v9773_v62, %v7461_v1  ;;  %v7780_v62 = vor.u32 %v9855_v54, %v7779_v53  ;;  %v7908_v1 = vor.u32 %v9887_v57, %v7907_v55  ;;  %v9805_v22 = vld [vmem:[#allocation8 + $0x2e4] sm:$0xf]  ;;  %v7845_v55 = vld [vmem:[#allocation8 + $0x4f0] sm:$0xf0] }
  0xf4   :  { %2929 = vmatpush.bf16.msra.mxu2 %v7524_v12  ;;  %v7955_v12 = vld [vmem:[#allocation8 + $0x5c0] sm:$0xf]  ;;  %v7828_v34 = vor.u32 %v9867_v8, %v7827_v7  ;;  %v9883_v8 = vld [vmem:[#allocation8 + $0x54c] sm:$0xf0]  ;;  %v7973_v57 = vld [vmem:[#allocation8 + $0x5f0] sm:$0xf0] }
  0xf5   :  { %v7956_v35 = vor.u32 %v9899_v16, %v7955_v12  ;;  %v9721_v12 = vld [vmem:[#allocation8 + $0x44] sm:$0xf] }
  0xf6   :  { %2943 = vmatpush.bf16.msra.mxu3 %v7652_v27  ;;  %2902 = vmatpush.bf16.msra.mxu0 %v7252_v18  ;;  %v7317_v27 = vld [vmem:[#allocation8 + $0xd0] sm:$0xf0]  ;;  %v7811_v18 = vld [vmem:[#allocation8 + $0x4a0] sm:$0xf]  ;;  %v9753_v16 = vld [vmem:[#allocation8 + $0x144] sm:$0xf] }
  0xf7   :  { %2916 = vmatpush.bf16.msra.mxu1 %v7380_v20  ;;  %v7320_v37 = vor.u32 %v9737_v26, %v7317_v27  ;;  %v9863_v20 = vld [vmem:[#allocation8 + $0x4ac] sm:$0xf0]  ;;  %v7381_v26 = vld [vmem:[#allocation8 + $0x150] sm:$0xf0] }
  0xf8   :  { %2930 = vmatpush.bf16.msra.mxu2 %v7508_v41  ;;  %v7939_v41 = vld [vmem:[#allocation8 + $0x5a0] sm:$0xf]  ;;  %v7812_v17 = vor.u32 %v9863_v20, %v7811_v18  ;;  %v7384_v18 = vor.u32 %v9753_v16, %v7381_v26  ;;  %v9879_v20 = vld [vmem:[#allocation8 + $0x52c] sm:$0xf0]  ;;  %v9797_v26 = vld [vmem:[#allocation8 + $0x2a4] sm:$0xf] }
  0xf9   :  { %v7940_v45 = vor.u32 %v9895_v23, %v7939_v41  ;;  %v9717_v41 = vld [vmem:[#allocation8 + $0x24] sm:$0xf] }
  0xfa   :  { %2944 = vmatpush.bf16.msra.mxu3 %v7636_v43  ;;  %2903 = vmatpush.bf16.msra.mxu0 %v7236_v19  ;;  %v7301_v43 = vld [vmem:[#allocation8 + $0xb0] sm:$0xf0]  ;;  %v7795_v19 = vld [vmem:[#allocation8 + $0x480] sm:$0xf]  ;;  %v9749_v23 = vld [vmem:[#allocation8 + $0x124] sm:$0xf] }
  0xfb   :  { %2917 = vmatpush.bf16.msra.mxu1 %v7364_v48  ;;  %v7304_v10 = vor.u32 %v9733_v25, %v7301_v43  ;;  %v7432_v48 = vor.u32 %v9765_v44, %v7429_v9  ;;  %v7796_v50 = vor.u32 %v9859_v46, %v7795_v19  ;;  %v7365_v25 = vld [vmem:[#allocation8 + $0x130] sm:$0xf0]  ;;  %v7731_v44 = vld [vmem:[#allocation8 + $0x400] sm:$0xf]  ;;  %v9875_v19 = vld [vmem:[#allocation8 + $0x50c] sm:$0xf0] }
  0xfc   :  { %2931 = vmatpush.bf16.msra.mxu2 %v7492_v11  ;;  %v9891_v11 = vld [vmem:[#allocation8 + $0x58c] sm:$0xf0]  ;;  %v7368_v46 = vor.u32 %v9749_v23, %v7365_v25  ;;  %v10732_v23 = vpop.f32.mrf.mxu3 }
  0xfd   :  { %v7924_v51 = vor.u32 %v9891_v11, %v7923_v47  ;;  %v9713_v47 = vld [vmem:[#allocation8 + $0x4] sm:$0xf] }
  0xfe   :  { %2945 = vmatpush.bf16.msra.mxu3 %v7620_v49  ;;  %2904 = vmatpush.bf16.msra.mxu0 %v7220_v56  ;;  %v7413_v49 = vld [vmem:[#allocation8 + $0x190] sm:$0xf0]  ;;  %v9745_v11 = vld [vmem:[#allocation8 + $0x104] sm:$0xf] }
  0xff   :  { %2918 = vmatpush.bf16.msra.mxu1 %v7348_v60  ;;  %v7416_v56 = vor.u32 %v9761_v24, %v7413_v49  ;;  %v9757_v60 = vld [vmem:[#allocation8 + $0x164] sm:$0xf]  ;;  %v7589_v24 = vld [vmem:[#allocation8 + $0x2f0] sm:$0xf0] }
 0x100   :  { %2932 = vmatpush.bf16.msra.mxu2 %v7476_v61  ;;  %v7397_v61 = vld [vmem:[#allocation8 + $0x170] sm:$0xf0] }
 0x101   :  { %2905 = vmatmul.bf16.vlgmr.msra.gmra.mxu0 %v10655_v0  ;;  %v7400_v7 = vor.u32 %v9757_v60, %v7397_v61  ;;  %v9801_v61 = vld [vmem:[#allocation8 + $0x2c4] sm:$0xf] }
 0x102   :  { %2946 = vmatpush.bf16.msra.mxu3 %v7604_v2  ;;  %2953 = vmatpush.bf16.msrb.mxu0 %v7844_v3  ;;  %v7272_v2 = vor.u32 %v9725_v58, %v7269_v59  ;;  %v7763_v3 = vld [vmem:[#allocation8 + $0x440] sm:$0xf]  ;;  %v7352_v58 = vor.u32 %v9745_v11, %v7349_v14  ;;  %v7592_v59 = vor.u32 %v9805_v22, %v7589_v24  ;;  %v7925_v11 = vld [vmem:[#allocation8 + $0x590] sm:$0xf0]  ;;  %v9789_v24 = vld [vmem:[#allocation8 + $0x264] sm:$0xf] }
 0x103   :  { %2967 = vmatpush.bf16.msrb.mxu1 %v7972_v4  ;;  %2933 = vmatmul.bf16.vlgmr.msra.gmra.mxu2 %v10611_v15  ;;  %v9851_v4 = vld [vmem:[#allocation8 + $0x44c] sm:$0xf0] }
 0x104   :  { %2981 = vmatpush.bf16.msrb.mxu2 %v7336_v5  ;;  %2919 = vmatmul.bf16.vlgmr.msra.gmra.mxu1 %v10657_v6  ;;  %v7891_v5 = vld [vmem:[#allocation8 + $0x540] sm:$0xf]  ;;  %v7764_v27 = vor.u32 %v9851_v4, %v7763_v3  ;;  %v9833_v3 = vld [vmem:[#allocation8 + $0x3c4] sm:$0xf]  ;;  %v7701_v4 = vld [vmem:[#allocation8 + $0x3d0] sm:$0xf0] }
 0x105   :  { %2947 = vmatmul.bf16.vlgmr.msra.gmra.mxu3 %v10636_v36  ;;  %v7892_v31 = vor.u32 %v9883_v8, %v7891_v5  ;;  %v9865_v5 = vld [vmem:[#allocation8 + $0x4c4] sm:$0xf]  ;;  %v7704_v16 = vor.u32 %v9833_v3, %v7701_v4 }
 0x106   :  { %2995 = vmatpush.bf16.msrb.mxu3 %v7464_v13  ;;  %2954 = vmatpush.bf16.msrb.mxu0 %v7828_v34  ;;  %v7253_v13 = vld [vmem:[#allocation8 + $0x50] sm:$0xf0]  ;;  %v7747_v34 = vld [vmem:[#allocation8 + $0x420] sm:$0xf]  ;;  %v9897_v8 = vld [vmem:[#allocation8 + $0x5c4] sm:$0xf] }
 0x107   :  { %2968 = vmatpush.bf16.msrb.mxu1 %v7956_v35  ;;  %v7256_v32 = vor.u32 %v9721_v12, %v7253_v13  ;;  %v9847_v35 = vld [vmem:[#allocation8 + $0x42c] sm:$0xf0]  ;;  %v7957_v12 = vld [vmem:[#allocation8 + $0x5d0] sm:$0xf0]  ;;  %v9817_v4 = vld [vmem:[#allocation8 + $0x344] sm:$0xf] }
 0x108   :  { %2982 = vmatpush.bf16.msrb.mxu2 %v7320_v37  ;;  %v7875_v37 = vld [vmem:[#allocation8 + $0x520] sm:$0xf]  ;;  %v7748_v43 = vor.u32 %v9847_v35, %v7747_v34  ;;  %v7960_v34 = vor.u32 %v9897_v8, %v7957_v12  ;;  %v9829_v35 = vld [vmem:[#allocation8 + $0x3a4] sm:$0xf]  ;;  %v10740_v8 = vpop.f32.mrf.mxu0  ;;  %v7765_v12 = vld [vmem:[#allocation8 + $0x450] sm:$0xf0] }
 0x109   :  { %v7876_v9 = vor.u32 %v9879_v20, %v7875_v37  ;;  %v7685_v37 = vld [vmem:[#allocation8 + $0x3b0] sm:$0xf0] }
 0x10a   :  { %2996 = vmatpush.bf16.msrb.mxu3 %v7448_v42  ;;  %2955 = vmatpush.bf16.msrb.mxu0 %v7812_v17  ;;  %v7237_v42 = vld [vmem:[#allocation8 + $0x30] sm:$0xf0] }
 0x10b   :  { %2969 = vmatpush.bf16.msrb.mxu1 %v7940_v45  ;;  %v7240_v17 = vor.u32 %v9717_v41, %v7237_v42  ;;  %v9843_v45 = vld [vmem:[#allocation8 + $0x40c] sm:$0xf0]  ;;  %v7813_v20 = vld [vmem:[#allocation8 + $0x4b0] sm:$0xf0]  ;;  %v9893_v41 = vld [vmem:[#allocation8 + $0x5a4] sm:$0xf] }
 0x10c   :  { %2983 = vmatpush.bf16.msrb.mxu2 %v7304_v10  ;;  %v7859_v10 = vld [vmem:[#allocation8 + $0x500] sm:$0xf]  ;;  %v7732_v49 = vor.u32 %v9843_v45, %v7731_v44  ;;  %v7941_v42 = vld [vmem:[#allocation8 + $0x5b0] sm:$0xf0]  ;;  %v9793_v44 = vld [vmem:[#allocation8 + $0x284] sm:$0xf] }
 0x10d   :  { %v7860_v53 = vor.u32 %v9875_v19, %v7859_v10  ;;  %v7944_v45 = vor.u32 %v9893_v41, %v7941_v42  ;;  %v9825_v10 = vld [vmem:[#allocation8 + $0x384] sm:$0xf]  ;;  %v7669_v19 = vld [vmem:[#allocation8 + $0x390] sm:$0xf0] }
 0x10e   :  { %2997 = vmatpush.bf16.msrb.mxu3 %v7432_v48  ;;  %2956 = vmatpush.bf16.msrb.mxu0 %v7796_v50  ;;  %v7221_v48 = vld [vmem:[#allocation8 + $0x10] sm:$0xf0]  ;;  %v9837_v50 = vld [vmem:[#allocation8 + $0x3e4] sm:$0xf]  ;;  %v7672_v22 = vor.u32 %v9825_v10, %v7669_v19 }
 0x10f   :  { %2970 = vmatpush.bf16.msrb.mxu1 %v7924_v51  ;;  %v7717_v51 = vld [vmem:[#allocation8 + $0x3f0] sm:$0xf0]  ;;  %v7224_v54 = vor.u32 %v9713_v47, %v7221_v48  ;;  %v9889_v48 = vld [vmem:[#allocation8 + $0x584] sm:$0xf] }
 0x110   :  { %2984 = vmatpush.bf16.msrb.mxu2 %v7288_v52  ;;  %v9869_v52 = vld [vmem:[#allocation8 + $0x4e4] sm:$0xf]  ;;  %v7720_v60 = vor.u32 %v9837_v50, %v7717_v51  ;;  %v7797_v47 = vld [vmem:[#allocation8 + $0x490] sm:$0xf0] }
 0x111   :  { %v7621_v41 = vld [vmem:[#allocation8 + $0x330] sm:$0xf0]  ;;  %v9845_v42 = vld [vmem:[#allocation8 + $0x424] sm:$0xf] }
 0x112   :  { %2998 = vmatpush.bf16.msrb.mxu3 %v7416_v56  ;;  %2957 = vmatpush.bf16.msrb.mxu0 %v7780_v62  ;;  %v9901_v56 = vld [vmem:[#allocation8 + $0x5e4] sm:$0xf]  ;;  %v7573_v62 = vld [vmem:[#allocation8 + $0x2d0] sm:$0xf0] }
 0x113   :  { %2971 = vmatpush.bf16.msrb.mxu1 %v7908_v1  ;;  %v7848_v1 = vor.u32 %v9869_v52, %v7845_v55  ;;  %v7576_v13 = vor.u32 %v9801_v61, %v7573_v62  ;;  %v7928_v52 = vor.u32 %v9889_v48, %v7925_v11  ;;  %v9853_v55 = vld [vmem:[#allocation8 + $0x464] sm:$0xf]  ;;  %v7477_v10 = vld [vmem:[#allocation8 + $0x210] sm:$0xf0] }
 0x114   :  { %2985 = vmatpush.bf16.msrb.mxu2 %v7272_v2  ;;  %v7976_v2 = vor.u32 %v9901_v56, %v7973_v57  ;;  %v7781_v56 = vld [vmem:[#allocation8 + $0x470] sm:$0xf0]  ;;  %v9885_v57 = vld [vmem:[#allocation8 + $0x564] sm:$0xf] }
 0x115   :  { %v9785_v62 = vld [vmem:[#allocation8 + $0x244] sm:$0xf] }
 0x116   :  { %2999 = vmatpush.bf16.msrb.mxu3 %v7400_v7  ;;  %2958 = vmatpush.bf16.msrb.mxu0 %v7764_v27  ;;  %v7829_v7 = vld [vmem:[#allocation8 + $0x4d0] sm:$0xf0]  ;;  %v9841_v48 = vld [vmem:[#allocation8 + $0x404] sm:$0xf] }
 0x117   :  { %2972 = vmatpush.bf16.msrb.mxu1 %v7892_v31  ;;  %v7557_v27 = vld [vmem:[#allocation8 + $0x2b0] sm:$0xf0]  ;;  %v10728_v31 = vpop.f32.mrf.mxu2 }
 0x118   :  { %2986 = vmatpush.bf16.msrb.mxu2 %v7256_v32  ;;  %v7832_v32 = vor.u32 %v9865_v5, %v7829_v7  ;;  %v7560_v25 = vor.u32 %v9797_v26, %v7557_v27  ;;  %v7637_v5 = vld [vmem:[#allocation8 + $0x350] sm:$0xf0]  ;;  %v9849_v7 = vld [vmem:[#allocation8 + $0x444] sm:$0xf]  ;;  %v10742_v27 = vpop.f32.mrf.mxu1 }
 0x11a   :  { %3000 = vmatpush.bf16.msrb.mxu3 %v7384_v18  ;;  %2959 = vmatpush.bf16.msrb.mxu0 %v7748_v43  ;;  %v9861_v18 = vld [vmem:[#allocation8 + $0x4a4] sm:$0xf]  ;;  %v7688_v43 = vor.u32 %v9829_v35, %v7685_v37  ;;  %v7493_v35 = vld [vmem:[#allocation8 + $0x230] sm:$0xf0]  ;;  %v7768_v37 = vor.u32 %v9849_v7, %v7765_v12 }
 0x11b   :  { %2973 = vmatpush.bf16.msrb.mxu1 %v7876_v9  ;;  %v7541_v9 = vld [vmem:[#allocation8 + $0x290] sm:$0xf0] }
 0x11c   :  { %2987 = vmatpush.bf16.msrb.mxu2 %v7240_v17  ;;  %v7816_v17 = vor.u32 %v9861_v18, %v7813_v20  ;;  %v7544_v14 = vor.u32 %v9793_v44, %v7541_v9  ;;  %v9813_v20 = vld [vmem:[#allocation8 + $0x324] sm:$0xf]  ;;  %v7877_v44 = vld [vmem:[#allocation8 + $0x530] sm:$0xf0] }
 0x11d   :  { %v7624_v19 = vor.u32 %v9813_v20, %v7621_v41  ;;  %v9836_v20 = vld [vmem:[#allocation8 + $0x3d4] sm:$0xf0] }
 0x11e   :  { %3001 = vmatpush.bf16.msrb.mxu3 %v7368_v46  ;;  %2960 = vmatpush.bf16.msrb.mxu0 %v7732_v49  ;;  %v9857_v46 = vld [vmem:[#allocation8 + $0x484] sm:$0xf]  ;;  %v7525_v49 = vld [vmem:[#allocation8 + $0x270] sm:$0xf0] }
 0x11f   :  { %2974 = vmatpush.bf16.msrb.mxu1 %v7860_v53  ;;  %v10736_v50 = vpop.f32.mrf.mxu2  ;;  %v7800_v51 = vor.u32 %v9857_v46, %v7797_v47  ;;  %v9821_v53 = vld [vmem:[#allocation8 + $0x364] sm:$0xf]  ;;  %v7605_v47 = vld [vmem:[#allocation8 + $0x310] sm:$0xf0] }
 0x120   :  { %2988 = vmatpush.bf16.msrb.mxu2 %v7224_v54  ;;  %v7653_v54 = vld [vmem:[#allocation8 + $0x370] sm:$0xf0]  ;;  %v9809_v46 = vld [vmem:[#allocation8 + $0x304] sm:$0xf] }
 0x121   :  { %2961 = vmatmul.bf16.vlgmr.msrb.gmra.mxu0 %v10689_v21  ;;  %v7656_v61 = vor.u32 %v9821_v53, %v7653_v54  ;;  %v9873_v53 = vld [vmem:[#allocation8 + $0x504] sm:$0xf]  ;;  %v7861_v54 = vld [vmem:[#allocation8 + $0x510] sm:$0xf0] }
 0x122   :  { %3002 = vmatpush.bf16.msrb.mxu3 %v7352_v58  ;;  %3009 = vmatpush.bf16.msra.mxu0 %v7592_v59  ;;  %v7909_v58 = vld [vmem:[#allocation8 + $0x570] sm:$0xf0]  ;;  %v10738_v59 = vpop.f32.mrf.mxu3 }
 0x123   :  { %3023 = vmatpush.bf16.msra.mxu1 %v7720_v60  ;;  %2989 = vmatmul.bf16.vlgmr.msrb.gmra.mxu2 %v10655_v0  ;;  %v7528_v60 = vor.u32 %v9789_v24, %v7525_v49  ;;  %v7912_v3 = vor.u32 %v9885_v57, %v7909_v58  ;;  %v7733_v24 = vld [vmem:[#allocation8 + $0x410] sm:$0xf0]  ;;  %v7339_v49 = vld [vmem:[#allocation8 + $0xe8] sm:$0xf]  ;;  %v9776_v57 = vld [vmem:[#allocation8 + $0x1f4] sm:$0xf0] }
 0x124   :  { %3037 = vmatpush.bf16.msra.mxu2 %v7848_v1  ;;  %2975 = vmatmul.bf16.vlgmr.msrb.gmra.mxu1 %v10691_v29  ;;  %v7509_v1 = vld [vmem:[#allocation8 + $0x250] sm:$0xf0]  ;;  %v7595_v58 = vld [vmem:[#allocation8 + $0x2e8] sm:$0xf] }
 0x125   :  { %3003 = vmatmul.bf16.vlgmr.msrb.gmra.mxu3 %v10657_v6  ;;  %v7512_v26 = vor.u32 %v9785_v62, %v7509_v1  ;;  %v7608_v62 = vor.u32 %v9809_v46, %v7605_v47  ;;  %v9768_v46 = vld [vmem:[#allocation8 + $0x1b4] sm:$0xf0]  ;;  %v7563_v47 = vld [vmem:[#allocation8 + $0x2a8] sm:$0xf] }
 0x126   :  { %3051 = vmatpush.bf16.msra.mxu3 %v7976_v2  ;;  %3010 = vmatpush.bf16.msra.mxu0 %v7576_v13  ;;  %v7784_v2 = vor.u32 %v9853_v55, %v7781_v56  ;;  %v9881_v13 = vld [vmem:[#allocation8 + $0x544] sm:$0xf]  ;;  %v7467_v55 = vld [vmem:[#allocation8 + $0x1e8] sm:$0xf] }
 0x127   :  { %3024 = vmatpush.bf16.msra.mxu1 %v7704_v16  ;;  %v7893_v16 = vld [vmem:[#allocation8 + $0x550] sm:$0xf0]  ;;  %v10744_v9 = vpop.f32.mrf.mxu2  ;;  %v7468_v7 = vor.u32 %v9776_v57, %v7467_v55  ;;  %v9732_v57 = vld [vmem:[#allocation8 + $0x94] sm:$0xf0] }
 0x128   :  { %3038 = vmatpush.bf16.msra.mxu2 %v7832_v32  ;;  %v7640_v32 = vor.u32 %v9817_v4, %v7637_v5  ;;  %v7896_v18 = vor.u32 %v9881_v13, %v7893_v16  ;;  %v7736_v4 = vor.u32 %v9841_v48, %v7733_v24  ;;  %v7864_v5 = vor.u32 %v9873_v53, %v7861_v54  ;;  %v7323_v13 = vld [vmem:[#allocation8 + $0xc8] sm:$0xf]  ;;  %v9740_v16 = vld [vmem:[#allocation8 + $0xd4] sm:$0xf0] }
 0x129   :  { %v9800_v48 = vld [vmem:[#allocation8 + $0x2b4] sm:$0xf0] }
 0x12a   :  { %3052 = vmatpush.bf16.msra.mxu3 %v7960_v34  ;;  %3011 = vmatpush.bf16.msra.mxu0 %v7560_v25  ;;  %v9781_v34 = vld [vmem:[#allocation8 + $0x224] sm:$0xf]  ;;  %v7749_v25 = vld [vmem:[#allocation8 + $0x430] sm:$0xf0]  ;;  %v10746_v11 = vpop.f32.mrf.mxu3  ;;  %v9832_v24 = vld [vmem:[#allocation8 + $0x3b4] sm:$0xf0]  ;;  %v7564_v55 = vor.u32 %v9800_v48, %v7563_v47 }
 0x12b   :  { %3025 = vmatpush.bf16.msra.mxu1 %v7688_v43  ;;  %v9877_v43 = vld [vmem:[#allocation8 + $0x524] sm:$0xf]  ;;  %v9724_v47 = vld [vmem:[#allocation8 + $0x54] sm:$0xf0]  ;;  %v7387_v48 = vld [vmem:[#allocation8 + $0x148] sm:$0xf] }
 0x12c   :  { %3039 = vmatpush.bf16.msra.mxu2 %v7816_v17  ;;  %v7496_v17 = vor.u32 %v9781_v34, %v7493_v35  ;;  %v9772_v34 = vld [vmem:[#allocation8 + $0x1d4] sm:$0xf0]  ;;  %v7579_v35 = vld [vmem:[#allocation8 + $0x2c8] sm:$0xf] }
 0x12e   :  { %3053 = vmatpush.bf16.msra.mxu3 %v7944_v45  ;;  %3012 = vmatpush.bf16.msra.mxu0 %v7544_v14  ;;  %v9777_v45 = vld [vmem:[#allocation8 + $0x204] sm:$0xf]  ;;  %v7752_v14 = vor.u32 %v9845_v42, %v7749_v25  ;;  %v7324_v42 = vor.u32 %v9740_v16, %v7323_v13  ;;  %v7275_v13 = vld [vmem:[#allocation8 + $0x68] sm:$0xf]  ;;  %v9728_v16 = vld [vmem:[#allocation8 + $0x74] sm:$0xf0] }
 0x12f   :  { %3026 = vmatpush.bf16.msra.mxu1 %v7672_v22  ;;  %v7880_v22 = vor.u32 %v9877_v43, %v7877_v44  ;;  %v7480_v56 = vor.u32 %v9777_v45, %v7477_v10  ;;  %v10752_v41 = vpop.f32.mrf.mxu2  ;;  %v7307_v44 = vld [vmem:[#allocation8 + $0xa8] sm:$0xf] }
 0x130   :  { %3040 = vmatpush.bf16.msra.mxu2 %v7800_v51  ;;  %v9744_v51 = vld [vmem:[#allocation8 + $0xf4] sm:$0xf0]  ;;  %v7435_v45 = vld [vmem:[#allocation8 + $0x1a8] sm:$0xf] }
 0x131   :  { %v7340_v1 = vor.u32 %v9744_v51, %v7339_v49  ;;  %v412_v49 = vperm.slane %v10709_v30, 1  ;;  %v7436_v54 = vor.u32 %v9768_v46, %v7435_v45  ;;  %v7259_v46 = vld [vmem:[#allocation8 + $0x48] sm:$0xf] }
 0x132   :  { %3054 = vmatpush.bf16.msra.mxu3 %v7928_v52  ;;  %3013 = vmatpush.bf16.msra.mxu0 %v7528_v60  ;;  %v10748_v52 = vpop.f32.mrf.mxu0  ;;  %v9808_v60 = vld [vmem:[#allocation8 + $0x2f4] sm:$0xf0]  ;;  %v10754_v10 = vpop.f32.mrf.mxu3 }
 0x133   :  { %3027 = vmatpush.bf16.msra.mxu1 %v7656_v61  ;;  %v10750_v61 = vpop.f32.mrf.mxu1  ;;  %v7596_v12 = vor.u32 %v9808_v60, %v7595_v58  ;;  %v7419_v58 = vld [vmem:[#allocation8 + $0x188] sm:$0xf] }
 0x134   :  { %3041 = vmatpush.bf16.msra.mxu2 %v7784_v2  ;;  %v7723_v2 = vld [vmem:[#allocation8 + $0x3e8] sm:$0xf] }
 0x136   :  { %3055 = vmatpush.bf16.msra.mxu3 %v7912_v3  ;;  %3014 = vmatpush.bf16.msra.mxu0 %v7512_v26  ;;  %v9840_v3 = vld [vmem:[#allocation8 + $0x3f4] sm:$0xf0]  ;;  %v7451_v26 = vld [vmem:[#allocation8 + $0x1c8] sm:$0xf] }
 0x137   :  { %3028 = vmatpush.bf16.msra.mxu1 %v7640_v32  ;;  %v7724_v32 = vor.u32 %v9840_v3, %v7723_v2  ;;  %v7452_v25 = vor.u32 %v9772_v34, %v7451_v26  ;;  %v9796_v2 = vld [vmem:[#allocation8 + $0x294] sm:$0xf0]  ;;  %v7675_v3 = vld [vmem:[#allocation8 + $0x388] sm:$0xf]  ;;  %v10768_v34 = vpop.f32.mrf.mxu2 }
 0x138   :  { %3042 = vmatpush.bf16.msra.mxu2 %v7768_v37  ;;  %v9804_v37 = vld [vmem:[#allocation8 + $0x2d4] sm:$0xf0]  ;;  %v7403_v26 = vld [vmem:[#allocation8 + $0x168] sm:$0xf] }
 0x139   :  { %v7580_v43 = vor.u32 %v9804_v37, %v7579_v35  ;;  %v9760_v37 = vld [vmem:[#allocation8 + $0x174] sm:$0xf0] }
 0x13a   :  { %3056 = vmatpush.bf16.msra.mxu3 %v7896_v18  ;;  %3015 = vmatpush.bf16.msra.mxu0 %v7496_v17  ;;  %v7707_v18 = vld [vmem:[#allocation8 + $0x3c8] sm:$0xf]  ;;  %v9736_v17 = vld [vmem:[#allocation8 + $0xb4] sm:$0xf0] }
 0x13b   :  { %3029 = vmatpush.bf16.msra.mxu1 %v7624_v19  ;;  %v7708_v19 = vor.u32 %v9836_v20, %v7707_v18  ;;  %v7308_v51 = vor.u32 %v9736_v17, %v7307_v44  ;;  %v10763_v53 = vpop.f32.mrf.mxu1  ;;  %v7531_v18 = vld [vmem:[#allocation8 + $0x268] sm:$0xf]  ;;  %v9792_v20 = vld [vmem:[#allocation8 + $0x274] sm:$0xf0]  ;;  %v10772_v44 = vpop.f32.mrf.mxu3  ;;  %v7276_v17 = vor.u32 %v9728_v16, %v7275_v13 }
 0x13c   :  { %3043 = vmatpush.bf16.msra.mxu2 %v7752_v14  ;;  %v10757_v14 = vpop.f32.mrf.mxu0  ;;  %v9784_v13 = vld [vmem:[#allocation8 + $0x234] sm:$0xf0]  ;;  %v7627_v16 = vld [vmem:[#allocation8 + $0x328] sm:$0xf] }
 0x13e   :  { %3057 = vmatpush.bf16.msra.mxu3 %v7880_v22  ;;  %3016 = vmatpush.bf16.msra.mxu0 %v7480_v56  ;;  %v7691_v22 = vld [vmem:[#allocation8 + $0x3a8] sm:$0xf] }
 0x13f   :  { %3030 = vmatpush.bf16.msra.mxu1 %v7608_v62  ;;  %v7291_v56 = vld [vmem:[#allocation8 + $0x88] sm:$0xf]  ;;  %v7692_v60 = vor.u32 %v9832_v24, %v7691_v22  ;;  %v9764_v62 = vld [vmem:[#allocation8 + $0x194] sm:$0xf0] }
 0x140   :  { %3044 = vmatpush.bf16.msra.mxu2 %v7736_v4  ;;  %v9828_v4 = vld [vmem:[#allocation8 + $0x394] sm:$0xf0] }
 0x141   :  { %3017 = vmatmul.bf16.vlgmr.msra.gmra.mxu0 %v10611_v15  ;;  %v7676_v35 = vor.u32 %v9828_v4, %v7675_v3  ;;  %v7371_v3 = vld [vmem:[#allocation8 + $0x128] sm:$0xf] }
 0x142   :  { %3065 = vmatpush.bf16.msrb.mxu0 %v7340_v1  ;;  %3058 = vmatpush.bf16.msra.mxu3 %v7864_v5  ;;  %v7547_v1 = vld [vmem:[#allocation8 + $0x288] sm:$0xf]  ;;  %v7292_v5 = vor.u32 %v9732_v57, %v7291_v56  ;;  %v9820_v57 = vld [vmem:[#allocation8 + $0x354] sm:$0xf0] }
 0x143   :  { %3079 = vmatpush.bf16.msrb.mxu1 %v7468_v7  ;;  %3045 = vmatmul.bf16.vlgmr.msra.gmra.mxu2 %v10689_v21  ;;  %v7420_v7 = vor.u32 %v9764_v62, %v7419_v58  ;;  %v10774_v45 = vpop.f32.mrf.mxu1  ;;  %v7643_v56 = vld [vmem:[#allocation8 + $0x348] sm:$0xf]  ;;  %v7260_v58 = vor.u32 %v9724_v47, %v7259_v46  ;;  %v9780_v47 = vld [vmem:[#allocation8 + $0x214] sm:$0xf0] }
 0x144   :  { %3093 = vmatpush.bf16.msrb.mxu2 %v7596_v12  ;;  %3031 = vmatmul.bf16.vlgmr.msra.gmra.mxu1 %v10636_v36  ;;  %v7548_v12 = vor.u32 %v9796_v2, %v7547_v1  ;;  %v7243_v1 = vld [vmem:[#allocation8 + $0x28] sm:$0xf]  ;;  %v9720_v2 = vld [vmem:[#allocation8 + $0x34] sm:$0xf0] }
 0x145   :  { %3059 = vmatmul.bf16.vlgmr.msra.gmra.mxu3 %v10691_v29 }
 0x146   :  { %3107 = vmatpush.bf16.msrb.mxu3 %v7724_v32  ;;  %3066 = vmatpush.bf16.msrb.mxu0 %v7324_v42  ;;  %v1485_v32 = vadd.f32 %v10736_v50, %v412_v49  ;;  %v10770_v42 = vpop.f32.mrf.mxu0  ;;  %v7404_v50 = vor.u32 %v9760_v37, %v7403_v26  ;;  %v9816_v26 = vld [vmem:[#allocation8 + $0x334] sm:$0xf0]  ;;  %v7227_v37 = vld [vmem:[#allocation8 + $0x8] sm:$0xf] }
 0x147   :  { %3080 = vmatpush.bf16.msrb.mxu1 %v7452_v25  ;;  %v7659_v25 = vld [vmem:[#allocation8 + $0x368] sm:$0xf]  ;;  %v7628_v46 = vor.u32 %v9816_v26, %v7627_v16  ;;  %v9868_v26 = vld [vmem:[#allocation8 + $0x4d4] sm:$0xf0] }
 0x148   :  { %3094 = vmatpush.bf16.msrb.mxu2 %v7580_v43  ;;  %v9824_v43 = vld [vmem:[#allocation8 + $0x374] sm:$0xf0]  ;;  %v1499_v22 = vadd.f32 %v10738_v59, %v1485_v32  ;;  %v7644_v59 = vor.u32 %v9820_v57, %v7643_v56  ;;  %v10780_v32 = vpop.f32.mrf.mxu3  ;;  %v7835_v16 = vld [vmem:[#allocation8 + $0x4c8] sm:$0xf] }
 0x149   :  { %v7660_v24 = vor.u32 %v9824_v43, %v7659_v25  ;;  %v7355_v43 = vld [vmem:[#allocation8 + $0x108] sm:$0xf]  ;;  %v9904_v57 = vld [vmem:[#allocation8 + $0x5f4] sm:$0xf0] }
 0x14a   :  { %3108 = vmatpush.bf16.msrb.mxu3 %v7708_v19  ;;  %3067 = vmatpush.bf16.msrb.mxu0 %v7308_v51  ;;  %v7532_v19 = vor.u32 %v9792_v20, %v7531_v18  ;;  %v9756_v51 = vld [vmem:[#allocation8 + $0x154] sm:$0xf0]  ;;  %v1513_v4 = vadd.f32 %v10748_v52, %v1499_v22 }
 0x14b   :  { %3081 = vmatpush.bf16.msrb.mxu1 %v7436_v54  ;;  %v7515_v54 = vld [vmem:[#allocation8 + $0x248] sm:$0xf]  ;;  %v9716_v18 = vld [vmem:[#allocation8 + $0x14] sm:$0xf0] }
 0x14c   :  { %3095 = vmatpush.bf16.msrb.mxu2 %v7564_v55  ;;  %v9788_v55 = vld [vmem:[#allocation8 + $0x254] sm:$0xf0]  ;;  %v7228_v56 = vor.u32 %v9716_v18, %v7227_v37 }
 0x14d   :  { %v7516_v62 = vor.u32 %v9788_v55, %v7515_v54  ;;  %v9812_v22 = vld [vmem:[#allocation8 + $0x314] sm:$0xf0]  ;;  %v7979_v55 = vld [vmem:[#allocation8 + $0x5e8] sm:$0xf] }
 0x14e   :  { %3109 = vmatpush.bf16.msrb.mxu3 %v7692_v60  ;;  %3068 = vmatpush.bf16.msrb.mxu0 %v7292_v5  ;;  %v7388_v60 = vor.u32 %v9756_v51, %v7387_v48  ;;  %v10778_v5 = vpop.f32.mrf.mxu2  ;;  %v10782_v20 = vpop.f32.mrf.mxu0  ;;  %v7611_v48 = vld [vmem:[#allocation8 + $0x308] sm:$0xf]  ;;  %v9872_v54 = vld [vmem:[#allocation8 + $0x4f4] sm:$0xf0] }
 0x14f   :  { %3082 = vmatpush.bf16.msrb.mxu1 %v7420_v7  ;;  %v9752_v7 = vld [vmem:[#allocation8 + $0x134] sm:$0xf0]  ;;  %v7851_v51 = vld [vmem:[#allocation8 + $0x4e8] sm:$0xf] }
 0x150   :  { %3096 = vmatpush.bf16.msrb.mxu2 %v7548_v12  ;;  %v7499_v12 = vld [vmem:[#allocation8 + $0x228] sm:$0xf]  ;;  %v7372_v52 = vor.u32 %v9752_v7, %v7371_v3  ;;  %v1403_v3 = vadd.f32 %v10714_v28, %v411_v39  ;;  %v7852_v7 = vor.u32 %v9872_v54, %v7851_v51  ;;  %v9770_v39 = vld [vmem:[#allocation8 + $0x1cc] sm:$0xf]  ;;  %v7453_v28 = vld [vmem:[#allocation8 + $0x1d8] sm:$0xf0] }
 0x151   :  { %v7500_v25 = vor.u32 %v9784_v13, %v7499_v12  ;;  %v7980_v12 = vor.u32 %v9904_v57, %v7979_v55  ;;  %v9864_v51 = vld [vmem:[#allocation8 + $0x4b4] sm:$0xf0]  ;;  %v7947_v54 = vld [vmem:[#allocation8 + $0x5a8] sm:$0xf]  ;;  %v7456_v55 = vor.u32 %v9770_v39, %v7453_v28  ;;  %v7309_v57 = vld [vmem:[#allocation8 + $0xb8] sm:$0xf0] }
 0x152   :  { %3110 = vmatpush.bf16.msrb.mxu3 %v7676_v35  ;;  %3069 = vmatpush.bf16.msrb.mxu0 %v7276_v17  ;;  %v7244_v35 = vor.u32 %v9720_v2, %v7243_v1  ;;  %v9748_v17 = vld [vmem:[#allocation8 + $0x114] sm:$0xf0]  ;;  %v7469_v2 = vld [vmem:[#allocation8 + $0x1f8] sm:$0xf0] }
 0x153   :  { %3083 = vmatpush.bf16.msrb.mxu1 %v7404_v50  ;;  %v7483_v50 = vld [vmem:[#allocation8 + $0x208] sm:$0xf] }
 0x154   :  { %3097 = vmatpush.bf16.msrb.mxu2 %v7532_v19  ;;  %v1527_v19 = vadd.f32 %v10750_v61, %v1513_v4  ;;  %v7484_v1 = vor.u32 %v9780_v47, %v7483_v50  ;;  %v9774_v61 = vld [vmem:[#allocation8 + $0x1ec] sm:$0xf]  ;;  %v10795_v50 = vpop.f32.mrf.mxu3 }
 0x155   :  { %v7472_v18 = vor.u32 %v9774_v61, %v7469_v2 }
 0x156   :  { %3111 = vmatpush.bf16.msrb.mxu3 %v7660_v24  ;;  %3070 = vmatpush.bf16.msrb.mxu0 %v7260_v58  ;;  %v10785_v24 = vpop.f32.mrf.mxu1  ;;  %v9742_v58 = vld [vmem:[#allocation8 + $0xec] sm:$0xf]  ;;  %v1541_v4 = vadd.f32 %v10752_v41, %v1527_v19  ;;  %v10791_v37 = vpop.f32.mrf.mxu2  ;;  %v1417_v41 = vadd.f32 %v10716_v38, %v1403_v3  ;;  %v7836_v19 = vor.u32 %v9868_v26, %v7835_v16 }
 0x157   :  { %3084 = vmatpush.bf16.msrb.mxu1 %v7388_v60  ;;  %v7341_v60 = vld [vmem:[#allocation8 + $0xf8] sm:$0xf0]  ;;  %v9734_v38 = vld [vmem:[#allocation8 + $0xac] sm:$0xf]  ;;  %v1487_v3 = vadd.f32 %v10744_v9, %v412_v49 }
 0x158   :  { %3098 = vmatpush.bf16.msrb.mxu2 %v7516_v62  ;;  %v7356_v62 = vor.u32 %v9748_v17, %v7355_v43  ;;  %v7344_v13 = vor.u32 %v9742_v58, %v7341_v60  ;;  %v7325_v43 = vld [vmem:[#allocation8 + $0xd8] sm:$0xf0]  ;;  %v1555_v17 = vadd.f32 %v10754_v10, %v1541_v4  ;;  %v9766_v58 = vld [vmem:[#allocation8 + $0x1ac] sm:$0xf] }
 0x159   :  { %v7437_v60 = vld [vmem:[#allocation8 + $0x1b8] sm:$0xf0]  ;;  %v9730_v26 = vld [vmem:[#allocation8 + $0x8c] sm:$0xf] }
 0x15a   :  { %3112 = vmatpush.bf16.msrb.mxu3 %v7644_v59  ;;  %3071 = vmatpush.bf16.msrb.mxu0 %v7244_v35  ;;  %v7612_v59 = vor.u32 %v9812_v22, %v7611_v48  ;;  %v7963_v35 = vld [vmem:[#allocation8 + $0x5c8] sm:$0xf]  ;;  %v1728_v61 = vmax.f32 %v1555_v17, 0.0  ;;  %v9856_v17 = vld [vmem:[#allocation8 + $0x474] sm:$0xf0] }
 0x15b   :  { %3085 = vmatpush.bf16.msrb.mxu1 %v7372_v52  ;;  %v9900_v52 = vld [vmem:[#allocation8 + $0x5d4] sm:$0xf0]  ;;  %v7819_v22 = vld [vmem:[#allocation8 + $0x4a8] sm:$0xf] }
 0x15c   :  { %3099 = vmatpush.bf16.msrb.mxu2 %v7500_v25  ;;  %v9738_v25 = vld [vmem:[#allocation8 + $0xcc] sm:$0xf]  ;;  %v7964_v47 = vor.u32 %v9900_v52, %v7963_v35  ;;  %v7820_v2 = vor.u32 %v9864_v51, %v7819_v22  ;;  %v7293_v35 = vld [vmem:[#allocation8 + $0x98] sm:$0xf0]  ;;  %v10815_v9 = vpop.f32.mrf.mxu3 }
 0x15d   :  { %v7328_v48 = vor.u32 %v9738_v25, %v7325_v43  ;;  %v7421_v52 = vld [vmem:[#allocation8 + $0x198] sm:$0xf0]  ;;  %v1501_v43 = vadd.f32 %v10746_v11, %v1487_v3  ;;  %v7296_v28 = vor.u32 %v9730_v26, %v7293_v35  ;;  %v9726_v22 = vld [vmem:[#allocation8 + $0x6c] sm:$0xf] }
 0x15e   :  { %3113 = vmatpush.bf16.msrb.mxu3 %v7628_v46  ;;  %3072 = vmatpush.bf16.msrb.mxu0 %v7228_v56  ;;  %v10797_v46 = vpop.f32.mrf.mxu0  ;;  %v9896_v56 = vld [vmem:[#allocation8 + $0x5b4] sm:$0xf0]  ;;  %v10800_v10 = vpop.f32.mrf.mxu1 }
 0x15f   :  { %3086 = vmatpush.bf16.msrb.mxu1 %v7356_v62  ;;  %v1727_v62 = vmax.f32 %v10722_v63, 0.0  ;;  %v7948_v4 = vor.u32 %v9896_v56, %v7947_v54  ;;  %v10810_v16 = vpop.f32.mrf.mxu2  ;;  %v7440_v63 = vor.u32 %v9766_v58, %v7437_v60  ;;  %v9758_v54 = vld [vmem:[#allocation8 + $0x16c] sm:$0xf] }
 0x160   :  { %3100 = vmatpush.bf16.msrb.mxu2 %v7484_v1  ;;  %v1431_v1 = vadd.f32 %v10728_v31, %v1417_v41  ;;  %v9892_v31 = vld [vmem:[#allocation8 + $0x594] sm:$0xf0]  ;;  %v7787_v41 = vld [vmem:[#allocation8 + $0x468] sm:$0xf] }
 0x161   :  { %3073 = vmatmul.bf16.vlgmr.msrb.gmra.mxu0 %v10655_v0  ;;  %v10813_v25 = vpack.c.bf16 %v1728_v61, %v1727_v62  ;;  %v9852_v61 = vld [vmem:[#allocation8 + $0x454] sm:$0xf0] }
 0x162   :  { %3114 = vmatpush.bf16.msrb.mxu3 %v7612_v59  ;;  %3121 = vmatpush.bf16.msra.mxu0 %v7852_v7  ;;  %v7312_v59 = vor.u32 %v9734_v38, %v7309_v57  ;;  %v7803_v7 = vld [vmem:[#allocation8 + $0x488] sm:$0xf]  ;;  %v1445_v30 = vadd.f32 %v10732_v23, %v1431_v1  ;;  %v7277_v23 = vld [vmem:[#allocation8 + $0x78] sm:$0xf0]  ;;  %v7788_v38 = vor.u32 %v9856_v17, %v7787_v41  ;;  %v9880_v41 = vld [vmem:[#allocation8 + $0x534] sm:$0xf0] }
 0x163   :  { %3135 = vmatpush.bf16.msra.mxu1 %v7980_v12  ;;  %3101 = vmatmul.bf16.vlgmr.msrb.gmra.mxu2 %v10611_v15  ;;  %v9860_v12 = vld [vmem:[#allocation8 + $0x494] sm:$0xf0]  ;;  %v10822_v11 = vunpack.c.l.b16 %v10813_v25  ;;  %v1515_v57 = vadd.f32 %v10757_v14, %v1501_v43  ;;  %v7280_v62 = vor.u32 %v9726_v22, %v7277_v23  ;;  %v7771_v1 = vld [vmem:[#allocation8 + $0x448] sm:$0xf]  ;;  %v9718_v17 = vld [vmem:[#allocation8 + $0x2c] sm:$0xf] }
 0x164   :  { %3149 = vmatpush.bf16.msra.mxu2 %v7344_v13  ;;  %3087 = vmatmul.bf16.vlgmr.msrb.gmra.mxu1 %v10657_v6  ;;  %v7931_v13 = vld [vmem:[#allocation8 + $0x588] sm:$0xf]  ;;  %v7804_v49 = vor.u32 %v9860_v12, %v7803_v7  ;;  %v1459_v56 = vadd.f32 %v10740_v8, %v1445_v30  ;;  %v9722_v8 = vld [vmem:[#allocation8 + $0x4c] sm:$0xf]  ;;  %v7389_v12 = vld [vmem:[#allocation8 + $0x158] sm:$0xf0]  ;;  %v7772_v35 = vor.u32 %v9852_v61, %v7771_v1 }
 0x165   :  { %3115 = vmatmul.bf16.vlgmr.msrb.gmra.mxu3 %v10636_v36  ;;  %v7932_v39 = vor.u32 %v9892_v31, %v7931_v13  ;;  %v9754_v7 = vld [vmem:[#allocation8 + $0x14c] sm:$0xf]  ;;  %v10832_v14 = vpack.c.b16 %v10822_v11, %v10822_v11  ;;  %v7883_v43 = vld [vmem:[#allocation8 + $0x528] sm:$0xf]  ;;  %v7373_v23 = vld [vmem:[#allocation8 + $0x138] sm:$0xf0] }
 0x166   :  { %3163 = vmatpush.bf16.msra.mxu3 %v7472_v18  ;;  %3122 = vmatpush.bf16.msra.mxu0 %v7836_v19  ;;  %v9762_v18 = vld [vmem:[#allocation8 + $0x18c] sm:$0xf]  ;;  %v7915_v19 = vld [vmem:[#allocation8 + $0x568] sm:$0xf]  ;;  %v10818_v51 = vpop.f32.mrf.mxu0  ;;  %v10825_v58 = vpop.f32.mrf.mxu1  ;;  %v10828_v13 = vadd.f32 %v10742_v27, %v1459_v56  ;;  %v9844_v1 = vld [vmem:[#allocation8 + $0x414] sm:$0xf0] }
 0x167   :  { %3136 = vmatpush.bf16.msra.mxu1 %v7964_v47  ;;  %v7424_v47 = vor.u32 %v9762_v18, %v7421_v52  ;;  %v10837_v26 = vpop.f32.mrf.mxu2  ;;  %v1529_v18 = vadd.f32 %v10763_v53, %v1515_v57  ;;  %v7755_v27 = vld [vmem:[#allocation8 + $0x428] sm:$0xf]  ;;  %v9750_v53 = vld [vmem:[#allocation8 + $0x12c] sm:$0xf]  ;;  %v10849_v57 = vunpack.c.h.b16 %v10813_v25 }
 0x168   :  { %3150 = vmatpush.bf16.msra.mxu2 %v7328_v48  ;;  %v9888_v48 = vld [vmem:[#allocation8 + $0x574] sm:$0xf0]  ;;  %v7867_v61 = vld [vmem:[#allocation8 + $0x508] sm:$0xf] }
 0x169   :  { %v7916_v60 = vor.u32 %v9888_v48, %v7915_v19  ;;  %v7245_v19 = vld [vmem:[#allocation8 + $0x38] sm:$0xf0] }
 0x16a   :  { %3164 = vmatpush.bf16.msra.mxu3 %v7456_v55  ;;  %3123 = vmatpush.bf16.msra.mxu0 %v7820_v2  ;;  %v7405_v55 = vld [vmem:[#allocation8 + $0x178] sm:$0xf0]  ;;  %v7899_v2 = vld [vmem:[#allocation8 + $0x548] sm:$0xf] }
 0x16b   :  { %3137 = vmatpush.bf16.msra.mxu1 %v7948_v4  ;;  %v7408_v3 = vor.u32 %v9758_v54, %v7405_v55  ;;  %v9884_v4 = vld [vmem:[#allocation8 + $0x554] sm:$0xf0]  ;;  %v1731_v54 = vmax.f32 %v10828_v13, 0.0  ;;  %v11412_v55 = vshrl.u32 %v10832_v14, 16 }
 0x16c   :  { %3151 = vmatpush.bf16.msra.mxu2 %v7312_v59  ;;  %v7261_v59 = vld [vmem:[#allocation8 + $0x58] sm:$0xf0]  ;;  %v7900_v52 = vor.u32 %v9884_v4, %v7899_v2  ;;  %v9876_v2 = vld [vmem:[#allocation8 + $0x514] sm:$0xf0]  ;;  %v7376_v4 = vor.u32 %v9750_v53, %v7373_v23 }
 0x16d   :  { %v7264_v30 = vor.u32 %v9722_v8, %v7261_v59  ;;  %v9714_v8 = vld [vmem:[#allocation8 + $0xc] sm:$0xf]  ;;  %v7229_v59 = vld [vmem:[#allocation8 + $0x18] sm:$0xf0]  ;;  %v3260_v13 = vrot.slane %v11412_v55, 7 }
 0x16e   :  { %3165 = vmatpush.bf16.msra.mxu3 %v7440_v63  ;;  %3124 = vmatpush.bf16.msra.mxu0 %v7804_v49  ;;  %v10834_v63 = vld [vmem:[#allocation10] sm:$0xf]  ;;  %v9848_v49 = vld [vmem:[#allocation8 + $0x434] sm:$0xf0]  ;;  %v10844_v22 = vpop.f32.mrf.mxu0 }
 0x16f   :  { %3138 = vmatpush.bf16.msra.mxu1 %v7932_v39  ;;  %v413_v31 = vperm.slane %v10834_v63, 2  ;;  %v10840_v39 = vpop.f32.mrf.mxu3  ;;  %v414_v48 = vperm.slane %v10834_v63, 3  ;;  %v7756_v56 = vor.u32 %v9848_v49, %v7755_v27  ;;  %v9838_v27 = vld [vmem:[#allocation8 + $0x3ec] sm:$0xf]  ;;  %v7725_v49 = vld [vmem:[#allocation8 + $0x3f8] sm:$0xf0]  ;;  %v10868_v53 = vpop.f32.mrf.mxu2 }
 0x170   :  { %3152 = vmatpush.bf16.msra.mxu2 %v7296_v28  ;;  %v7392_v28 = vor.u32 %v9754_v7, %v7389_v12  ;;  %v9746_v7 = vld [vmem:[#allocation8 + $0x10c] sm:$0xf] }
 0x171   :  { %v1653_v12 = vadd.f32 %v10810_v16, %v414_v48  ;;  %v11415_v16 = vshll.u32 %v10832_v14, 16 }
 0x172   :  { %3166 = vmatpush.bf16.msra.mxu3 %v7424_v47  ;;  %3125 = vmatpush.bf16.msra.mxu0 %v7788_v38  ;;  %v1543_v47 = vadd.f32 %v10768_v34, %v1529_v18  ;;  %v7739_v38 = vld [vmem:[#allocation8 + $0x408] sm:$0xf]  ;;  %v7884_v34 = vor.u32 %v9880_v41, %v7883_v43  ;;  %v9806_v18 = vld [vmem:[#allocation8 + $0x2ec] sm:$0xf]  ;;  %v10864_v43 = vpack.c.b16 %v10849_v57, %v10849_v57  ;;  %v7853_v41 = vld [vmem:[#allocation8 + $0x4f8] sm:$0xf0] }
 0x173   :  { %3139 = vmatpush.bf16.msra.mxu1 %v7916_v60  ;;  %v10851_v60 = vpop.f32.mrf.mxu1 }
 0x174   :  { %3153 = vmatpush.bf16.msra.mxu2 %v7280_v62  ;;  %v7248_v62 = vor.u32 %v9718_v17, %v7245_v19  ;;  %v10857_v25 = vadd.f32 %v10772_v44, %v1543_v47  ;;  %v7868_v44 = vor.u32 %v9876_v2, %v7867_v61  ;;  %v9902_v17 = vld [vmem:[#allocation8 + $0x5ec] sm:$0xf]  ;;  %v7981_v19 = vld [vmem:[#allocation8 + $0x5f8] sm:$0xf0] }
 0x175   :  { %v9802_v61 = vld [vmem:[#allocation8 + $0x2cc] sm:$0xf]  ;;  %v7581_v2 = vld [vmem:[#allocation8 + $0x2d8] sm:$0xf0] }
 0x176   :  { %3167 = vmatpush.bf16.msra.mxu3 %v7408_v3  ;;  %3126 = vmatpush.bf16.msra.mxu0 %v7772_v35  ;;  %v1569_v3 = vadd.f32 %v10770_v42, %v413_v31  ;;  %v7357_v35 = vld [vmem:[#allocation8 + $0x118] sm:$0xf0]  ;;  %v9870_v42 = vld [vmem:[#allocation8 + $0x4ec] sm:$0xf] }
 0x177   :  { %3140 = vmatpush.bf16.msra.mxu1 %v7900_v52  ;;  %v7597_v52 = vld [vmem:[#allocation8 + $0x2f8] sm:$0xf0]  ;;  %v7360_v23 = vor.u32 %v9746_v7, %v7357_v35  ;;  %v9866_v7 = vld [vmem:[#allocation8 + $0x4cc] sm:$0xf]  ;;  %v1682_v35 = vpop.f32.mrf.mxu0 }
 0x178   :  { %3154 = vmatpush.bf16.msra.mxu2 %v7264_v30  ;;  %v7740_v30 = vor.u32 %v9844_v1, %v7739_v38  ;;  %v1583_v47 = vadd.f32 %v10774_v45, %v1569_v3  ;;  %v1732_v38 = vmax.f32 %v10857_v25, 0.0  ;;  %v7728_v1 = vor.u32 %v9838_v27, %v7725_v49  ;;  %v7837_v25 = vld [vmem:[#allocation8 + $0x4d8] sm:$0xf0] }
 0x179   :  { %v7856_v45 = vor.u32 %v9870_v42, %v7853_v41  ;;  %v7984_v3 = vor.u32 %v9902_v17, %v7981_v19  ;;  %v10886_v41 = vld [vmem:[#allocation13] sm:$0xf]  ;;  %v9862_v17 = vld [vmem:[#allocation8 + $0x4ac] sm:$0xf] }
 0x17a   :  { %3168 = vmatpush.bf16.msra.mxu3 %v7392_v28  ;;  %3127 = vmatpush.bf16.msra.mxu0 %v7756_v56  ;;  %v7232_v28 = vor.u32 %v9714_v8, %v7229_v59  ;;  %v7600_v56 = vor.u32 %v9806_v18, %v7597_v52  ;;  %v10875_v8 = vpop.f32.mrf.mxu3  ;;  %v9834_v59 = vld [vmem:[#allocation8 + $0x3cc] sm:$0xf]  ;;  %v7965_v52 = vld [vmem:[#allocation8 + $0x5d8] sm:$0xf0] }
 0x17b   :  { %3141 = vmatpush.bf16.msra.mxu1 %v7884_v34  ;;  %v1571_v34 = vadd.f32 %v10782_v20, %v413_v31  ;;  %v9898_v18 = vld [vmem:[#allocation8 + $0x5cc] sm:$0xf]  ;;  %v11404_v20 = vshrl.u32 %v10864_v43, 16  ;;  %v1655_v31 = vadd.f32 %v10837_v26, %v414_v48  ;;  %v10884_v49 = vpop.f32.mrf.mxu1  ;;  %v7693_v48 = vld [vmem:[#allocation8 + $0x3b8] sm:$0xf0] }
 0x17c   :  { %3155 = vmatpush.bf16.msra.mxu2 %v7248_v62  ;;  %v1667_v62 = vadd.f32 %v10815_v9, %v1653_v12  ;;  %v1597_v9 = vadd.f32 %v10778_v5, %v1583_v47  ;;  %v7584_v12 = vor.u32 %v9802_v61, %v7581_v2  ;;  %v7840_v5 = vor.u32 %v9866_v7, %v7837_v25  ;;  %v9830_v26 = vld [vmem:[#allocation8 + $0x3ac] sm:$0xf]  ;;  %v7949_v47 = vld [vmem:[#allocation8 + $0x5b8] sm:$0xf0] }
 0x17d   :  { %v7968_v63 = vor.u32 %v9898_v18, %v7965_v52  ;;  %v9894_v19 = vld [vmem:[#allocation8 + $0x5ac] sm:$0xf]  ;;  %v7549_v2 = vld [vmem:[#allocation8 + $0x298] sm:$0xf0] }
 0x17e   :  { %3169 = vmatpush.bf16.msra.mxu3 %v7376_v4  ;;  %3128 = vmatpush.bf16.msra.mxu0 %v7740_v30  ;;  %v7709_v4 = vld [vmem:[#allocation8 + $0x3d8] sm:$0xf0]  ;;  %v1585_v30 = vadd.f32 %v10785_v24, %v1571_v34  ;;  %v1681_v27 = vadd.f32 %v10844_v22, %v1667_v62  ;;  %v10890_v24 = vpack.c.bf16 %v1732_v38, %v1731_v54  ;;  %v11401_v62 = vperm.slane %v10886_v41, 0  ;;  %v9794_v61 = vld [vmem:[#allocation8 + $0x28c] sm:$0xf] }
 0x17f   :  { %3142 = vmatpush.bf16.msra.mxu1 %v7868_v44  ;;  %v7712_v42 = vor.u32 %v9834_v59, %v7709_v4  ;;  %v9798_v44 = vld [vmem:[#allocation8 + $0x2ac] sm:$0xf]  ;;  %v7821_v22 = vld [vmem:[#allocation8 + $0x4b8] sm:$0xf0] }
 0x180   :  { %3156 = vmatpush.bf16.msra.mxu2 %v7232_v28  ;;  %v7565_v28 = vld [vmem:[#allocation8 + $0x2b8] sm:$0xf0]  ;;  %v1599_v54 = vadd.f32 %v10791_v37, %v1585_v30  ;;  %v1695_v38 = vadd.f32 %v10851_v60, %v1681_v27  ;;  %v9858_v59 = vld [vmem:[#allocation8 + $0x48c] sm:$0xf]  ;;  %v10903_v4 = vunpack.c.l.b16 %v10890_v24  ;;  %v2906_v60 = vpop.f32.mrf.mxu0  ;;  %v11410_v30 = vshll.u32 %v10864_v43, 16 }
 0x181   :  { %3129 = vmatmul.bf16.vlgmr.msra.gmra.mxu0 %v10689_v21  ;;  %v7568_v34 = vor.u32 %v9798_v44, %v7565_v28  ;;  %v7805_v7 = vld [vmem:[#allocation8 + $0x498] sm:$0xf0]  ;;  %v9890_v25 = vld [vmem:[#allocation8 + $0x58c] sm:$0xf] }
 0x182   :  { %3170 = vmatpush.bf16.msra.mxu3 %v7360_v23  ;;  %3177 = vmatpush.bf16.msrb.mxu0 %v7600_v56  ;;  %v1611_v23 = vadd.f32 %v10780_v32, %v1597_v9  ;;  %v1669_v56 = vadd.f32 %v10840_v39, %v1655_v31  ;;  %v1710_v32 = vpop.f32.mrf.mxu2  ;;  %v7824_v39 = vor.u32 %v9862_v17, %v7821_v22  ;;  %v7933_v37 = vld [vmem:[#allocation8 + $0x598] sm:$0xf0]  ;;  %v10907_v9 = vpop.f32.mrf.mxu3 }
 0x183   :  { %3191 = vmatpush.bf16.msrb.mxu1 %v7728_v1  ;;  %3157 = vmatmul.bf16.vlgmr.msra.gmra.mxu2 %v10655_v0  ;;  %v7696_v1 = vor.u32 %v9830_v26, %v7693_v48  ;;  %v7677_v0 = vld [vmem:[#allocation8 + $0x398] sm:$0xf0]  ;;  %v7552_v31 = vor.u32 %v9794_v61, %v7549_v2  ;;  %v1613_v27 = vadd.f32 %v10795_v50, %v1599_v54  ;;  %v9854_v48 = vld [vmem:[#allocation8 + $0x46c] sm:$0xf]  ;;  %v10928_v54 = vrot.slane %v11404_v20, 7 }
 0x184   :  { %3205 = vmatpush.bf16.msrb.mxu2 %v7856_v45  ;;  %3143 = vmatmul.bf16.vlgmr.msra.gmra.mxu1 %v10691_v29  ;;  %v7952_v45 = vor.u32 %v9894_v19, %v7949_v47  ;;  %v1625_v18 = vadd.f32 %v10797_v46, %v1611_v23  ;;  %v1683_v52 = vadd.f32 %v1682_v35, %v1669_v56  ;;  %v7533_v28 = vld [vmem:[#allocation8 + $0x278] sm:$0xf0]  ;;  %v9886_v19 = vld [vmem:[#allocation8 + $0x56c] sm:$0xf] }
 0x185   :  { %3171 = vmatmul.bf16.vlgmr.msra.gmra.mxu3 %v10657_v6  ;;  %v9790_v6 = vld [vmem:[#allocation8 + $0x26c] sm:$0xf]  ;;  %v7808_v46 = vor.u32 %v9858_v59, %v7805_v7  ;;  %v7936_v35 = vor.u32 %v9890_v25, %v7933_v37  ;;  %v7661_v26 = vld [vmem:[#allocation8 + $0x378] sm:$0xf0]  ;;  %v10916_v22 = vor.u32 %v11415_v16, %v3260_v13  ;;  %v10920_v47 = vpack.c.b16 %v10903_v4, %v10903_v4  ;;  %v10003_v16 = vld [vmem:[#allocation7 + $0x30c] sm:$0xf0] }
 0x186   :  { %3219 = vmatpush.bf16.msrb.mxu3 %v7984_v3  ;;  %3178 = vmatpush.bf16.msrb.mxu0 %v7584_v12  ;;  %v9826_v3 = vld [vmem:[#allocation8 + $0x38c] sm:$0xf]  ;;  %v2907_v12 = vadd.f32 %v2906_v60, %v11401_v62  ;;  %v7789_v50 = vld [vmem:[#allocation8 + $0x478] sm:$0xf0]  ;;  %v10923_v23 = vadd.f32 %v10800_v10, %v1625_v18  ;;  %v1697_v56 = vadd.f32 %v10884_v49, %v1683_v52  ;;  %v10935_v7 = vunpack.c.h.b16 %v10890_v24  ;;  %v9951_v62 = vld [vmem:[#allocation7 + $0x16c] sm:$0xf0] }
 0x187   :  { %3192 = vmatpush.bf16.msrb.mxu1 %v7712_v42  ;;  %v1709_v42 = vadd.f32 %v10868_v53, %v1695_v38  ;;  %v7680_v44 = vor.u32 %v9826_v3, %v7677_v0  ;;  %v7917_v53 = vld [vmem:[#allocation8 + $0x578] sm:$0xf0]  ;;  %v1627_v13 = vadd.f32 %v10818_v51, %v1613_v27  ;;  %v9786_v61 = vld [vmem:[#allocation8 + $0x24c] sm:$0xf]  ;;  %v7792_v10 = vor.u32 %v9854_v48, %v7789_v50 }
 0x188   :  { %3206 = vmatpush.bf16.msrb.mxu2 %v7840_v5  ;;  %v2920_v5 = vpop.f32.mrf.mxu1  ;;  %v7517_v2 = vld [vmem:[#allocation8 + $0x258] sm:$0xf0]  ;;  %v7920_v49 = vor.u32 %v9886_v19, %v7917_v53  ;;  %v9850_v0 = vld [vmem:[#allocation8 + $0x44c] sm:$0xf]  ;;  %v3321_v60 = vsel %vm10628_vm2, 0, %v10916_v22  ;;  %v1729_v18 = vmax.f32 %v10923_v23, 0.0 }
 0x189   :  { %v2921_v17 = vadd.f32 %v2920_v5, %v2907_v12  ;;  %v10932_v38 = vadd.f32 %v10875_v8, %v1709_v42  ;;  %v7645_v3 = vld [vmem:[#allocation8 + $0x358] sm:$0xf0]  ;;  %v9882_v25 = vld [vmem:[#allocation8 + $0x54c] sm:$0xf]  ;;  %v7520_v52 = vor.u32 %v9786_v61, %v7517_v2  ;;  %v1641_v12 = vadd.f32 %v10825_v58, %v1627_v13 }
 0x18a   :  { %3220 = vmatpush.bf16.msrb.mxu3 %v7968_v63  ;;  %3179 = vmatpush.bf16.msrb.mxu0 %v7568_v34  ;;  %v9822_v63 = vld [vmem:[#allocation8 + $0x36c] sm:$0xf]  ;;  %v7536_v34 = vor.u32 %v9790_v6, %v7533_v28  ;;  %v2934_v59 = vpop.f32.mrf.mxu2  ;;  %v7773_v51 = vld [vmem:[#allocation8 + $0x458] sm:$0xf0] }
 0x18b   :  { %3193 = vmatpush.bf16.msrb.mxu1 %v7696_v1  ;;  %v7664_v1 = vor.u32 %v9822_v63, %v7661_v26  ;;  %v7901_v8 = vld [vmem:[#allocation8 + $0x558] sm:$0xf0]  ;;  %v2935_v37 = vadd.f32 %v2934_v59, %v2921_v17  ;;  %v1730_v24 = vmax.f32 %v10932_v38, 0.0  ;;  %v9782_v42 = vld [vmem:[#allocation8 + $0x22c] sm:$0xf]  ;;  %v7776_v5 = vor.u32 %v9850_v0, %v7773_v51 }
 0x18c   :  { %3207 = vmatpush.bf16.msrb.mxu2 %v7824_v39  ;;  %v1711_v39 = vadd.f32 %v1710_v32, %v1697_v56  ;;  %v11403_v32 = vshrl.u32 %v10920_v47, 16  ;;  %v7629_v63 = vld [vmem:[#allocation8 + $0x338] sm:$0xf0]  ;;  %v9846_v26 = vld [vmem:[#allocation8 + $0x42c] sm:$0xf]  ;;  %v10949_v56 = vpack.c.b16 %v10935_v7, %v10935_v7 }
 0x18d   :  { %v7757_v48 = vld [vmem:[#allocation8 + $0x438] sm:$0xf0]  ;;  %v9878_v17 = vld [vmem:[#allocation8 + $0x52c] sm:$0xf]  ;;  %v8227_v0 = vld [vmem:[#allocation7 + $0x1e0] sm:$0xf] }
 0x18e   :  { %3221 = vmatpush.bf16.msrb.mxu3 %v7952_v45  ;;  %3180 = vmatpush.bf16.msrb.mxu0 %v7552_v31  ;;  %v9818_v45 = vld [vmem:[#allocation8 + $0x34c] sm:$0xf]  ;;  %v2948_v31 = vpop.f32.mrf.mxu3  ;;  %v1725_v28 = vadd.f32 %v10907_v9, %v1711_v39  ;;  %v7885_v58 = vld [vmem:[#allocation8 + $0x538] sm:$0xf0]  ;;  %v7760_v2 = vor.u32 %v9846_v26, %v7757_v48  ;;  %v9967_v51 = vld [vmem:[#allocation7 + $0x1ec] sm:$0xf0] }
 0x18f   :  { %3194 = vmatpush.bf16.msrb.mxu1 %v7680_v44  ;;  %v7648_v27 = vor.u32 %v9818_v45, %v7645_v3  ;;  %v7501_v44 = vld [vmem:[#allocation8 + $0x238] sm:$0xf0]  ;;  %v10944_v6 = vadd.f32 %v2948_v31, %v2935_v37  ;;  %v9778_v19 = vld [vmem:[#allocation8 + $0x20c] sm:$0xf]  ;;  %v7888_v39 = vor.u32 %v9878_v17, %v7885_v58  ;;  %v11402_v37 = vshrl.u32 %v10949_v56, 16 }
 0x190   :  { %3208 = vmatpush.bf16.msrb.mxu2 %v7808_v46  ;;  %v7904_v46 = vor.u32 %v9882_v25, %v7901_v8  ;;  %v7504_v50 = vor.u32 %v9782_v42, %v7501_v44  ;;  %v7485_v53 = vld [vmem:[#allocation8 + $0x218] sm:$0xf0]  ;;  %v9810_v23 = vld [vmem:[#allocation8 + $0x30c] sm:$0xf]  ;;  %v1734_v61 = vmax.f32 %v1725_v28, 0.0  ;;  %v11406_v44 = vshll.u32 %v10920_v47, 16 }
 0x191   :  { %v9842_v13 = vld [vmem:[#allocation8 + $0x40c] sm:$0xf]  ;;  %v7741_v38 = vld [vmem:[#allocation8 + $0x418] sm:$0xf0]  ;;  %v7488_v59 = vor.u32 %v9778_v19, %v7485_v53  ;;  %v8355_v25 = vld [vmem:[#allocation7 + $0x2e0] sm:$0xf]  ;;  %v10958_v53 = vor.u32 %v11410_v30, %v10928_v54 }
 0x192   :  { %3222 = vmatpush.bf16.msrb.mxu3 %v7936_v35  ;;  %3181 = vmatpush.bf16.msrb.mxu0 %v7536_v34  ;;  %v9814_v35 = vld [vmem:[#allocation8 + $0x32c] sm:$0xf]  ;;  %v7613_v34 = vld [vmem:[#allocation8 + $0x318] sm:$0xf0]  ;;  %v9999_v8 = vld [vmem:[#allocation7 + $0x2ec] sm:$0xf0] }
 0x193   :  { %3195 = vmatpush.bf16.msrb.mxu1 %v7664_v1  ;;  %v7632_v9 = vor.u32 %v9814_v35, %v7629_v63  ;;  %v1733_v1 = vmax.f32 %v1641_v12, 0.0  ;;  %v9874_v45 = vld [vmem:[#allocation8 + $0x50c] sm:$0xf]  ;;  %v7869_v3 = vld [vmem:[#allocation8 + $0x518] sm:$0xf0]  ;;  %v7616_v31 = vor.u32 %v9810_v23, %v7613_v34  ;;  %v8228_v35 = vor.u32 %v9967_v51, %v8227_v0 }
 0x194   :  { %3209 = vmatpush.bf16.msrb.mxu2 %v7792_v10  ;;  %v8099_v10 = vld [vmem:[#allocation7 + $0xe0] sm:$0xf]  ;;  %v10031_v42 = vld [vmem:[#allocation7 + $0x3ec] sm:$0xf0]  ;;  %v8356_v63 = vor.u32 %v9999_v8, %v8355_v25  ;;  %v3288_v23 = vrot.slane %v11403_v32, 7 }
 0x195   :  { %v3236_v28 = vpack.c.bf16 %v1734_v61, %v1733_v1  ;;  %v8083_v26 = vld [vmem:[#allocation7 + $0xc0] sm:$0xf]  ;;  %v9931_v48 = vld [vmem:[#allocation7 + $0xcc] sm:$0xf0] }
 0x196   :  { %3223 = vmatpush.bf16.msrb.mxu3 %v7920_v49  ;;  %3182 = vmatpush.bf16.msrb.mxu0 %v7520_v52  ;;  %v9935_v49 = vld [vmem:[#allocation7 + $0xec] sm:$0xf0]  ;;  %v3234_v52 = vpack.c.bf16 %v1730_v24, %v1729_v18  ;;  %v8211_v17 = vld [vmem:[#allocation7 + $0x1c0] sm:$0xf]  ;;  %v10953_v18 = vpop.f32.mrf.mxu0  ;;  %v8084_v54 = vor.u32 %v9931_v48, %v8083_v26  ;;  %v11017_v20 = vpop.f32.mrf.mxu3 }
 0x197   :  { %3196 = vmatpush.bf16.msrb.mxu1 %v7648_v27  ;;  %v8100_v12 = vor.u32 %v9935_v49, %v8099_v10  ;;  %v8483_v27 = vld [vmem:[#allocation7 + $0x3e0] sm:$0xf]  ;;  %v9963_v24 = vld [vmem:[#allocation7 + $0x1cc] sm:$0xf0]  ;;  %v10967_v61 = vunpack.c.l.b16 %v3236_v28 }
 0x198   :  { %3210 = vmatpush.bf16.msrb.mxu2 %v7776_v5  ;;  %v7744_v5 = vor.u32 %v9842_v13, %v7741_v38  ;;  %v8484_v58 = vor.u32 %v10031_v42, %v8483_v27  ;;  %v9995_v19 = vld [vmem:[#allocation7 + $0x2cc] sm:$0xf0]  ;;  %v8467_v34 = vld [vmem:[#allocation7 + $0x3c0] sm:$0xf]  ;;  %v11405_v38 = vshll.u32 %v10949_v56, 16  ;;  %v10965_v1 = vunpack.c.l.b16 %v3234_v52 }
 0x199   :  { %v10027_v13 = vld [vmem:[#allocation7 + $0x3cc] sm:$0xf0]  ;;  %v8067_v49 = vld [vmem:[#allocation7 + $0xa0] sm:$0xf]  ;;  %v10983_v27 = vunpack.c.h.b16 %v3234_v52 }
 0x19a   :  { %3224 = vmatpush.bf16.msrb.mxu3 %v7904_v46  ;;  %3183 = vmatpush.bf16.msrb.mxu0 %v7504_v50  ;;  %v7872_v46 = vor.u32 %v9874_v45, %v7869_v3  ;;  %v8339_v50 = vld [vmem:[#allocation7 + $0x2c0] sm:$0xf]  ;;  %v9927_v45 = vld [vmem:[#allocation7 + $0xac] sm:$0xf0]  ;;  %v8468_v0 = vor.u32 %v10027_v13, %v8467_v34 }
 0x19b   :  { %3197 = vmatpush.bf16.msrb.mxu1 %v7632_v9  ;;  %v3295_v9 = vrot.slane %v11402_v37, 7  ;;  %v8340_v10 = vor.u32 %v9995_v19, %v8339_v50  ;;  %v8195_v3 = vld [vmem:[#allocation7 + $0x1a0] sm:$0xf]  ;;  %v9991_v25 = vld [vmem:[#allocation7 + $0x2ac] sm:$0xf0]  ;;  %v8068_v52 = vor.u32 %v9927_v45, %v8067_v49  ;;  %v11000_v50 = vpack.c.b16 %v10983_v27, %v10983_v27 }
 0x19c   :  { %3211 = vmatpush.bf16.msrb.mxu2 %v7760_v2  ;;  %v10969_v2 = vpop.f32.mrf.mxu1  ;;  %v8323_v51 = vld [vmem:[#allocation7 + $0x2a0] sm:$0xf]  ;;  %v10023_v42 = vld [vmem:[#allocation7 + $0x3ac] sm:$0xf0] }
 0x19d   :  { %v9923_v26 = vld [vmem:[#allocation7 + $0x8c] sm:$0xf0]  ;;  %v8179_v48 = vld [vmem:[#allocation7 + $0x180] sm:$0xf] }
 0x19e   :  { %3225 = vmatpush.bf16.msrb.mxu3 %v7888_v39  ;;  %3184 = vmatpush.bf16.msrb.mxu0 %v7488_v59  ;;  %v8212_v39 = vor.u32 %v9963_v24, %v8211_v17  ;;  %v9959_v59 = vld [vmem:[#allocation7 + $0x1ac] sm:$0xf0]  ;;  %v8435_v19 = vld [vmem:[#allocation7 + $0x380] sm:$0xf] }
 0x19f   :  { %3198 = vmatpush.bf16.msrb.mxu1 %v7616_v31  ;;  %v10977_v31 = vor.u32 %v11406_v44, %v3288_v23  ;;  %v9987_v24 = vld [vmem:[#allocation7 + $0x28c] sm:$0xf0]  ;;  %v11002_v23 = vpop.f32.mrf.mxu2  ;;  %v8291_v37 = vld [vmem:[#allocation7 + $0x260] sm:$0xf] }
 0x1a0   :  { %3212 = vmatpush.bf16.msrb.mxu2 %v7744_v5  ;;  %v10989_v5 = vpack.c.b16 %v10965_v1, %v10965_v1  ;;  %v9983_v32 = vld [vmem:[#allocation7 + $0x26c] sm:$0xf0]  ;;  %v8611_v8 = vld [vmem:[#allocation7 + $0x4e0] sm:$0xf] }
 0x1a1   :  { %3185 = vmatmul.bf16.vlgmr.msrb.gmra.mxu0 %v10611_v15  ;;  %v8451_v15 = vld [vmem:[#allocation7 + $0x3a0] sm:$0xf]  ;;  %v9979_v44 = vld [vmem:[#allocation7 + $0x24c] sm:$0xf0] }
 0x1a2   :  { %5731 = vmatpush.bf16.msra.mxu0 %v8100_v12  ;;  %3226 = vmatpush.bf16.msrb.mxu3 %v7872_v46  ;;  %v10981_v12 = vor.u32 %v11405_v38, %v3295_v9  ;;  %v10991_v46 = vunpack.c.h.b16 %v3236_v28  ;;  %v8452_v17 = vor.u32 %v10023_v42, %v8451_v15  ;;  %v8307_v28 = vld [vmem:[#allocation7 + $0x280] sm:$0xf]  ;;  %v3325_v9 = vsel %vm10628_vm2, 0, %v10977_v31  ;;  %v9943_v30 = vld [vmem:[#allocation7 + $0x12c] sm:$0xf0] }
 0x1a3   :  { %5745 = vmatpush.bf16.msra.mxu1 %v8228_v35  ;;  %3213 = vmatmul.bf16.vlgmr.msrb.gmra.mxu2 %v10689_v21  ;;  %v10995_v35 = vpack.c.b16 %v10967_v61, %v10967_v61  ;;  %v8196_v21 = vor.u32 %v9959_v59, %v8195_v3  ;;  %v11409_v13 = vshrl.u32 %v10989_v5, 16  ;;  %v8035_v59 = vld [vmem:[#allocation7 + $0x60] sm:$0xf] }
 0x1a4   :  { %5759 = vmatpush.bf16.msra.mxu2 %v8356_v63  ;;  %3199 = vmatmul.bf16.vlgmr.msrb.gmra.mxu1 %v10636_v36  ;;  %v8324_v36 = vor.u32 %v9991_v25, %v8323_v51  ;;  %v8051_v63 = vld [vmem:[#allocation7 + $0x80] sm:$0xf]  ;;  %v3326_v34 = vsel %vm10628_vm2, 0, %v10981_v12  ;;  %v9919_v51 = vld [vmem:[#allocation7 + $0x6c] sm:$0xf0]  ;;  %v2976_v42 = vpop.f32.mrf.mxu1  ;;  %v3377_v12 = vunpack.c.l.b16 %v3321_v60 }
 0x1a5   :  { %3227 = vmatmul.bf16.vlgmr.msrb.gmra.mxu3 %v10691_v29  ;;  %v10019_v29 = vld [vmem:[#allocation7 + $0x38c] sm:$0xf0]  ;;  %v8052_v49 = vor.u32 %v9923_v26, %v8051_v63  ;;  %v8163_v25 = vld [vmem:[#allocation7 + $0x160] sm:$0xf] }
 0x1a6   :  { %5773 = vmatpush.bf16.msra.mxu3 %v8484_v58  ;;  %5732 = vmatpush.bf16.msra.mxu0 %v8084_v54  ;;  %v9955_v58 = vld [vmem:[#allocation7 + $0x18c] sm:$0xf0]  ;;  %v11013_v54 = vpack.c.b16 %v10991_v46, %v10991_v46  ;;  %v8436_v15 = vor.u32 %v10019_v29, %v8435_v19  ;;  %v8019_v19 = vld [vmem:[#allocation7 + $0x40] sm:$0xf] }
 0x1a7   :  { %5746 = vmatpush.bf16.msra.mxu1 %v8212_v39  ;;  %v11407_v39 = vshrl.u32 %v10995_v35, 16  ;;  %v8180_v3 = vor.u32 %v9955_v58, %v8179_v48  ;;  %v10015_v63 = vld [vmem:[#allocation7 + $0x36c] sm:$0xf0]  ;;  %v11414_v58 = vperm.slane %v10886_v41, 1  ;;  %v8275_v38 = vld [vmem:[#allocation7 + $0x240] sm:$0xf] }
 0x1a8   :  { %5760 = vmatpush.bf16.msra.mxu2 %v8340_v10  ;;  %v2962_v10 = vpop.f32.mrf.mxu0  ;;  %v11413_v48 = vshrl.u32 %v11013_v54, 16  ;;  %v9915_v29 = vld [vmem:[#allocation7 + $0x4c] sm:$0xf0]  ;;  %v3004_v55 = vpop.f32.mrf.mxu3 }
 0x1a9   :  { %v2963_v45 = vadd.f32 %v2962_v10, %v10944_v6  ;;  %v8419_v6 = vld [vmem:[#allocation7 + $0x360] sm:$0xf]  ;;  %v3302_v26 = vrot.slane %v11407_v39, 7  ;;  %v3274_v39 = vrot.slane %v11409_v13, 7 }
 0x1aa   :  { %5774 = vmatpush.bf16.msra.mxu3 %v8468_v0  ;;  %5733 = vmatpush.bf16.msra.mxu0 %v8068_v52  ;;  %v8308_v0 = vor.u32 %v9987_v24, %v8307_v28  ;;  %v11408_v52 = vshrl.u32 %v11000_v50, 16  ;;  %v8164_v28 = vor.u32 %v9951_v62, %v8163_v25  ;;  %v8292_v24 = vor.u32 %v9983_v32, %v8291_v37  ;;  %v8147_v10 = vld [vmem:[#allocation7 + $0x140] sm:$0xf] }
 0x1ab   :  { %5747 = vmatpush.bf16.msra.mxu1 %v8196_v21  ;;  %v11411_v21 = vshll.u32 %v10995_v35, 16  ;;  %v3309_v32 = vrot.slane %v11413_v48, 7  ;;  %v8020_v37 = vor.u32 %v9915_v29, %v8019_v19  ;;  %v11418_v48 = vshll.u32 %v10989_v5, 16  ;;  %v8387_v19 = vld [vmem:[#allocation7 + $0x320] sm:$0xf] }
 0x1ac   :  { %5761 = vmatpush.bf16.msra.mxu2 %v8324_v36  ;;  %v11021_v36 = vadd.f32 %v2976_v42, %v2963_v45  ;;  %v8420_v45 = vor.u32 %v10015_v63, %v8419_v6  ;;  %v9947_v42 = vld [vmem:[#allocation7 + $0x14c] sm:$0xf0]  ;;  %v8003_v6 = vld [vmem:[#allocation7 + $0x20] sm:$0xf] }
 0x1ad   :  { %v11033_v62 = vor.u32 %v11411_v21, %v3302_v26  ;;  %v8148_v25 = vor.u32 %v9947_v42, %v8147_v10  ;;  %v9911_v63 = vld [vmem:[#allocation7 + $0x2c] sm:$0xf0]  ;;  %v8259_v26 = vld [vmem:[#allocation7 + $0x220] sm:$0xf] }
 0x1ae   :  { %5775 = vmatpush.bf16.msra.mxu3 %v8452_v17  ;;  %5734 = vmatpush.bf16.msra.mxu0 %v8052_v49  ;;  %v8036_v17 = vor.u32 %v9919_v51, %v8035_v59  ;;  %v3281_v49 = vrot.slane %v11408_v52, 7  ;;  %v8403_v59 = vld [vmem:[#allocation7 + $0x340] sm:$0xf]  ;;  %v10011_v51 = vld [vmem:[#allocation7 + $0x34c] sm:$0xf0] }
 0x1af   :  { %5748 = vmatpush.bf16.msra.mxu1 %v8180_v3  ;;  %v2990_v3 = vpop.f32.mrf.mxu2  ;;  %v8131_v52 = vld [vmem:[#allocation7 + $0x120] sm:$0xf]  ;;  %v8404_v13 = vor.u32 %v10011_v51, %v8403_v59  ;;  %v9975_v21 = vld [vmem:[#allocation7 + $0x22c] sm:$0xf0]  ;;  %v3327_v10 = vsel %vm10628_vm2, 0, %v11033_v62 }
 0x1b0   :  { %5762 = vmatpush.bf16.msra.mxu2 %v8308_v0  ;;  %v2991_v0 = vadd.f32 %v2990_v3, %v11414_v58  ;;  %v10007_v29 = vld [vmem:[#allocation7 + $0x32c] sm:$0xf0]  ;;  %v8132_v42 = vor.u32 %v9943_v30, %v8131_v52  ;;  %v8260_v59 = vor.u32 %v9975_v21, %v8259_v26  ;;  %v8115_v51 = vld [vmem:[#allocation7 + $0x100] sm:$0xf] }
 0x1b1   :  { %v9971_v58 = vld [vmem:[#allocation7 + $0x20c] sm:$0xf0]  ;;  %v8371_v62 = vld [vmem:[#allocation7 + $0x300] sm:$0xf] }
 0x1b2   :  { %5776 = vmatpush.bf16.msra.mxu3 %v8436_v15  ;;  %5735 = vmatpush.bf16.msra.mxu0 %v8036_v17  ;;  %v8276_v15 = vor.u32 %v9979_v44, %v8275_v38  ;;  %v11416_v17 = vshll.u32 %v11013_v54, 16  ;;  %v11041_v3 = vadd.f32 %v3004_v55, %v2991_v0  ;;  %v8004_v44 = vor.u32 %v9911_v63, %v8003_v6  ;;  %v7987_v38 = vld [vmem:[#allocation7] sm:$0xf]  ;;  %v9939_v55 = vld [vmem:[#allocation7 + $0x10c] sm:$0xf0] }
 0x1b3   :  { %5749 = vmatpush.bf16.msra.mxu1 %v8164_v28  ;;  %v11417_v28 = vshll.u32 %v11000_v50, 16  ;;  %v8243_v0 = vld [vmem:[#allocation7 + $0x200] sm:$0xf]  ;;  %v8388_v63 = vor.u32 %v10007_v29, %v8387_v19  ;;  %v10095_v52 = vld [vmem:[#allocation7 + $0x5ec] sm:$0xf0]  ;;  %v3386_v29 = vunpack.c.l.b16 %v3326_v34  ;;  %v11437_v34 = vsel %vm10628_vm2, 0, %v10958_v53 }
 0x1b4   :  { %5763 = vmatpush.bf16.msra.mxu2 %v8292_v24  ;;  %v9907_v24 = vld [vmem:[#allocation7 + $0xc] sm:$0xf0]  ;;  %v8867_v21 = vld [vmem:[#allocation7 + $0x6e0] sm:$0xf] }
 0x1b5   :  { %v3284_v6 = vor.u32 %v11417_v28, %v3281_v49  ;;  %v7988_v30 = vor.u32 %v9907_v24, %v7987_v38  ;;  %v8244_v49 = vor.u32 %v9971_v58, %v8243_v0  ;;  %v8995_v26 = vld [vmem:[#allocation7 + $0x7e0] sm:$0xf]  ;;  %v10159_v19 = vld [vmem:[#allocation7 + $0x7ec] sm:$0xf0] }
 0x1b6   :  { %5777 = vmatpush.bf16.msra.mxu3 %v8420_v45  ;;  %5736 = vmatpush.bf16.msra.mxu0 %v8020_v37  ;;  %v3312_v45 = vor.u32 %v11416_v17, %v3309_v32  ;;  %v3277_v37 = vor.u32 %v11418_v48, %v3274_v39  ;;  %v10063_v32 = vld [vmem:[#allocation7 + $0x4ec] sm:$0xf0]  ;;  %v3385_v39 = vunpack.c.l.b16 %v3325_v9  ;;  %v8372_v9 = vor.u32 %v10003_v16, %v8371_v62  ;;  %v8723_v0 = vld [vmem:[#allocation7 + $0x5c0] sm:$0xf]  ;;  %v11075_v62 = vpop.f32.mrf.mxu0 }
 0x1b7   :  { %5750 = vmatpush.bf16.msra.mxu1 %v8148_v25  ;;  %v8739_v25 = vld [vmem:[#allocation7 + $0x5e0] sm:$0xf]  ;;  %v3324_v31 = vsel %vm10628_vm2, 0, %v3284_v6  ;;  %v8612_v24 = vor.u32 %v10063_v32, %v8611_v8  ;;  %v10091_v8 = vld [vmem:[#allocation7 + $0x5cc] sm:$0xf0] }
 0x1b8   :  { %5764 = vmatpush.bf16.msra.mxu2 %v8276_v15  ;;  %v10127_v15 = vld [vmem:[#allocation7 + $0x6ec] sm:$0xf0]  ;;  %v3323_v38 = vsel %vm10628_vm2, 0, %v3277_v37  ;;  %v8740_v58 = vor.u32 %v10095_v52, %v8739_v25  ;;  %v8996_v37 = vor.u32 %v10159_v19, %v8995_v26  ;;  %v8851_v6 = vld [vmem:[#allocation7 + $0x6c0] sm:$0xf]  ;;  %v3380_v22 = vunpack.c.l.b16 %v3324_v31 }
 0x1b9   :  { %v8979_v32 = vld [vmem:[#allocation7 + $0x7c0] sm:$0xf]  ;;  %v10155_v25 = vld [vmem:[#allocation7 + $0x7cc] sm:$0xf0]  ;;  %v11077_v33 = vpack.c.b16 %v3385_v39, %v3377_v12 }
 0x1ba   :  { %5778 = vmatpush.bf16.msra.mxu3 %v8404_v13  ;;  %5737 = vmatpush.bf16.msra.mxu0 %v8004_v44  ;;  %v8116_v13 = vor.u32 %v9939_v55, %v8115_v51  ;;  %v3328_v44 = vsel %vm10628_vm2, 0, %v3312_v45  ;;  %v8595_v51 = vld [vmem:[#allocation7 + $0x4c0] sm:$0xf]  ;;  %v10059_v55 = vld [vmem:[#allocation7 + $0x4cc] sm:$0xf0]  ;;  %v3378_v45 = vunpack.c.l.b16 %v11437_v34  ;;  %v8980_v39 = vor.u32 %v10155_v25, %v8979_v32  ;;  %v11093_v34 = vpop.f32.mrf.mxu3 }
 0x1bb   :  { %5751 = vmatpush.bf16.msra.mxu1 %v8132_v42  ;;  %v8868_v42 = vor.u32 %v10127_v15, %v8867_v21  ;;  %v3388_v16 = vunpack.c.l.b16 %v3328_v44  ;;  %v8596_v53 = vor.u32 %v10059_v55, %v8595_v51  ;;  %v8724_v21 = vor.u32 %v10091_v8, %v8723_v0  ;;  %v8707_v26 = vld [vmem:[#allocation7 + $0x5a0] sm:$0xf]  ;;  %v10051_v55 = vld [vmem:[#allocation7 + $0x48c] sm:$0xf0] }
 0x1bc   :  { %5765 = vmatpush.bf16.msra.mxu2 %v8260_v59  ;;  %v3387_v59 = vunpack.c.l.b16 %v3327_v10  ;;  %v3379_v10 = vunpack.c.l.b16 %v3323_v38  ;;  %v11079_v60 = vpack.c.b16 %v3386_v29, %v3378_v45  ;;  %v10087_v29 = vld [vmem:[#allocation7 + $0x5ac] sm:$0xf0]  ;;  %v8835_v44 = vld [vmem:[#allocation7 + $0x6a0] sm:$0xf] }
 0x1bd   :  { %v11086_v19 = vpack.c.b16 %v3388_v16, %v3380_v22  ;;  %v10119_v38 = vld [vmem:[#allocation7 + $0x6ac] sm:$0xf0]  ;;  %v8963_v31 = vld [vmem:[#allocation7 + $0x7a0] sm:$0xf] }
 0x1be   :  { %5779 = vmatpush.bf16.msra.mxu3 %v8388_v63  ;;  %5738 = vmatpush.bf16.msra.mxu0 %v7988_v30  ;;  %v10123_v63 = vld [vmem:[#allocation7 + $0x6cc] sm:$0xf0]  ;;  %v11081_v30 = vpop.f32.mrf.mxu1  ;;  %v11083_v52 = vpack.c.b16 %v3387_v59, %v3379_v10  ;;  %v8836_v59 = vor.u32 %v10119_v38, %v8835_v44  ;;  %v8563_v51 = vld [vmem:[#allocation7 + $0x480] sm:$0xf]  ;;  %v3018_v8 = vpop.f32.mrf.mxu0 }
 0x1bf   :  { %5752 = vmatpush.bf16.msra.mxu1 %v8116_v13  ;;  %11438 = vst [vmem:[#allocation20_spill] sm:$0xff] %v11081_v30  ;;  %v8852_v15 = vor.u32 %v10123_v63, %v8851_v6  ;;  %v8579_v13 = vld [vmem:[#allocation7 + $0x4a0] sm:$0xf]  ;;  %v10083_v45 = vld [vmem:[#allocation7 + $0x58c] sm:$0xf0]  ;;  %v3019_v10 = vadd.f32 %v3018_v8, %v11041_v3  ;;  %v8564_v32 = vor.u32 %v10051_v55, %v8563_v51 }
 0x1c0   :  { %5766 = vmatpush.bf16.msra.mxu2 %v8244_v49  ;;  %v10055_v49 = vld [vmem:[#allocation7 + $0x4ac] sm:$0xf0]  ;;  %v8691_v0 = vld [vmem:[#allocation7 + $0x580] sm:$0xf]  ;;  %v10058_v30 = vld [vmem:[#allocation7 + $0x4cc] sm:$0xf] }
 0x1c1   :  { %5739 = vmatmul.bf16.vlgmr.msra.gmra.mxu0 %v11077_v33  ;;  %v10115_v16 = vld [vmem:[#allocation7 + $0x68c] sm:$0xf0]  ;;  %v8947_v6 = vld [vmem:[#allocation7 + $0x780] sm:$0xf]  ;;  %v8692_v25 = vor.u32 %v10083_v45, %v8691_v0 }
 0x1c2   :  { %5780 = vmatpush.bf16.msra.mxu3 %v8372_v9  ;;  %5787 = vmatpush.bf16.msrb.mxu0 %v8612_v24  ;;  %v10151_v9 = vld [vmem:[#allocation7 + $0x7ac] sm:$0xf0]  ;;  %v8580_v24 = vor.u32 %v10055_v49, %v8579_v13  ;;  %v8675_v13 = vld [vmem:[#allocation7 + $0x560] sm:$0xf] }
 0x1c3   :  { %5801 = vmatpush.bf16.msrb.mxu1 %v8740_v58  ;;  %5767 = vmatmul.bf16.vlgmr.msra.gmra.mxu2 %v11083_v52  ;;  %v11091_v58 = vpop.f32.mrf.mxu2  ;;  %v8964_v12 = vor.u32 %v10151_v9, %v8963_v31  ;;  %v10147_v63 = vld [vmem:[#allocation7 + $0x78c] sm:$0xf0]  ;;  %v8931_v38 = vld [vmem:[#allocation7 + $0x760] sm:$0xf] }
 0x1c4   :  { %5815 = vmatpush.bf16.msrb.mxu2 %v8868_v42  ;;  %5753 = vmatmul.bf16.vlgmr.msra.gmra.mxu1 %v11079_v60  ;;  %v8708_v42 = vor.u32 %v10087_v29, %v8707_v26  ;;  %v8948_v49 = vor.u32 %v10147_v63, %v8947_v6  ;;  %v8803_v29 = vld [vmem:[#allocation7 + $0x660] sm:$0xf]  ;;  %v10111_v44 = vld [vmem:[#allocation7 + $0x66c] sm:$0xf0] }
 0x1c5   :  { %5781 = vmatmul.bf16.vlgmr.msra.gmra.mxu3 %v11086_v19  ;;  %v10143_v31 = vld [vmem:[#allocation7 + $0x76c] sm:$0xf0]  ;;  %v8659_v51 = vld [vmem:[#allocation7 + $0x540] sm:$0xf] }
 0x1c6   :  { %5829 = vmatpush.bf16.msrb.mxu3 %v8996_v37  ;;  %5788 = vmatpush.bf16.msrb.mxu0 %v8596_v53  ;;  %v8819_v37 = vld [vmem:[#allocation7 + $0x680] sm:$0xf]  ;;  %v3032_v53 = vpop.f32.mrf.mxu1  ;;  %v8932_v55 = vor.u32 %v10143_v31, %v8931_v38  ;;  %v10139_v6 = vld [vmem:[#allocation7 + $0x74c] sm:$0xf0]  ;;  %v11098_v48 = vpop.f32.mrf.mxu0 }
 0x1c7   :  { %5802 = vmatpush.bf16.msrb.mxu1 %v8724_v21  ;;  %v8820_v22 = vor.u32 %v10115_v16, %v8819_v37  ;;  %v8547_v21 = vld [vmem:[#allocation7 + $0x460] sm:$0xf]  ;;  %v3033_v26 = vadd.f32 %v3032_v53, %v3019_v10  ;;  %v10107_v37 = vld [vmem:[#allocation7 + $0x64c] sm:$0xf0] }
 0x1c8   :  { %5816 = vmatpush.bf16.msrb.mxu2 %v8852_v15  ;;  %v10047_v15 = vld [vmem:[#allocation7 + $0x46c] sm:$0xf0]  ;;  %v8787_v45 = vld [vmem:[#allocation7 + $0x640] sm:$0xf]  ;;  %v3060_v63 = vpop.f32.mrf.mxu3 }
 0x1c9   :  { %v8548_v9 = vor.u32 %v10047_v15, %v8547_v21  ;;  %v8915_v8 = vld [vmem:[#allocation7 + $0x740] sm:$0xf]  ;;  %v10039_v21 = vld [vmem:[#allocation7 + $0x42c] sm:$0xf0] }
 0x1ca   :  { %5830 = vmatpush.bf16.msrb.mxu3 %v8980_v39  ;;  %5789 = vmatpush.bf16.msrb.mxu0 %v8580_v24  ;;  %v10079_v39 = vld [vmem:[#allocation7 + $0x56c] sm:$0xf0]  ;;  %v8804_v24 = vor.u32 %v10111_v44, %v8803_v29  ;;  %v8515_v53 = vld [vmem:[#allocation7 + $0x420] sm:$0xf] }
 0x1cb   :  { %5803 = vmatpush.bf16.msrb.mxu1 %v8708_v42  ;;  %v8676_v3 = vor.u32 %v10079_v39, %v8675_v13  ;;  %v8531_v42 = vld [vmem:[#allocation7 + $0x440] sm:$0xf]  ;;  %v3046_v0 = vpop.f32.mrf.mxu2  ;;  %v8916_v13 = vor.u32 %v10139_v6, %v8915_v8  ;;  %v10103_v29 = vld [vmem:[#allocation7 + $0x62c] sm:$0xf0]  ;;  %v8516_v38 = vor.u32 %v10039_v21, %v8515_v53 }
 0x1cc   :  { %5817 = vmatpush.bf16.msrb.mxu2 %v8836_v59  ;;  %v10043_v59 = vld [vmem:[#allocation7 + $0x44c] sm:$0xf0]  ;;  %v3047_v16 = vadd.f32 %v3046_v0, %v3033_v26  ;;  %v8643_v15 = vld [vmem:[#allocation7 + $0x520] sm:$0xf] }
 0x1cd   :  { %v8532_v10 = vor.u32 %v10043_v59, %v8531_v42  ;;  %v8771_v39 = vld [vmem:[#allocation7 + $0x620] sm:$0xf]  ;;  %v10135_v44 = vld [vmem:[#allocation7 + $0x72c] sm:$0xf0] }
 0x1ce   :  { %5831 = vmatpush.bf16.msrb.mxu3 %v8964_v12  ;;  %5790 = vmatpush.bf16.msrb.mxu0 %v8564_v32  ;;  %v10075_v12 = vld [vmem:[#allocation7 + $0x54c] sm:$0xf0]  ;;  %v11096_v32 = vadd.f32 %v3060_v63, %v3047_v16  ;;  %v8899_v26 = vld [vmem:[#allocation7 + $0x720] sm:$0xf] }
 0x1cf   :  { %5804 = vmatpush.bf16.msrb.mxu1 %v8692_v25  ;;  %v8660_v25 = vor.u32 %v10075_v12, %v8659_v51  ;;  %v8499_v31 = vld [vmem:[#allocation7 + $0x400] sm:$0xf]  ;;  %v10067_v59 = vld [vmem:[#allocation7 + $0x50c] sm:$0xf0]  ;;  %v8900_v0 = vor.u32 %v10135_v44, %v8899_v26 }
 0x1d0   :  { %5818 = vmatpush.bf16.msrb.mxu2 %v8820_v22  ;;  %v8788_v22 = vor.u32 %v10107_v37, %v8787_v45  ;;  %v8627_v42 = vld [vmem:[#allocation7 + $0x500] sm:$0xf]  ;;  %v10131_v45 = vld [vmem:[#allocation7 + $0x70c] sm:$0xf0] }
 0x1d1   :  { %v8755_v51 = vld [vmem:[#allocation7 + $0x600] sm:$0xf]  ;;  %v10191_v16 = vld [vmem:[#allocation7 + $0x8ec] sm:$0xf0] }
 0x1d2   :  { %5832 = vmatpush.bf16.msrb.mxu3 %v8948_v49  ;;  %5791 = vmatpush.bf16.msrb.mxu0 %v8548_v9  ;;  %v10071_v49 = vld [vmem:[#allocation7 + $0x52c] sm:$0xf0]  ;;  %v8883_v12 = vld [vmem:[#allocation7 + $0x700] sm:$0xf] }
 0x1d3   :  { %5805 = vmatpush.bf16.msrb.mxu1 %v8676_v3  ;;  %v10035_v9 = vld [vmem:[#allocation7 + $0x40c] sm:$0xf0]  ;;  %v8644_v3 = vor.u32 %v10071_v49, %v8643_v15  ;;  %v9123_v37 = vld [vmem:[#allocation7 + $0x8e0] sm:$0xf] }
 0x1d4   :  { %5819 = vmatpush.bf16.msrb.mxu2 %v8804_v24  ;;  %v8772_v24 = vor.u32 %v10103_v29, %v8771_v39  ;;  %v9251_v8 = vld [vmem:[#allocation7 + $0x9e0] sm:$0xf]  ;;  %v8500_v6 = vor.u32 %v10035_v9, %v8499_v31  ;;  %v10223_v63 = vld [vmem:[#allocation7 + $0x9ec] sm:$0xf0]  ;;  %v9124_v49 = vor.u32 %v10191_v16, %v9123_v37 }
 0x1d5   :  { %v10255_v53 = vld [vmem:[#allocation7 + $0xaec] sm:$0xf0]  ;;  %v9507_v21 = vld [vmem:[#allocation7 + $0xbe0] sm:$0xf]  ;;  %v9252_v39 = vor.u32 %v10223_v63, %v9251_v8  ;;  %v11443_v8 = vshll.u32 %v10832_v14, 16 }
 0x1d6   :  { %5833 = vmatpush.bf16.msrb.mxu3 %v8932_v55  ;;  %5792 = vmatpush.bf16.msrb.mxu0 %v8532_v10  ;;  %v10099_v55 = vld [vmem:[#allocation7 + $0x60c] sm:$0xf0]  ;;  %v9379_v10 = vld [vmem:[#allocation7 + $0xae0] sm:$0xf] }
 0x1d7   :  { %5806 = vmatpush.bf16.msrb.mxu1 %v8660_v25  ;;  %v8628_v25 = vor.u32 %v10067_v59, %v8627_v42  ;;  %v10287_v15 = vld [vmem:[#allocation7 + $0xbec] sm:$0xf0]  ;;  %v9380_v29 = vor.u32 %v10255_v53, %v9379_v10  ;;  %v9107_v26 = vld [vmem:[#allocation7 + $0x8c0] sm:$0xf]  ;;  %v11102_v42 = vpack.c.b16 %v10903_v4, %v10822_v11  ;;  %v11106_v59 = vpack.c.b16 %v10935_v7, %v10849_v57 }
 0x1d8   :  { %5820 = vmatpush.bf16.msrb.mxu2 %v8788_v22  ;;  %v8756_v22 = vor.u32 %v10099_v55, %v8755_v51  ;;  %v10187_v44 = vld [vmem:[#allocation7 + $0x8cc] sm:$0xf0]  ;;  %v9235_v17 = vld [vmem:[#allocation7 + $0x9c0] sm:$0xf]  ;;  %v11112_v55 = vpop.f32.mrf.mxu1  ;;  %v11116_v57 = vpack.c.b16 %v10991_v46, %v10983_v27  ;;  %v11124_v46 = vld [vmem:[#allocation13] sm:$0xf] }
 0x1d9   :  { %v10219_v31 = vld [vmem:[#allocation7 + $0x9cc] sm:$0xf0]  ;;  %v9363_v9 = vld [vmem:[#allocation7 + $0xac0] sm:$0xf]  ;;  %11439 = vst [vmem:[#allocation21_spill] sm:$0xff] %v11102_v42  ;;  %v9108_v51 = vor.u32 %v10187_v44, %v9107_v26  ;;  %v11419_v63 = vperm.slane %v11124_v46, 2 }
 0x1da   :  { %5834 = vmatpush.bf16.msrb.mxu3 %v8916_v13  ;;  %5793 = vmatpush.bf16.msrb.mxu0 %v8516_v38  ;;  %v8884_v13 = vor.u32 %v10131_v45, %v8883_v12  ;;  %v9508_v38 = vor.u32 %v10287_v15, %v9507_v21  ;;  %v10251_v28 = vld [vmem:[#allocation7 + $0xacc] sm:$0xf0]  ;;  %11440 = vst [vmem:[#allocation22_spill] sm:$0xff] %v11106_v59  ;;  %v9091_v37 = vld [vmem:[#allocation7 + $0x8a0] sm:$0xf]  ;;  %v11127_v15 = vpop.f32.mrf.mxu2 }
 0x1db   :  { %5807 = vmatpush.bf16.msrb.mxu1 %v8644_v3  ;;  %v9491_v3 = vld [vmem:[#allocation7 + $0xbc0] sm:$0xf]  ;;  %v9236_v12 = vor.u32 %v10219_v31, %v9235_v17  ;;  %v9364_v45 = vor.u32 %v10251_v28, %v9363_v9  ;;  %v10183_v11 = vld [vmem:[#allocation7 + $0x8ac] sm:$0xf0]  ;;  %11442 = vst [vmem:[#allocation24_spill] sm:$0xff] %v11116_v57  ;;  %v11445_v31 = vshrl.u32 %v10832_v14, 16 }
 0x1dc   :  { %5821 = vmatpush.bf16.msrb.mxu2 %v8772_v24  ;;  %v10283_v24 = vld [vmem:[#allocation7 + $0xbcc] sm:$0xf0]  ;;  %v9219_v4 = vld [vmem:[#allocation7 + $0x9a0] sm:$0xf]  ;;  %v9092_v27 = vor.u32 %v10183_v11, %v9091_v37  ;;  %11444 = vst [vmem:[#allocation25_spill] sm:$0xff] %v11124_v46 }
 0x1dd   :  { %v9492_v7 = vor.u32 %v10283_v24, %v9491_v3  ;;  %v10215_v16 = vld [vmem:[#allocation7 + $0x9ac] sm:$0xf0]  ;;  %v9475_v17 = vld [vmem:[#allocation7 + $0xba0] sm:$0xf]  ;;  %v11446_v3 = vshll.u32 %v10864_v43, 16 }
 0x1de   :  { %5835 = vmatpush.bf16.msrb.mxu3 %v8900_v0  ;;  %5794 = vmatpush.bf16.msrb.mxu0 %v8500_v6  ;;  %v11110_v0 = vpack.c.b16 %v10967_v61, %v10965_v1  ;;  %v9347_v1 = vld [vmem:[#allocation7 + $0xaa0] sm:$0xf]  ;;  %v10247_v61 = vld [vmem:[#allocation7 + $0xaac] sm:$0xf0]  ;;  %v3329_v6 = vrot.slane %v11443_v8, 1  ;;  %v9220_v10 = vor.u32 %v10215_v16, %v9219_v4 }
 0x1df   :  { %5808 = vmatpush.bf16.msrb.mxu1 %v8628_v25  ;;  %v10279_v28 = vld [vmem:[#allocation7 + $0xbac] sm:$0xf0]  ;;  %v9348_v53 = vor.u32 %v10247_v61, %v9347_v1  ;;  %v9075_v25 = vld [vmem:[#allocation7 + $0x880] sm:$0xf]  ;;  %v3331_v24 = vrot.slane %v11446_v3, 1  ;;  %v11451_v3 = vshrl.u32 %v10864_v43, 16 }
 0x1e0   :  { %5822 = vmatpush.bf16.msrb.mxu2 %v8756_v22  ;;  %11441 = vst [vmem:[#allocation23_spill] sm:$0xff] %v11110_v0  ;;  %v10179_v22 = vld [vmem:[#allocation7 + $0x88c] sm:$0xf0]  ;;  %v9203_v21 = vld [vmem:[#allocation7 + $0x980] sm:$0xf]  ;;  %v11131_v9 = vor.u32 %v3329_v6, %v11445_v31  ;;  %v11448_v6 = vshll.u32 %v10920_v47, 16 }
 0x1e1   :  { %5795 = vmatmul.bf16.vlgmr.msrb.gmra.mxu0 %v11102_v42  ;;  %v9459_v26 = vld [vmem:[#allocation7 + $0xb80] sm:$0xf]  ;;  %v10275_v44 = vld [vmem:[#allocation7 + $0xb8c] sm:$0xf0]  ;;  %v3088_v14 = vpop.f32.mrf.mxu1 }
 0x1e2   :  { %5836 = vmatpush.bf16.msrb.mxu3 %v8884_v13  ;;  %5843 = vmatpush.bf16.msra.mxu0 %v9124_v49  ;;  %v9476_v13 = vor.u32 %v10279_v28, %v9475_v17  ;;  %v10211_v49 = vld [vmem:[#allocation7 + $0x98c] sm:$0xf0]  ;;  %v9059_v4 = vld [vmem:[#allocation7 + $0x860] sm:$0xf]  ;;  %v9460_v1 = vor.u32 %v10275_v44, %v9459_v26 }
 0x1e3   :  { %5857 = vmatpush.bf16.msra.mxu1 %v9252_v39  ;;  %5823 = vmatmul.bf16.vlgmr.msrb.gmra.mxu2 %v11110_v0  ;;  %v9331_v39 = vld [vmem:[#allocation7 + $0xa80] sm:$0xf]  ;;  %v9204_v37 = vor.u32 %v10211_v49, %v9203_v21  ;;  %v10207_v61 = vld [vmem:[#allocation7 + $0x96c] sm:$0xf0]  ;;  %v11450_v49 = vshll.u32 %v10995_v35, 16 }
 0x1e4   :  { %5871 = vmatpush.bf16.msra.mxu2 %v9380_v29  ;;  %5809 = vmatmul.bf16.vlgmr.msrb.gmra.mxu1 %v11106_v59  ;;  %v10243_v29 = vld [vmem:[#allocation7 + $0xa8c] sm:$0xf0]  ;;  %v9187_v16 = vld [vmem:[#allocation7 + $0x960] sm:$0xf] }
 0x1e5   :  { %5837 = vmatmul.bf16.vlgmr.msrb.gmra.mxu3 %v11116_v57  ;;  %v9332_v11 = vor.u32 %v10243_v29, %v9331_v39  ;;  %v9315_v17 = vld [vmem:[#allocation7 + $0xa60] sm:$0xf]  ;;  %v10239_v28 = vld [vmem:[#allocation7 + $0xa6c] sm:$0xf0]  ;;  %v9188_v29 = vor.u32 %v10207_v61, %v9187_v16 }
 0x1e6   :  { %5885 = vmatpush.bf16.msra.mxu3 %v9508_v38  ;;  %5844 = vmatpush.bf16.msra.mxu0 %v9108_v51  ;;  %v3074_v38 = vpop.f32.mrf.mxu0  ;;  %v11135_v51 = vpop.f32.mrf.mxu3  ;;  %v9316_v26 = vor.u32 %v10239_v28, %v9315_v17  ;;  %v9043_v44 = vld [vmem:[#allocation7 + $0x840] sm:$0xf]  ;;  %v10267_v43 = vld [vmem:[#allocation7 + $0xb4c] sm:$0xf0]  ;;  %v11456_v28 = vshrl.u32 %v10995_v35, 16 }
 0x1e7   :  { %5858 = vmatpush.bf16.msra.mxu1 %v9236_v12  ;;  %11447 = vst [vmem:[#allocation26_spill] sm:$0xff] %v11135_v51  ;;  %v9076_v12 = vor.u32 %v10179_v22, %v9075_v25  ;;  %v11449_v25 = vshll.u32 %v10949_v56, 16  ;;  %v9171_v31 = vld [vmem:[#allocation7 + $0x940] sm:$0xf]  ;;  %v3102_v21 = vpop.f32.mrf.mxu2  ;;  %v10199_v35 = vld [vmem:[#allocation7 + $0x92c] sm:$0xf0] }
 0x1e8   :  { %5872 = vmatpush.bf16.msra.mxu2 %v9364_v45  ;;  %v3075_v45 = vadd.f32 %v3074_v38, %v11419_v63  ;;  %v10171_v38 = vld [vmem:[#allocation7 + $0x84c] sm:$0xf0]  ;;  %v9427_v61 = vld [vmem:[#allocation7 + $0xb40] sm:$0xf] }
 0x1e9   :  { %v3339_v22 = vrot.slane %v11449_v25, 1  ;;  %v9299_v25 = vld [vmem:[#allocation7 + $0xa40] sm:$0xf]  ;;  %v10235_v63 = vld [vmem:[#allocation7 + $0xa4c] sm:$0xf0] }
 0x1ea   :  { %5886 = vmatpush.bf16.msra.mxu3 %v9492_v7  ;;  %5845 = vmatpush.bf16.msra.mxu0 %v9092_v27  ;;  %v10175_v7 = vld [vmem:[#allocation7 + $0x86c] sm:$0xf0]  ;;  %v3089_v8 = vadd.f32 %v3088_v14, %v3075_v45  ;;  %v3337_v27 = vrot.slane %v11448_v6, 1  ;;  %v11150_v45 = vor.u32 %v3331_v24, %v11451_v3  ;;  %v9027_v3 = vld [vmem:[#allocation7 + $0x820] sm:$0xf] }
 0x1eb   :  { %5859 = vmatpush.bf16.msra.mxu1 %v9220_v10  ;;  %v9443_v10 = vld [vmem:[#allocation7 + $0xb60] sm:$0xf]  ;;  %v9060_v39 = vor.u32 %v10175_v7, %v9059_v4  ;;  %v10203_v6 = vld [vmem:[#allocation7 + $0x94c] sm:$0xf0]  ;;  %v11454_v7 = vshll.u32 %v10989_v5, 16 }
 0x1ec   :  { %5873 = vmatpush.bf16.msra.mxu2 %v9348_v53  ;;  %v10271_v53 = vld [vmem:[#allocation7 + $0xb6c] sm:$0xf0]  ;;  %v3103_v24 = vadd.f32 %v3102_v21, %v3089_v8  ;;  %v9155_v8 = vld [vmem:[#allocation7 + $0x920] sm:$0xf] }
 0x1ed   :  { %v9444_v14 = vor.u32 %v10271_v53, %v9443_v10  ;;  %v3333_v16 = vrot.slane %v11454_v7, 1  ;;  %v9172_v53 = vor.u32 %v10203_v6, %v9171_v31  ;;  %v10231_v7 = vld [vmem:[#allocation7 + $0xa2c] sm:$0xf0] }
 0x1ee   :  { %5887 = vmatpush.bf16.msra.mxu3 %v9476_v13  ;;  %v3341_v13 = vrot.slane %v11450_v49, 1  ;;  %5846 = vmatpush.bf16.msra.mxu0 %v9076_v12  ;;  %v11452_v12 = vshrl.u32 %v10920_v47, 16  ;;  %v11457_v47 = vshll.u32 %v11013_v54, 16  ;;  %v9300_v49 = vor.u32 %v10235_v63, %v9299_v25  ;;  %v10163_v31 = vld [vmem:[#allocation7 + $0x80c] sm:$0xf0] }
 0x1ef   :  { %5860 = vmatpush.bf16.msra.mxu1 %v9204_v37  ;;  %v11453_v37 = vshrl.u32 %v10949_v56, 16  ;;  %v9044_v56 = vor.u32 %v10171_v38, %v9043_v44  ;;  %v9411_v44 = vld [vmem:[#allocation7 + $0xb20] sm:$0xf]  ;;  %v10263_v38 = vld [vmem:[#allocation7 + $0xb2c] sm:$0xf0]  ;;  %v11458_v25 = vshrl.u32 %v11013_v54, 16 }
 0x1f0   :  { %5874 = vmatpush.bf16.msra.mxu2 %v9332_v11  ;;  %v3338_v4 = vor.u32 %v3337_v27, %v11452_v12  ;;  %v11164_v10 = vor.u32 %v3341_v13, %v11456_v28  ;;  %v3343_v27 = vrot.slane %v11457_v47, 1  ;;  %v10167_v12 = vld [vmem:[#allocation7 + $0x82c] sm:$0xf0]  ;;  %v9283_v13 = vld [vmem:[#allocation7 + $0xa20] sm:$0xf]  ;;  %v11459_v28 = vshrl.u32 %v10989_v5, 16 }
 0x1f1   :  { %v11156_v11 = vor.u32 %v3339_v22, %v11453_v37  ;;  %v3116_v22 = vpop.f32.mrf.mxu3  ;;  %v9428_v37 = vor.u32 %v10267_v43, %v9427_v61  ;;  %v9028_v63 = vor.u32 %v10167_v12, %v9027_v3  ;;  %v9156_v61 = vor.u32 %v10199_v35, %v9155_v8  ;;  %v10227_v3 = vld [vmem:[#allocation7 + $0xa0c] sm:$0xf0]  ;;  %v9933_v54 = vld [vmem:[#allocation7 + $0xe4] sm:$0xf]  ;;  %v8229_v8 = vld [vmem:[#allocation7 + $0x1f0] sm:$0xf0] }
 0x1f2   :  { %5888 = vmatpush.bf16.msra.mxu3 %v9460_v1  ;;  %v11455_v1 = vshll.u32 %v11000_v50, 16  ;;  %5847 = vmatpush.bf16.msra.mxu0 %v9060_v39  ;;  %v11168_v21 = vadd.f32 %v3116_v22, %v3103_v24  ;;  %v3354_v39 = vsel %vm10673_vm5, %v11150_v45, 0  ;;  %v3359_v6 = vsel %vm10673_vm5, %v11164_v10, 0  ;;  %v10195_v24 = vld [vmem:[#allocation7 + $0x90c] sm:$0xf0] }
 0x1f3   :  { %5861 = vmatpush.bf16.msra.mxu1 %v9188_v29  ;;  %v3357_v29 = vsel %vm10673_vm5, %v3338_v4, 0  ;;  %v3344_v45 = vor.u32 %v3343_v27, %v11458_v25  ;;  %v9284_v43 = vor.u32 %v10231_v7, %v9283_v13  ;;  %v9139_v4 = vld [vmem:[#allocation7 + $0x900] sm:$0xf]  ;;  %v3334_v47 = vor.u32 %v3333_v16, %v11459_v28  ;;  %v10259_v12 = vld [vmem:[#allocation7 + $0xb0c] sm:$0xf0] }
 0x1f4   :  { %v3335_v17 = vrot.slane %v11455_v1, 1  ;;  %5875 = vmatpush.bf16.msra.mxu2 %v9316_v26  ;;  %v9011_v26 = vld [vmem:[#allocation7 + $0x800] sm:$0xf]  ;;  %v9412_v22 = vor.u32 %v10263_v38, %v9411_v44  ;;  %v8101_v27 = vld [vmem:[#allocation7 + $0xf0] sm:$0xf0]  ;;  %v3389_v7 = vunpack.c.l.b16 %v3357_v29  ;;  %v9140_v5 = vor.u32 %v10195_v24, %v9139_v4 }
 0x1f5   :  { %v9267_v1 = vld [vmem:[#allocation7 + $0xa00] sm:$0xf]  ;;  %v9997_v35 = vld [vmem:[#allocation7 + $0x2e4] sm:$0xf]  ;;  %v8357_v13 = vld [vmem:[#allocation7 + $0x2f0] sm:$0xf0] }
 0x1f6   :  { %5889 = vmatpush.bf16.msra.mxu3 %v9444_v14  ;;  %5848 = vmatpush.bf16.msra.mxu0 %v9044_v56  ;;  %v3358_v14 = vsel %vm10673_vm5, %v11156_v11, 0  ;;  %v11460_v56 = vshrl.u32 %v11000_v50, 16  ;;  %v9395_v10 = vld [vmem:[#allocation7 + $0xb00] sm:$0xf]  ;;  %v9268_v16 = vor.u32 %v10227_v3, %v9267_v1  ;;  %v10029_v50 = vld [vmem:[#allocation7 + $0x3e4] sm:$0xf]  ;;  %v8360_v25 = vor.u32 %v9997_v35, %v8357_v13 }
 0x1f7   :  { %5862 = vmatpush.bf16.msra.mxu1 %v9172_v53  ;;  %v9965_v53 = vld [vmem:[#allocation7 + $0x1e4] sm:$0xf]  ;;  %v3360_v44 = vsel %vm10673_vm5, %v3344_v45, 0  ;;  %v3355_v38 = vsel %vm10673_vm5, %v3334_v47, 0  ;;  %v8085_v4 = vld [vmem:[#allocation7 + $0xd0] sm:$0xf0]  ;;  %v3382_v1 = vunpack.c.l.b16 %v3354_v39 }
 0x1f8   :  { %5876 = vmatpush.bf16.msra.mxu2 %v9300_v49  ;;  %v3336_v11 = vor.u32 %v3335_v17, %v11460_v56  ;;  %v9012_v49 = vor.u32 %v10163_v31, %v9011_v26  ;;  %v8485_v17 = vld [vmem:[#allocation7 + $0x3f0] sm:$0xf0]  ;;  %v9396_v26 = vor.u32 %v10259_v12, %v9395_v10  ;;  %v8104_v31 = vor.u32 %v9933_v54, %v8101_v27  ;;  %v9961_v24 = vld [vmem:[#allocation7 + $0x1c4] sm:$0xf]  ;;  %v11197_v56 = vpop.f32.mrf.mxu0  ;;  %v11203_v27 = vpop.f32.mrf.mxu1 }
 0x1f9   :  { %v8232_v29 = vor.u32 %v9965_v53, %v8229_v8  ;;  %v8488_v28 = vor.u32 %v10029_v50, %v8485_v17  ;;  %v3392_v47 = vunpack.c.l.b16 %v3360_v44  ;;  %11462 = vst [vmem:[#allocation27_spill] sm:$0xff] %v11197_v56  ;;  %v8341_v3 = vld [vmem:[#allocation7 + $0x2d0] sm:$0xf0]  ;;  %v3383_v10 = vunpack.c.l.b16 %v3355_v38  ;;  %v9925_v35 = vld [vmem:[#allocation7 + $0xa4] sm:$0xf] }
 0x1fa   :  { %5890 = vmatpush.bf16.msra.mxu3 %v9428_v37  ;;  %5849 = vmatpush.bf16.msra.mxu0 %v9028_v63  ;;  %v3390_v37 = vunpack.c.l.b16 %v3358_v14  ;;  %v3356_v63 = vsel %vm10673_vm5, %v3336_v11, 0  ;;  %v11461_v14 = vsel %vm10673_vm5, %v11131_v9, 0  ;;  %v8213_v11 = vld [vmem:[#allocation7 + $0x1d0] sm:$0xf0]  ;;  %11465 = vst [vmem:[#allocation30_spill] sm:$0xff] %v11203_v27 }
 0x1fb   :  { %5863 = vmatpush.bf16.msra.mxu1 %v9156_v61  ;;  %v3391_v61 = vunpack.c.l.b16 %v3359_v6  ;;  %v3381_v45 = vunpack.c.l.b16 %v11461_v14  ;;  %v10025_v6 = vld [vmem:[#allocation7 + $0x3c4] sm:$0xf]  ;;  %v8469_v12 = vld [vmem:[#allocation7 + $0x3d0] sm:$0xf0]  ;;  %v3384_v54 = vunpack.c.l.b16 %v3356_v63  ;;  %v8219_v27 = vld [vmem:[#allocation7 + $0x1c8] sm:$0xf] }
 0x1fc   :  { %5877 = vmatpush.bf16.msra.mxu2 %v9284_v43  ;;  %v9929_v43 = vld [vmem:[#allocation7 + $0xc4] sm:$0xf]  ;;  %v11201_v9 = vpack.c.b16 %v3390_v37, %v3382_v1  ;;  %v8069_v13 = vld [vmem:[#allocation7 + $0xb0] sm:$0xf0] }
 0x1fd   :  { %v11199_v40 = vpack.c.b16 %v3389_v7, %v3381_v45  ;;  %v8088_v39 = vor.u32 %v9929_v43, %v8085_v4  ;;  %v11205_v53 = vpack.c.b16 %v3391_v61, %v3383_v10  ;;  %v8472_v7 = vor.u32 %v10025_v6, %v8469_v12  ;;  %v8197_v50 = vld [vmem:[#allocation7 + $0x1b0] sm:$0xf0]  ;;  %v9989_v17 = vld [vmem:[#allocation7 + $0x2a4] sm:$0xf] }
 0x1fe   :  { %5891 = vmatpush.bf16.msra.mxu3 %v9412_v22  ;;  %5850 = vmatpush.bf16.msra.mxu0 %v9012_v49  ;;  %v9993_v22 = vld [vmem:[#allocation7 + $0x2c4] sm:$0xf]  ;;  %11464 = vst [vmem:[#allocation29_spill] sm:$0xff] %v11201_v9  ;;  %v8216_v49 = vor.u32 %v9961_v24, %v8213_v11  ;;  %v8325_v37 = vld [vmem:[#allocation7 + $0x2b0] sm:$0xf0]  ;;  %v8072_v63 = vor.u32 %v9925_v35, %v8069_v13 }
 0x1ff   :  { %5864 = vmatpush.bf16.msra.mxu1 %v9140_v5  ;;  %11463 = vst [vmem:[#allocation28_spill] sm:$0xff] %v11199_v40  ;;  %v8344_v8 = vor.u32 %v9993_v22, %v8341_v3  ;;  %v9957_v5 = vld [vmem:[#allocation7 + $0x1a4] sm:$0xf]  ;;  %v8453_v38 = vld [vmem:[#allocation7 + $0x3b0] sm:$0xf0] }
 0x200   :  { %5878 = vmatpush.bf16.msra.mxu2 %v9268_v16  ;;  %11466 = vst [vmem:[#allocation31_spill] sm:$0xff] %v11205_v53  ;;  %v11208_v16 = vpack.c.b16 %v3392_v47, %v3384_v54  ;;  %v10021_v44 = vld [vmem:[#allocation7 + $0x3a4] sm:$0xf]  ;;  %v8181_v4 = vld [vmem:[#allocation7 + $0x190] sm:$0xf0]  ;;  %v3130_v47 = vpop.f32.mrf.mxu0 }
 0x201   :  { %5851 = vmatmul.bf16.vlgmr.msra.gmra.mxu0 %v11199_v40  ;;  %v9953_v61 = vld [vmem:[#allocation7 + $0x184] sm:$0xf]  ;;  %v8456_v43 = vor.u32 %v10021_v44, %v8453_v38  ;;  %v8309_v14 = vld [vmem:[#allocation7 + $0x290] sm:$0xf0]  ;;  %v3131_v22 = vadd.f32 %v3130_v47, %v11168_v21  ;;  %v11420_v21 = vperm.slane %v11124_v46, 3 }
 0x202   :  { %5892 = vmatpush.bf16.msra.mxu3 %v9396_v26  ;;  %5899 = vmatpush.bf16.msrb.mxu0 %v8104_v31  ;;  %11467 = vst [vmem:[#allocation32_spill] sm:$0xff] %v11208_v16  ;;  %v8200_v26 = vor.u32 %v9957_v5, %v8197_v50  ;;  %v8328_v31 = vor.u32 %v9989_v17, %v8325_v37  ;;  %v9985_v24 = vld [vmem:[#allocation7 + $0x284] sm:$0xf]  ;;  %v8437_v1 = vld [vmem:[#allocation7 + $0x390] sm:$0xf0]  ;;  %v11216_v5 = vpop.f32.mrf.mxu3 }
 0x203   :  { %5913 = vmatpush.bf16.msrb.mxu1 %v8232_v29  ;;  %5879 = vmatmul.bf16.vlgmr.msra.gmra.mxu2 %v11205_v53  ;;  %v9921_v29 = vld [vmem:[#allocation7 + $0x84] sm:$0xf]  ;;  %v8184_v3 = vor.u32 %v9953_v61, %v8181_v4  ;;  %v8312_v10 = vor.u32 %v9985_v24, %v8309_v14  ;;  %v8037_v12 = vld [vmem:[#allocation7 + $0x70] sm:$0xf0]  ;;  %11469 = vst [vmem:[#allocation34_spill] sm:$0xff] %v11216_v5 }
 0x204   :  { %5927 = vmatpush.bf16.msrb.mxu2 %v8360_v25  ;;  %5865 = vmatmul.bf16.vlgmr.msra.gmra.mxu1 %v11201_v9  ;;  %v8053_v25 = vld [vmem:[#allocation7 + $0x90] sm:$0xf0]  ;;  %v10017_v45 = vld [vmem:[#allocation7 + $0x384] sm:$0xf]  ;;  %v10252_v46 = vld [vmem:[#allocation7 + $0xad4] sm:$0xf0] }
 0x205   :  { %5893 = vmatmul.bf16.vlgmr.msra.gmra.mxu3 %v11208_v16  ;;  %v8056_v11 = vor.u32 %v9921_v29, %v8053_v25  ;;  %v9917_v6 = vld [vmem:[#allocation7 + $0x64] sm:$0xf]  ;;  %v8293_v13 = vld [vmem:[#allocation7 + $0x270] sm:$0xf0] }
 0x206   :  { %5941 = vmatpush.bf16.msrb.mxu3 %v8488_v28  ;;  %5900 = vmatpush.bf16.msrb.mxu0 %v8088_v39  ;;  %v11213_v28 = vpop.f32.mrf.mxu2  ;;  %v9949_v54 = vld [vmem:[#allocation7 + $0x164] sm:$0xf]  ;;  %v8440_v39 = vor.u32 %v10017_v45, %v8437_v1  ;;  %v8421_v17 = vld [vmem:[#allocation7 + $0x370] sm:$0xf0]  ;;  %v8040_v37 = vor.u32 %v9917_v6, %v8037_v12 }
 0x207   :  { %5914 = vmatpush.bf16.msrb.mxu1 %v8216_v49  ;;  %11468 = vst [vmem:[#allocation33_spill] sm:$0xff] %v11213_v28  ;;  %v3144_v49 = vpop.f32.mrf.mxu1  ;;  %v9981_v35 = vld [vmem:[#allocation7 + $0x264] sm:$0xf]  ;;  %v8149_v25 = vld [vmem:[#allocation7 + $0x150] sm:$0xf0] }
 0x208   :  { %5928 = vmatpush.bf16.msrb.mxu2 %v8344_v8  ;;  %v8165_v8 = vld [vmem:[#allocation7 + $0x170] sm:$0xf0]  ;;  %v10013_v50 = vld [vmem:[#allocation7 + $0x364] sm:$0xf]  ;;  %v8296_v38 = vor.u32 %v9981_v35, %v8293_v13  ;;  %v11225_v28 = vpop.f32.mrf.mxu0 }
 0x209   :  { %v8168_v44 = vor.u32 %v9949_v54, %v8165_v8  ;;  %v8424_v29 = vor.u32 %v10013_v50, %v8421_v17  ;;  %v9977_v61 = vld [vmem:[#allocation7 + $0x244] sm:$0xf]  ;;  %v8405_v24 = vld [vmem:[#allocation7 + $0x350] sm:$0xf0]  ;;  %11471 = vst [vmem:[#allocation36_spill] sm:$0xff] %v11225_v28 }
 0x20a   :  { %5942 = vmatpush.bf16.msrb.mxu3 %v8472_v7  ;;  %5901 = vmatpush.bf16.msrb.mxu0 %v8072_v63  ;;  %v11218_v7 = vadd.f32 %v3144_v49, %v3131_v22  ;;  %v9913_v63 = vld [vmem:[#allocation7 + $0x44] sm:$0xf]  ;;  %v8133_v12 = vld [vmem:[#allocation7 + $0x130] sm:$0xf0]  ;;  %v3172_v49 = vpop.f32.mrf.mxu3 }
 0x20b   :  { %5915 = vmatpush.bf16.msrb.mxu1 %v8200_v26  ;;  %v8021_v26 = vld [vmem:[#allocation7 + $0x50] sm:$0xf0]  ;;  %v10009_v4 = vld [vmem:[#allocation7 + $0x344] sm:$0xf] }
 0x20c   :  { %5929 = vmatpush.bf16.msrb.mxu2 %v8328_v31  ;;  %11470 = vst [vmem:[#allocation35_spill] sm:$0xff] %v11218_v7  ;;  %v9945_v31 = vld [vmem:[#allocation7 + $0x144] sm:$0xf]  ;;  %v8024_v45 = vor.u32 %v9913_v63, %v8021_v26  ;;  %v8408_v6 = vor.u32 %v10009_v4, %v8405_v24  ;;  %v8389_v35 = vld [vmem:[#allocation7 + $0x330] sm:$0xf0] }
 0x20d   :  { %v8152_v47 = vor.u32 %v9945_v31, %v8149_v25  ;;  %v9909_v22 = vld [vmem:[#allocation7 + $0x24] sm:$0xf]  ;;  %v8117_v26 = vld [vmem:[#allocation7 + $0x110] sm:$0xf0]  ;;  %v9994_v7 = vld [vmem:[#allocation7 + $0x2cc] sm:$0xf] }
 0x20e   :  { %5943 = vmatpush.bf16.msrb.mxu3 %v8456_v43  ;;  %5902 = vmatpush.bf16.msrb.mxu0 %v8056_v11  ;;  %v8277_v43 = vld [vmem:[#allocation7 + $0x250] sm:$0xf0]  ;;  %v3158_v14 = vpop.f32.mrf.mxu2  ;;  %v9973_v54 = vld [vmem:[#allocation7 + $0x224] sm:$0xf] }
 0x20f   :  { %5916 = vmatpush.bf16.msrb.mxu1 %v8184_v3  ;;  %v3159_v1 = vadd.f32 %v3158_v14, %v11420_v21  ;;  %v8280_v11 = vor.u32 %v9977_v61, %v8277_v43  ;;  %v8005_v3 = vld [vmem:[#allocation7 + $0x30] sm:$0xf0]  ;;  %v10005_v8 = vld [vmem:[#allocation7 + $0x324] sm:$0xf] }
 0x210   :  { %5930 = vmatpush.bf16.msrb.mxu2 %v8312_v10  ;;  %v9941_v10 = vld [vmem:[#allocation7 + $0x124] sm:$0xf]  ;;  %v8008_v50 = vor.u32 %v9909_v22, %v8005_v3  ;;  %v8245_v25 = vld [vmem:[#allocation7 + $0x210] sm:$0xf0] }
 0x211   :  { %v11223_v13 = vadd.f32 %v3172_v49, %v3159_v1  ;;  %v9905_v17 = vld [vmem:[#allocation7 + $0x4] sm:$0xf]  ;;  %v8373_v43 = vld [vmem:[#allocation7 + $0x310] sm:$0xf0] }
 0x212   :  { %5944 = vmatpush.bf16.msrb.mxu3 %v8440_v39  ;;  %5903 = vmatpush.bf16.msrb.mxu0 %v8040_v37  ;;  %v8261_v39 = vld [vmem:[#allocation7 + $0x230] sm:$0xf0]  ;;  %v9937_v63 = vld [vmem:[#allocation7 + $0x104] sm:$0xf] }
 0x213   :  { %5917 = vmatpush.bf16.msrb.mxu1 %v8168_v44  ;;  %v7989_v37 = vld [vmem:[#allocation7 + $0x10] sm:$0xf0]  ;;  %v8136_v44 = vor.u32 %v9941_v10, %v8133_v12  ;;  %v9969_v31 = vld [vmem:[#allocation7 + $0x204] sm:$0xf] }
 0x214   :  { %5931 = vmatpush.bf16.msrb.mxu2 %v8296_v38  ;;  %v8264_v38 = vor.u32 %v9973_v54, %v8261_v39  ;;  %v10001_v61 = vld [vmem:[#allocation7 + $0x304] sm:$0xf]  ;;  %v8613_v24 = vld [vmem:[#allocation7 + $0x4f0] sm:$0xf0] }
 0x215   :  { %v10061_v4 = vld [vmem:[#allocation7 + $0x4e4] sm:$0xf]  ;;  %v8741_v1 = vld [vmem:[#allocation7 + $0x5f0] sm:$0xf0] }
 0x216   :  { %5945 = vmatpush.bf16.msrb.mxu3 %v8424_v29  ;;  %5904 = vmatpush.bf16.msrb.mxu0 %v8024_v45  ;;  %v8392_v29 = vor.u32 %v10005_v8, %v8389_v35  ;;  %v10093_v14 = vld [vmem:[#allocation7 + $0x5e4] sm:$0xf]  ;;  %v7992_v45 = vor.u32 %v9905_v17, %v7989_v37  ;;  %v8869_v3 = vld [vmem:[#allocation7 + $0x6f0] sm:$0xf0]  ;;  %v8616_v54 = vor.u32 %v10061_v4, %v8613_v24 }
 0x217   :  { %5918 = vmatpush.bf16.msrb.mxu1 %v8152_v47  ;;  %v10125_v22 = vld [vmem:[#allocation7 + $0x6e4] sm:$0xf]  ;;  %v8120_v47 = vor.u32 %v9937_v63, %v8117_v26  ;;  %v8997_v12 = vld [vmem:[#allocation7 + $0x7f0] sm:$0xf0]  ;;  %v8744_v39 = vor.u32 %v10093_v14, %v8741_v1  ;;  %v11227_v26 = vpop.f32.mrf.mxu1 }
 0x218   :  { %5932 = vmatpush.bf16.msrb.mxu2 %v8280_v11  ;;  %v8248_v11 = vor.u32 %v9969_v31, %v8245_v25  ;;  %v10157_v10 = vld [vmem:[#allocation7 + $0x7e4] sm:$0xf]  ;;  %v8872_v49 = vor.u32 %v10125_v22, %v8869_v3  ;;  %v8597_v35 = vld [vmem:[#allocation7 + $0x4d0] sm:$0xf0]  ;;  %11472 = vst [vmem:[#allocation37_spill] sm:$0xff] %v11227_v26 }
 0x219   :  { %v10057_v8 = vld [vmem:[#allocation7 + $0x4c4] sm:$0xf]  ;;  %v8725_v17 = vld [vmem:[#allocation7 + $0x5d0] sm:$0xf0] }
 0x21a   :  { %5946 = vmatpush.bf16.msrb.mxu3 %v8408_v6  ;;  %5905 = vmatpush.bf16.msrb.mxu0 %v8008_v50  ;;  %v8376_v6 = vor.u32 %v10001_v61, %v8373_v43  ;;  %v10089_v21 = vld [vmem:[#allocation7 + $0x5c4] sm:$0xf]  ;;  %v9000_v50 = vor.u32 %v10157_v10, %v8997_v12  ;;  %v8853_v5 = vld [vmem:[#allocation7 + $0x6d0] sm:$0xf0]  ;;  %v8600_v63 = vor.u32 %v10057_v8, %v8597_v35 }
 0x21b   :  { %5919 = vmatpush.bf16.msrb.mxu1 %v8136_v44  ;;  %v10121_v37 = vld [vmem:[#allocation7 + $0x6c4] sm:$0xf]  ;;  %v8728_v31 = vor.u32 %v10089_v21, %v8725_v17  ;;  %v8581_v61 = vld [vmem:[#allocation7 + $0x4b0] sm:$0xf0]  ;;  %v11233_v21 = vpop.f32.mrf.mxu2 }
 0x21c   :  { %5933 = vmatpush.bf16.msrb.mxu2 %v8264_v38  ;;  %v10153_v44 = vld [vmem:[#allocation7 + $0x7c4] sm:$0xf]  ;;  %v8981_v38 = vld [vmem:[#allocation7 + $0x7d0] sm:$0xf0]  ;;  %11473 = vst [vmem:[#allocation38_spill] sm:$0xff] %v11233_v21 }
 0x21d   :  { %v10053_v25 = vld [vmem:[#allocation7 + $0x4a4] sm:$0xf]  ;;  %v8984_v4 = vor.u32 %v10153_v44, %v8981_v38  ;;  %v8709_v24 = vld [vmem:[#allocation7 + $0x5b0] sm:$0xf0]  ;;  %v8347_v21 = vld [vmem:[#allocation7 + $0x2c8] sm:$0xf] }
 0x21e   :  { %5947 = vmatpush.bf16.msrb.mxu3 %v8392_v29  ;;  %5906 = vmatpush.bf16.msrb.mxu0 %v7992_v45  ;;  %v8856_v29 = vor.u32 %v10121_v37, %v8853_v5  ;;  %v10085_v43 = vld [vmem:[#allocation7 + $0x5a4] sm:$0xf]  ;;  %v8837_v45 = vld [vmem:[#allocation7 + $0x6b0] sm:$0xf0]  ;;  %v8584_v5 = vor.u32 %v10053_v25, %v8581_v61  ;;  %v3186_v35 = vpop.f32.mrf.mxu0 }
 0x21f   :  { %5920 = vmatpush.bf16.msrb.mxu1 %v8120_v47  ;;  %v10117_v14 = vld [vmem:[#allocation7 + $0x6a4] sm:$0xf]  ;;  %v8965_v22 = vld [vmem:[#allocation7 + $0x7b0] sm:$0xf0]  ;;  %v8712_v3 = vor.u32 %v10085_v43, %v8709_v24  ;;  %v3187_v37 = vadd.f32 %v3186_v35, %v11223_v13 }
 0x220   :  { %5934 = vmatpush.bf16.msrb.mxu2 %v8248_v11  ;;  %v10149_v1 = vld [vmem:[#allocation7 + $0x7a4] sm:$0xf]  ;;  %v8840_v47 = vor.u32 %v10117_v14, %v8837_v45  ;;  %v8565_v10 = vld [vmem:[#allocation7 + $0x490] sm:$0xf0] }
 0x221   :  { %5907 = vmatmul.bf16.vlgmr.msrb.gmra.mxu0 %v11077_v33  ;;  %v10049_v11 = vld [vmem:[#allocation7 + $0x484] sm:$0xf]  ;;  %v8821_v8 = vld [vmem:[#allocation7 + $0x690] sm:$0xf0] }
 0x222   :  { %5948 = vmatpush.bf16.msrb.mxu3 %v8376_v6  ;;  %5955 = vmatpush.bf16.msra.mxu0 %v8616_v54  ;;  %v10081_v12 = vld [vmem:[#allocation7 + $0x584] sm:$0xf]  ;;  %v8968_v6 = vor.u32 %v10149_v1, %v8965_v22  ;;  %v11235_v54 = vpop.f32.mrf.mxu3  ;;  %v8949_v17 = vld [vmem:[#allocation7 + $0x790] sm:$0xf0]  ;;  %v8568_v44 = vor.u32 %v10049_v11, %v8565_v10 }
 0x223   :  { %5969 = vmatpush.bf16.msra.mxu1 %v8744_v39  ;;  %5935 = vmatmul.bf16.vlgmr.msrb.gmra.mxu2 %v11083_v52  ;;  %11474 = vst [vmem:[#allocation39_spill] sm:$0xff] %v11235_v54  ;;  %v8693_v39 = vld [vmem:[#allocation7 + $0x590] sm:$0xf0]  ;;  %v10077_v61 = vld [vmem:[#allocation7 + $0x564] sm:$0xf] }
 0x224   :  { %5983 = vmatpush.bf16.msra.mxu2 %v8872_v49  ;;  %5921 = vmatmul.bf16.vlgmr.msrb.gmra.mxu1 %v11079_v60  ;;  %v10113_v49 = vld [vmem:[#allocation7 + $0x684] sm:$0xf]  ;;  %v8696_v38 = vor.u32 %v10081_v12, %v8693_v39  ;;  %v8549_v25 = vld [vmem:[#allocation7 + $0x470] sm:$0xf0] }
 0x225   :  { %5949 = vmatmul.bf16.vlgmr.msrb.gmra.mxu3 %v11086_v19  ;;  %v8677_v24 = vld [vmem:[#allocation7 + $0x570] sm:$0xf0]  ;;  %v10109_v14 = vld [vmem:[#allocation7 + $0x664] sm:$0xf] }
 0x226   :  { %5997 = vmatpush.bf16.msra.mxu3 %v9000_v50  ;;  %5956 = vmatpush.bf16.msra.mxu0 %v8600_v63  ;;  %v10145_v50 = vld [vmem:[#allocation7 + $0x784] sm:$0xf]  ;;  %v8824_v63 = vor.u32 %v10113_v49, %v8821_v8  ;;  %v8805_v45 = vld [vmem:[#allocation7 + $0x670] sm:$0xf0]  ;;  %v8680_v13 = vor.u32 %v10077_v61, %v8677_v24  ;;  %v3214_v39 = vpop.f32.mrf.mxu2  ;;  %v11240_v54 = vpop.f32.mrf.mxu0 }
 0x227   :  { %5970 = vmatpush.bf16.msra.mxu1 %v8728_v31  ;;  %v3200_v31 = vpop.f32.mrf.mxu1  ;;  %v8952_v43 = vor.u32 %v10145_v50, %v8949_v17  ;;  %v10141_v1 = vld [vmem:[#allocation7 + $0x764] sm:$0xf]  ;;  %v8933_v22 = vld [vmem:[#allocation7 + $0x770] sm:$0xf0]  ;;  %11476 = vst [vmem:[#allocation41_spill] sm:$0xff] %v11240_v54 }
 0x228   :  { %5984 = vmatpush.bf16.msra.mxu2 %v8856_v29  ;;  %v10045_v29 = vld [vmem:[#allocation7 + $0x464] sm:$0xf]  ;;  %v8533_v11 = vld [vmem:[#allocation7 + $0x450] sm:$0xf0]  ;;  %v8936_v12 = vor.u32 %v10141_v1, %v8933_v22  ;;  %v8091_v54 = vld [vmem:[#allocation7 + $0xc8] sm:$0xf] }
 0x229   :  { %v10073_v10 = vld [vmem:[#allocation7 + $0x544] sm:$0xf]  ;;  %v8789_v8 = vld [vmem:[#allocation7 + $0x650] sm:$0xf0] }
 0x22a   :  { %5998 = vmatpush.bf16.msra.mxu3 %v8984_v4  ;;  %5957 = vmatpush.bf16.msra.mxu0 %v8584_v5  ;;  %v3201_v4 = vadd.f32 %v3200_v31, %v3187_v37  ;;  %v8552_v5 = vor.u32 %v10045_v29, %v8549_v25  ;;  %v10105_v49 = vld [vmem:[#allocation7 + $0x644] sm:$0xf]  ;;  %v8917_v17 = vld [vmem:[#allocation7 + $0x750] sm:$0xf0]  ;;  %v3228_v37 = vpop.f32.mrf.mxu3 }
 0x22b   :  { %5971 = vmatpush.bf16.msra.mxu1 %v8712_v3  ;;  %v8808_v3 = vor.u32 %v10109_v14, %v8805_v45  ;;  %v10137_v50 = vld [vmem:[#allocation7 + $0x744] sm:$0xf]  ;;  %v8792_v31 = vor.u32 %v10105_v49, %v8789_v8  ;;  %v8517_v25 = vld [vmem:[#allocation7 + $0x430] sm:$0xf0] }
 0x22c   :  { %5985 = vmatpush.bf16.msra.mxu2 %v8840_v47  ;;  %v10041_v47 = vld [vmem:[#allocation7 + $0x444] sm:$0xf]  ;;  %v3215_v35 = vadd.f32 %v3214_v39, %v3201_v4  ;;  %v8645_v24 = vld [vmem:[#allocation7 + $0x530] sm:$0xf0] }
 0x22d   :  { %v10037_v29 = vld [vmem:[#allocation7 + $0x424] sm:$0xf]  ;;  %v8773_v45 = vld [vmem:[#allocation7 + $0x630] sm:$0xf0] }
 0x22e   :  { %5999 = vmatpush.bf16.msra.mxu3 %v8968_v6  ;;  %5958 = vmatpush.bf16.msra.mxu0 %v8568_v44  ;;  %v8661_v6 = vld [vmem:[#allocation7 + $0x550] sm:$0xf0]  ;;  %v8536_v44 = vor.u32 %v10041_v47, %v8533_v11  ;;  %v10069_v61 = vld [vmem:[#allocation7 + $0x524] sm:$0xf]  ;;  %v8520_v22 = vor.u32 %v10037_v29, %v8517_v25 }
 0x22f   :  { %5972 = vmatpush.bf16.msra.mxu1 %v8696_v38  ;;  %v11238_v38 = vadd.f32 %v3228_v37, %v3215_v35  ;;  %v10101_v14 = vld [vmem:[#allocation7 + $0x624] sm:$0xf]  ;;  %v8901_v1 = vld [vmem:[#allocation7 + $0x730] sm:$0xf0] }
 0x230   :  { %5986 = vmatpush.bf16.msra.mxu2 %v8824_v63  ;;  %v8664_v63 = vor.u32 %v10073_v10, %v8661_v6  ;;  %v10133_v4 = vld [vmem:[#allocation7 + $0x724] sm:$0xf]  ;;  %v8501_v47 = vld [vmem:[#allocation7 + $0x410] sm:$0xf0] }
 0x231   :  { %11475 = vst [vmem:[#allocation40_spill] sm:$0xff] %v11238_v38  ;;  %v10065_v11 = vld [vmem:[#allocation7 + $0x504] sm:$0xf]  ;;  %v8629_v10 = vld [vmem:[#allocation7 + $0x510] sm:$0xf0]  ;;  %v8904_v6 = vor.u32 %v10133_v4, %v8901_v1 }
 0x232   :  { %6000 = vmatpush.bf16.msra.mxu3 %v8952_v43  ;;  %5959 = vmatpush.bf16.msra.mxu0 %v8552_v5  ;;  %v8920_v43 = vor.u32 %v10137_v50, %v8917_v17  ;;  %v10033_v5 = vld [vmem:[#allocation7 + $0x404] sm:$0xf]  ;;  %v8885_v8 = vld [vmem:[#allocation7 + $0x710] sm:$0xf0] }
 0x233   :  { %5973 = vmatpush.bf16.msra.mxu1 %v8680_v13  ;;  %v8648_v13 = vor.u32 %v10069_v61, %v8645_v24  ;;  %v10097_v39 = vld [vmem:[#allocation7 + $0x604] sm:$0xf]  ;;  %v9125_v50 = vld [vmem:[#allocation7 + $0x8f0] sm:$0xf0]  ;;  %v8504_v37 = vor.u32 %v10033_v5, %v8501_v47 }
 0x234   :  { %5987 = vmatpush.bf16.msra.mxu2 %v8808_v3  ;;  %v8776_v3 = vor.u32 %v10101_v14, %v8773_v45  ;;  %v10129_v49 = vld [vmem:[#allocation7 + $0x704] sm:$0xf]  ;;  %v9381_v25 = vld [vmem:[#allocation7 + $0xaf0] sm:$0xf0] }
 0x235   :  { %v10189_v35 = vld [vmem:[#allocation7 + $0x8e4] sm:$0xf]  ;;  %v9509_v24 = vld [vmem:[#allocation7 + $0xbf0] sm:$0xf0] }
 0x236   :  { %6001 = vmatpush.bf16.msra.mxu3 %v8936_v12  ;;  %5960 = vmatpush.bf16.msra.mxu0 %v8536_v44  ;;  %v8757_v12 = vld [vmem:[#allocation7 + $0x610] sm:$0xf0]  ;;  %v10221_v17 = vld [vmem:[#allocation7 + $0x9e4] sm:$0xf]  ;;  %v9128_v14 = vor.u32 %v10189_v35, %v9125_v50 }
 0x237   :  { %5974 = vmatpush.bf16.msra.mxu1 %v8664_v63  ;;  %v9253_v44 = vld [vmem:[#allocation7 + $0x9f0] sm:$0xf0]  ;;  %v10253_v29 = vld [vmem:[#allocation7 + $0xae4] sm:$0xf]  ;;  %v8632_v63 = vor.u32 %v10065_v11, %v8629_v10  ;;  %v11242_v11 = vpop.f32.mrf.mxu1 }
 0x238   :  { %5988 = vmatpush.bf16.msra.mxu2 %v8792_v31  ;;  %v8760_v31 = vor.u32 %v10097_v39, %v8757_v12  ;;  %v10285_v61 = vld [vmem:[#allocation7 + $0xbe4] sm:$0xf]  ;;  %v9256_v45 = vor.u32 %v10221_v17, %v9253_v44  ;;  %v9384_v4 = vor.u32 %v10253_v29, %v9381_v25  ;;  %v9109_v26 = vld [vmem:[#allocation7 + $0x8d0] sm:$0xf0]  ;;  %11477 = vst [vmem:[#allocation42_spill] sm:$0xff] %v11242_v11 }
 0x239   :  { %v10185_v1 = vld [vmem:[#allocation7 + $0x8c4] sm:$0xf]  ;;  %v9237_v5 = vld [vmem:[#allocation7 + $0x9d0] sm:$0xf0] }
 0x23a   :  { %6002 = vmatpush.bf16.msra.mxu3 %v8920_v43  ;;  %5961 = vmatpush.bf16.msra.mxu0 %v8520_v22  ;;  %v8888_v43 = vor.u32 %v10129_v49, %v8885_v8  ;;  %v10217_v38 = vld [vmem:[#allocation7 + $0x9c4] sm:$0xf]  ;;  %v9512_v22 = vor.u32 %v10285_v61, %v9509_v24  ;;  %v9365_v28 = vld [vmem:[#allocation7 + $0xad0] sm:$0xf0]  ;;  %v9112_v10 = vor.u32 %v10185_v1, %v9109_v26 }
 0x23b   :  { %5975 = vmatpush.bf16.msra.mxu1 %v8648_v13  ;;  %v10249_v47 = vld [vmem:[#allocation7 + $0xac4] sm:$0xf]  ;;  %v9093_v49 = vld [vmem:[#allocation7 + $0x8b0] sm:$0xf0] }
 0x23c   :  { %5989 = vmatpush.bf16.msra.mxu2 %v8776_v3  ;;  %v10281_v13 = vld [vmem:[#allocation7 + $0xbc4] sm:$0xf]  ;;  %v9493_v3 = vld [vmem:[#allocation7 + $0xbd0] sm:$0xf0]  ;;  %v9368_v12 = vor.u32 %v10249_v47, %v9365_v28 }
 0x23d   :  { %v10181_v39 = vld [vmem:[#allocation7 + $0x8a4] sm:$0xf]  ;;  %v9496_v50 = vor.u32 %v10281_v13, %v9493_v3  ;;  %v9221_v17 = vld [vmem:[#allocation7 + $0x9b0] sm:$0xf0] }
 0x23e   :  { %6003 = vmatpush.bf16.msra.mxu3 %v8904_v6  ;;  %5962 = vmatpush.bf16.msra.mxu0 %v8504_v37  ;;  %v9240_v6 = vor.u32 %v10217_v38, %v9237_v5  ;;  %v10213_v8 = vld [vmem:[#allocation7 + $0x9a4] sm:$0xf]  ;;  %v9349_v44 = vld [vmem:[#allocation7 + $0xab0] sm:$0xf0]  ;;  %v9096_v28 = vor.u32 %v10181_v39, %v9093_v49  ;;  %v5740_v5 = vpop.f32.mrf.mxu0 }
 0x23f   :  { %5976 = vmatpush.bf16.msra.mxu1 %v8632_v63  ;;  %v11244_v35 = vld [vmem:[#allocation11] sm:$0xf]  ;;  %v9477_v29 = vld [vmem:[#allocation7 + $0xbb0] sm:$0xf0]  ;;  %v9224_v25 = vor.u32 %v10213_v8, %v9221_v17 }
 0x240   :  { %5990 = vmatpush.bf16.msra.mxu2 %v8760_v31  ;;  %v10245_v37 = vld [vmem:[#allocation7 + $0xaa4] sm:$0xf]  ;;  %v3779_v38 = vperm.slane %v11244_v35, 0  ;;  %v9077_v61 = vld [vmem:[#allocation7 + $0x890] sm:$0xf0] }
 0x241   :  { %5963 = vmatmul.bf16.vlgmr.msra.gmra.mxu0 %v11102_v42  ;;  %v10277_v26 = vld [vmem:[#allocation7 + $0xba4] sm:$0xf]  ;;  %v9352_v63 = vor.u32 %v10245_v37, %v9349_v44  ;;  %v9333_v1 = vld [vmem:[#allocation7 + $0xa90] sm:$0xf0] }
 0x242   :  { %6004 = vmatpush.bf16.msra.mxu3 %v8888_v43  ;;  %6011 = vmatpush.bf16.msrb.mxu0 %v9128_v14  ;;  %v10177_v31 = vld [vmem:[#allocation7 + $0x884] sm:$0xf]  ;;  %v11251_v43 = vpop.f32.mrf.mxu2  ;;  %v9480_v14 = vor.u32 %v10277_v26, %v9477_v29  ;;  %v9461_v13 = vld [vmem:[#allocation7 + $0xb90] sm:$0xf0]  ;;  %v5741_v3 = vadd.f32 %v5740_v5, %v3779_v38 }
 0x243   :  { %6025 = vmatpush.bf16.msrb.mxu1 %v9256_v45  ;;  %5991 = vmatmul.bf16.vlgmr.msra.gmra.mxu2 %v11110_v0  ;;  %v10209_v24 = vld [vmem:[#allocation7 + $0x984] sm:$0xf]  ;;  %11478 = vst [vmem:[#allocation43_spill] sm:$0xff] %v11251_v43  ;;  %v9205_v45 = vld [vmem:[#allocation7 + $0x990] sm:$0xf0]  ;;  %v9080_v39 = vor.u32 %v10177_v31, %v9077_v61 }
 0x244   :  { %6039 = vmatpush.bf16.msrb.mxu2 %v9384_v4  ;;  %5977 = vmatmul.bf16.vlgmr.msra.gmra.mxu1 %v11106_v59  ;;  %v10241_v4 = vld [vmem:[#allocation7 + $0xa84] sm:$0xf]  ;;  %v9061_v8 = vld [vmem:[#allocation7 + $0x870] sm:$0xf0] }
 0x245   :  { %6005 = vmatmul.bf16.vlgmr.msra.gmra.mxu3 %v11116_v57  ;;  %v10273_v47 = vld [vmem:[#allocation7 + $0xb84] sm:$0xf]  ;;  %v9189_v37 = vld [vmem:[#allocation7 + $0x970] sm:$0xf0] }
 0x246   :  { %6053 = vmatpush.bf16.msrb.mxu3 %v9512_v22  ;;  %6012 = vmatpush.bf16.msrb.mxu0 %v9112_v10  ;;  %v11253_v22 = vpop.f32.mrf.mxu3  ;;  %v5754_v10 = vpop.f32.mrf.mxu1  ;;  %v10173_v49 = vld [vmem:[#allocation7 + $0x864] sm:$0xf]  ;;  %v9464_v17 = vor.u32 %v10273_v47, %v9461_v13  ;;  %v9317_v26 = vld [vmem:[#allocation7 + $0xa70] sm:$0xf0] }
 0x247   :  { %6026 = vmatpush.bf16.msrb.mxu1 %v9240_v6  ;;  %11479 = vst [vmem:[#allocation44_spill] sm:$0xff] %v11253_v22  ;;  %v9208_v6 = vor.u32 %v10209_v24, %v9205_v45  ;;  %v10205_v35 = vld [vmem:[#allocation7 + $0x964] sm:$0xf]  ;;  %v9445_v22 = vld [vmem:[#allocation7 + $0xb70] sm:$0xf0] }
 0x248   :  { %6040 = vmatpush.bf16.msrb.mxu2 %v9368_v12  ;;  %v9336_v12 = vor.u32 %v10241_v4, %v9333_v1  ;;  %v10237_v44 = vld [vmem:[#allocation7 + $0xa64] sm:$0xf]  ;;  %v9192_v31 = vor.u32 %v10205_v35, %v9189_v37  ;;  %v9045_v61 = vld [vmem:[#allocation7 + $0x850] sm:$0xf0] }
 0x249   :  { %v10269_v29 = vld [vmem:[#allocation7 + $0xb64] sm:$0xf]  ;;  %v9301_v5 = vld [vmem:[#allocation7 + $0xa50] sm:$0xf0] }
 0x24a   :  { %6054 = vmatpush.bf16.msrb.mxu3 %v9496_v50  ;;  %6013 = vmatpush.bf16.msrb.mxu0 %v9096_v28  ;;  %v5755_v50 = vadd.f32 %v5754_v10, %v5741_v3  ;;  %v9064_v28 = vor.u32 %v10173_v49, %v9061_v8  ;;  %v10201_v24 = vld [vmem:[#allocation7 + $0x944] sm:$0xf]  ;;  %v9448_v45 = vor.u32 %v10269_v29, %v9445_v22  ;;  %v5768_v4 = vpop.f32.mrf.mxu2  ;;  %v5742_v3 = vpop.f32.mrf.mxu0  ;;  %v9429_v43 = vld [vmem:[#allocation7 + $0xb50] sm:$0xf0] }
 0x24b   :  { %6027 = vmatpush.bf16.msrb.mxu1 %v9224_v25  ;;  %v9320_v25 = vor.u32 %v10237_v44, %v9317_v26  ;;  %v10233_v1 = vld [vmem:[#allocation7 + $0xa44] sm:$0xf]  ;;  %v9157_v26 = vld [vmem:[#allocation7 + $0x930] sm:$0xf0] }
 0x24c   :  { %6041 = vmatpush.bf16.msrb.mxu2 %v9352_v63  ;;  %v10169_v63 = vld [vmem:[#allocation7 + $0x844] sm:$0xf]  ;;  %v5769_v47 = vadd.f32 %v5768_v4, %v5755_v50  ;;  %v9304_v35 = vor.u32 %v10233_v1, %v9301_v5  ;;  %v9285_v4 = vld [vmem:[#allocation7 + $0xa30] sm:$0xf0] }
 0x24d   :  { %v10265_v10 = vld [vmem:[#allocation7 + $0xb44] sm:$0xf] }
 0x24e   :  { %6055 = vmatpush.bf16.msrb.mxu3 %v9480_v14  ;;  %6014 = vmatpush.bf16.msrb.mxu0 %v9080_v39  ;;  %v9173_v14 = vld [vmem:[#allocation7 + $0x950] sm:$0xf0]  ;;  %v5782_v13 = vpop.f32.mrf.mxu3  ;;  %v5743_v39 = vadd.f32 %v5742_v3, %v3779_v38  ;;  %v5756_v49 = vpop.f32.mrf.mxu1  ;;  %v10165_v22 = vld [vmem:[#allocation7 + $0x824] sm:$0xf]  ;;  %v9432_v50 = vor.u32 %v10265_v10, %v9429_v43  ;;  %v8107_v10 = vld [vmem:[#allocation7 + $0xe8] sm:$0xf] }
 0x24f   :  { %6028 = vmatpush.bf16.msrb.mxu1 %v9208_v6  ;;  %v9048_v6 = vor.u32 %v10169_v63, %v9045_v61  ;;  %v9176_v8 = vor.u32 %v10201_v24, %v9173_v14  ;;  %v10197_v37 = vld [vmem:[#allocation7 + $0x924] sm:$0xf]  ;;  %v9141_v14 = vld [vmem:[#allocation7 + $0x910] sm:$0xf0] }
 0x250   :  { %6042 = vmatpush.bf16.msrb.mxu2 %v9336_v12  ;;  %v11255_v12 = vadd.f32 %v5782_v13, %v5769_v47  ;;  %v5757_v44 = vadd.f32 %v5756_v49, %v5743_v39  ;;  %v10229_v29 = vld [vmem:[#allocation7 + $0xa24] sm:$0xf]  ;;  %v9160_v63 = vor.u32 %v10197_v37, %v9157_v26  ;;  %v9269_v43 = vld [vmem:[#allocation7 + $0xa10] sm:$0xf0]  ;;  %v9936_v39 = vld [vmem:[#allocation7 + $0xf4] sm:$0xf0] }
 0x251   :  { %v10261_v11 = vld [vmem:[#allocation7 + $0xb24] sm:$0xf]  ;;  %v9288_v61 = vor.u32 %v10229_v29, %v9285_v4  ;;  %v9397_v13 = vld [vmem:[#allocation7 + $0xb10] sm:$0xf0]  ;;  %v8491_v26 = vld [vmem:[#allocation7 + $0x3e8] sm:$0xf] }
 0x252   :  { %6056 = vmatpush.bf16.msrb.mxu3 %v9464_v17  ;;  %6015 = vmatpush.bf16.msrb.mxu0 %v9064_v28  ;;  %v9029_v17 = vld [vmem:[#allocation7 + $0x830] sm:$0xf0]  ;;  %v10193_v24 = vld [vmem:[#allocation7 + $0x904] sm:$0xf]  ;;  %v5770_v5 = vpop.f32.mrf.mxu2  ;;  %v10032_v29 = vld [vmem:[#allocation7 + $0x3f4] sm:$0xf0] }
 0x253   :  { %6029 = vmatpush.bf16.msrb.mxu1 %v9192_v31  ;;  %v9413_v28 = vld [vmem:[#allocation7 + $0xb30] sm:$0xf0]  ;;  %v9032_v38 = vor.u32 %v10165_v22, %v9029_v17  ;;  %v10161_v31 = vld [vmem:[#allocation7 + $0x804] sm:$0xf]  ;;  %v5771_v3 = vadd.f32 %v5770_v5, %v5757_v44  ;;  %v10000_v17 = vld [vmem:[#allocation7 + $0x2f4] sm:$0xf0]  ;;  %v8108_v44 = vor.u32 %v9936_v39, %v8107_v10 }
 0x254   :  { %6043 = vmatpush.bf16.msrb.mxu2 %v9320_v25  ;;  %v9013_v25 = vld [vmem:[#allocation7 + $0x810] sm:$0xf0]  ;;  %v10225_v1 = vld [vmem:[#allocation7 + $0xa04] sm:$0xf]  ;;  %v9960_v10 = vld [vmem:[#allocation7 + $0x1b4] sm:$0xf0] }
 0x255   :  { %v10257_v47 = vld [vmem:[#allocation7 + $0xb04] sm:$0xf]  ;;  %v9016_v22 = vor.u32 %v10161_v31, %v9013_v25  ;;  %v8492_v31 = vor.u32 %v10032_v29, %v8491_v26  ;;  %v9964_v25 = vld [vmem:[#allocation7 + $0x1d4] sm:$0xf0]  ;;  %v8331_v39 = vld [vmem:[#allocation7 + $0x2a8] sm:$0xf] }
 0x256   :  { %6057 = vmatpush.bf16.msrb.mxu3 %v9448_v45  ;;  %6016 = vmatpush.bf16.msrb.mxu0 %v9048_v6  ;;  %v9416_v45 = vor.u32 %v10261_v11, %v9413_v28  ;;  %v8235_v6 = vld [vmem:[#allocation7 + $0x1e8] sm:$0xf]  ;;  %v5784_v49 = vpop.f32.mrf.mxu3  ;;  %v9272_v11 = vor.u32 %v10225_v1, %v9269_v43  ;;  %v9400_v4 = vor.u32 %v10257_v47, %v9397_v13  ;;  %v9928_v47 = vld [vmem:[#allocation7 + $0xb4] sm:$0xf0] }
 0x257   :  { %6030 = vmatpush.bf16.msrb.mxu1 %v9176_v8  ;;  %v9968_v8 = vld [vmem:[#allocation7 + $0x1f4] sm:$0xf0]  ;;  %v11257_v37 = vadd.f32 %v5784_v49, %v5771_v3  ;;  %v8220_v1 = vor.u32 %v9964_v25, %v8219_v27  ;;  %v8075_v43 = vld [vmem:[#allocation7 + $0xa8] sm:$0xf] }
 0x258   :  { %6044 = vmatpush.bf16.msrb.mxu2 %v9304_v35  ;;  %v8363_v35 = vld [vmem:[#allocation7 + $0x2e8] sm:$0xf]  ;;  %v8236_v28 = vor.u32 %v9968_v8, %v8235_v6  ;;  %v9992_v6 = vld [vmem:[#allocation7 + $0x2b4] sm:$0xf0]  ;;  %v8076_v27 = vor.u32 %v9928_v47, %v8075_v43 }
 0x259   :  { %v8364_v5 = vor.u32 %v10000_v17, %v8363_v35  ;;  %v8203_v13 = vld [vmem:[#allocation7 + $0x1a8] sm:$0xf]  ;;  %v9924_v35 = vld [vmem:[#allocation7 + $0x94] sm:$0xf0] }
 0x25a   :  { %6058 = vmatpush.bf16.msrb.mxu3 %v9432_v50  ;;  %6017 = vmatpush.bf16.msrb.mxu0 %v9032_v38  ;;  %v9144_v50 = vor.u32 %v10193_v24, %v9141_v14  ;;  %v9932_v38 = vld [vmem:[#allocation7 + $0xd4] sm:$0xf0]  ;;  %v8459_v49 = vld [vmem:[#allocation7 + $0x3a8] sm:$0xf] }
 0x25b   :  { %6031 = vmatpush.bf16.msrb.mxu1 %v9160_v63  ;;  %v9996_v63 = vld [vmem:[#allocation7 + $0x2d4] sm:$0xf0]  ;;  %v8092_v14 = vor.u32 %v9932_v38, %v8091_v54  ;;  %v8059_v8 = vld [vmem:[#allocation7 + $0x88] sm:$0xf] }
 0x25c   :  { %6045 = vmatpush.bf16.msrb.mxu2 %v9288_v61  ;;  %v8475_v61 = vld [vmem:[#allocation7 + $0x3c8] sm:$0xf]  ;;  %v10028_v24 = vld [vmem:[#allocation7 + $0x3d4] sm:$0xf0] }
 0x25d   :  { %v8476_v3 = vor.u32 %v10028_v24, %v8475_v61  ;;  %v10024_v54 = vld [vmem:[#allocation7 + $0x3b4] sm:$0xf0]  ;;  %v8187_v17 = vld [vmem:[#allocation7 + $0x188] sm:$0xf] }
 0x25e   :  { %6059 = vmatpush.bf16.msrb.mxu3 %v9416_v45  ;;  %6018 = vmatpush.bf16.msrb.mxu0 %v9016_v22  ;;  %v8348_v45 = vor.u32 %v9996_v63, %v8347_v21  ;;  %v8204_v21 = vor.u32 %v9960_v10, %v8203_v13  ;;  %v8332_v22 = vor.u32 %v9992_v6, %v8331_v39  ;;  %v8315_v26 = vld [vmem:[#allocation7 + $0x288] sm:$0xf]  ;;  %v9988_v29 = vld [vmem:[#allocation7 + $0x294] sm:$0xf0] }
 0x25f   :  { %6032 = vmatpush.bf16.msrb.mxu1 %v9144_v50  ;;  %v8460_v50 = vor.u32 %v10024_v54, %v8459_v49  ;;  %v8316_v38 = vor.u32 %v9988_v29, %v8315_v26  ;;  %v9920_v25 = vld [vmem:[#allocation7 + $0x74] sm:$0xf0]  ;;  %v8171_v63 = vld [vmem:[#allocation7 + $0x168] sm:$0xf] }
 0x260   :  { %6046 = vmatpush.bf16.msrb.mxu2 %v9272_v11  ;;  %v9956_v11 = vld [vmem:[#allocation7 + $0x194] sm:$0xf0]  ;;  %v8027_v10 = vld [vmem:[#allocation7 + $0x48] sm:$0xf] }
 0x261   :  { %6019 = vmatmul.bf16.vlgmr.msrb.gmra.mxu0 %v11199_v40  ;;  %v9952_v24 = vld [vmem:[#allocation7 + $0x174] sm:$0xf0]  ;;  %v8155_v6 = vld [vmem:[#allocation7 + $0x148] sm:$0xf] }
 0x262   :  { %6060 = vmatpush.bf16.msrb.mxu3 %v9400_v4  ;;  %6067 = vmatpush.bf16.msra.mxu0 %v8108_v44  ;;  %v8443_v4 = vld [vmem:[#allocation7 + $0x388] sm:$0xf]  ;;  %v10020_v44 = vld [vmem:[#allocation7 + $0x394] sm:$0xf0]  ;;  %v8172_v13 = vor.u32 %v9952_v24, %v8171_v63 }
 0x263   :  { %6081 = vmatpush.bf16.msra.mxu1 %v8236_v28  ;;  %6047 = vmatmul.bf16.vlgmr.msrb.gmra.mxu2 %v11205_v53  ;;  %v8060_v28 = vor.u32 %v9924_v35, %v8059_v8  ;;  %v8444_v61 = vor.u32 %v10020_v44, %v8443_v4  ;;  %v10016_v43 = vld [vmem:[#allocation7 + $0x374] sm:$0xf0]  ;;  %v8139_v29 = vld [vmem:[#allocation7 + $0x128] sm:$0xf] }
 0x264   :  { %6095 = vmatpush.bf16.msra.mxu2 %v8364_v5  ;;  %6033 = vmatmul.bf16.vlgmr.msrb.gmra.mxu1 %v11201_v9  ;;  %v8188_v5 = vor.u32 %v9956_v11, %v8187_v17  ;;  %v9916_v39 = vld [vmem:[#allocation7 + $0x54] sm:$0xf0]  ;;  %v8011_v11 = vld [vmem:[#allocation7 + $0x28] sm:$0xf] }
 0x265   :  { %6061 = vmatmul.bf16.vlgmr.msrb.gmra.mxu3 %v11208_v16  ;;  %v9948_v54 = vld [vmem:[#allocation7 + $0x154] sm:$0xf0]  ;;  %v8028_v35 = vor.u32 %v9916_v39, %v8027_v10  ;;  %v8379_v10 = vld [vmem:[#allocation7 + $0x308] sm:$0xf] }
 0x266   :  { %6109 = vmatpush.bf16.msra.mxu3 %v8492_v31  ;;  %6068 = vmatpush.bf16.msra.mxu0 %v8092_v14  ;;  %v8043_v31 = vld [vmem:[#allocation7 + $0x68] sm:$0xf]  ;;  %v10012_v8 = vld [vmem:[#allocation7 + $0x354] sm:$0xf0]  ;;  %v8156_v17 = vor.u32 %v9948_v54, %v8155_v6 }
 0x267   :  { %6082 = vmatpush.bf16.msra.mxu1 %v8220_v1  ;;  %v8299_v14 = vld [vmem:[#allocation7 + $0x268] sm:$0xf]  ;;  %v9984_v1 = vld [vmem:[#allocation7 + $0x274] sm:$0xf0]  ;;  %v8044_v47 = vor.u32 %v9920_v25, %v8043_v31 }
 0x268   :  { %6096 = vmatpush.bf16.msra.mxu2 %v8348_v45  ;;  %v8427_v45 = vld [vmem:[#allocation7 + $0x368] sm:$0xf]  ;;  %v9912_v26 = vld [vmem:[#allocation7 + $0x34] sm:$0xf0] }
 0x269   :  { %v8428_v49 = vor.u32 %v10016_v43, %v8427_v45  ;;  %v9944_v44 = vld [vmem:[#allocation7 + $0x134] sm:$0xf0]  ;;  %v8395_v31 = vld [vmem:[#allocation7 + $0x328] sm:$0xf]  ;;  %v8012_v63 = vor.u32 %v9912_v26, %v8011_v11 }
 0x26a   :  { %6110 = vmatpush.bf16.msra.mxu3 %v8476_v3  ;;  %6069 = vmatpush.bf16.msra.mxu0 %v8076_v27  ;;  %v8300_v3 = vor.u32 %v9984_v1, %v8299_v14  ;;  %v8283_v27 = vld [vmem:[#allocation7 + $0x248] sm:$0xf]  ;;  %v10008_v25 = vld [vmem:[#allocation7 + $0x334] sm:$0xf0]  ;;  %v8140_v14 = vor.u32 %v9944_v44, %v8139_v29  ;;  %v5824_v29 = vpop.f32.mrf.mxu2 }
 0x26b   :  { %6083 = vmatpush.bf16.msra.mxu1 %v8204_v21  ;;  %v9980_v21 = vld [vmem:[#allocation7 + $0x254] sm:$0xf0]  ;;  %v8123_v45 = vld [vmem:[#allocation7 + $0x108] sm:$0xf] }
 0x26c   :  { %6097 = vmatpush.bf16.msra.mxu2 %v8332_v22  ;;  %v8411_v22 = vld [vmem:[#allocation7 + $0x348] sm:$0xf]  ;;  %v9908_v24 = vld [vmem:[#allocation7 + $0x14] sm:$0xf0] }
 0x26d   :  { %v8412_v4 = vor.u32 %v10012_v8, %v8411_v22  ;;  %v9940_v43 = vld [vmem:[#allocation7 + $0x114] sm:$0xf0]  ;;  %v8619_v6 = vld [vmem:[#allocation7 + $0x4e8] sm:$0xf] }
 0x26e   :  { %6111 = vmatpush.bf16.msra.mxu3 %v8460_v50  ;;  %6070 = vmatpush.bf16.msra.mxu0 %v8060_v28  ;;  %v8284_v50 = vor.u32 %v9980_v21, %v8283_v27  ;;  %v8267_v28 = vld [vmem:[#allocation7 + $0x228] sm:$0xf]  ;;  %v10004_v39 = vld [vmem:[#allocation7 + $0x314] sm:$0xf0]  ;;  %v5810_v27 = vpop.f32.mrf.mxu1 }
 0x26f   :  { %6084 = vmatpush.bf16.msra.mxu1 %v8188_v5  ;;  %v9976_v5 = vld [vmem:[#allocation7 + $0x234] sm:$0xf0]  ;;  %v8747_v54 = vld [vmem:[#allocation7 + $0x5e8] sm:$0xf] }
 0x270   :  { %6098 = vmatpush.bf16.msra.mxu2 %v8316_v38  ;;  %v5796_v38 = vpop.f32.mrf.mxu0  ;;  %v8268_v1 = vor.u32 %v9976_v5, %v8267_v28  ;;  %v10096_v22 = vld [vmem:[#allocation7 + $0x5f4] sm:$0xf0]  ;;  %v8875_v8 = vld [vmem:[#allocation7 + $0x6e8] sm:$0xf] }
 0x271   :  { %v9003_v11 = vld [vmem:[#allocation7 + $0x7e8] sm:$0xf]  ;;  %v10160_v26 = vld [vmem:[#allocation7 + $0x7f4] sm:$0xf0]  ;;  %v5797_v28 = vadd.f32 %v5796_v38, %v11255_v12  ;;  %v8748_v5 = vor.u32 %v10096_v22, %v8747_v54 }
 0x272   :  { %6112 = vmatpush.bf16.msra.mxu3 %v8444_v61  ;;  %6071 = vmatpush.bf16.msra.mxu0 %v8044_v47  ;;  %v7995_v61 = vld [vmem:[#allocation7 + $0x8] sm:$0xf]  ;;  %v9004_v56 = vor.u32 %v10160_v26, %v9003_v11 }
 0x273   :  { %6085 = vmatpush.bf16.msra.mxu1 %v8172_v13  ;;  %v8251_v47 = vld [vmem:[#allocation7 + $0x208] sm:$0xf]  ;;  %v8396_v13 = vor.u32 %v10008_v25, %v8395_v31  ;;  %v7996_v21 = vor.u32 %v9908_v24, %v7995_v61  ;;  %v5838_v24 = vpop.f32.mrf.mxu3  ;;  %v5811_v38 = vadd.f32 %v5810_v27, %v5797_v28 }
 0x274   :  { %6099 = vmatpush.bf16.msra.mxu2 %v8300_v3  ;;  %v9972_v3 = vld [vmem:[#allocation7 + $0x214] sm:$0xf0]  ;;  %v8603_v25 = vld [vmem:[#allocation7 + $0x4c8] sm:$0xf] }
 0x275   :  { %v8731_v61 = vld [vmem:[#allocation7 + $0x5c8] sm:$0xf] }
 0x276   :  { %6113 = vmatpush.bf16.msra.mxu3 %v8428_v49  ;;  %6072 = vmatpush.bf16.msra.mxu0 %v8028_v35  ;;  %v10064_v49 = vld [vmem:[#allocation7 + $0x4f4] sm:$0xf0]  ;;  %v8843_v22 = vld [vmem:[#allocation7 + $0x6a8] sm:$0xf] }
 0x277   :  { %6086 = vmatpush.bf16.msra.mxu1 %v8156_v17  ;;  %v10128_v35 = vld [vmem:[#allocation7 + $0x6f4] sm:$0xf0]  ;;  %v8124_v17 = vor.u32 %v9940_v43, %v8123_v45  ;;  %v8620_v44 = vor.u32 %v10064_v49, %v8619_v6  ;;  %v8715_v49 = vld [vmem:[#allocation7 + $0x5a8] sm:$0xf] }
 0x278   :  { %6100 = vmatpush.bf16.msra.mxu2 %v8284_v50  ;;  %v8252_v50 = vor.u32 %v9972_v3, %v8251_v47  ;;  %v8876_v31 = vor.u32 %v10128_v35, %v8875_v8  ;;  %v10124_v45 = vld [vmem:[#allocation7 + $0x6d4] sm:$0xf0]  ;;  %v11264_v43 = vpop.f32.mrf.mxu0  ;;  %v8987_v47 = vld [vmem:[#allocation7 + $0x7c8] sm:$0xf]  ;;  %v5825_v35 = vadd.f32 %v5824_v29, %v5811_v38  ;;  %v11272_v29 = vpop.f32.mrf.mxu2 }
 0x279   :  { %v10056_v6 = vld [vmem:[#allocation7 + $0x4b4] sm:$0xf0]  ;;  %v8971_v27 = vld [vmem:[#allocation7 + $0x7a8] sm:$0xf] }
 0x27a   :  { %6114 = vmatpush.bf16.msra.mxu3 %v8412_v4  ;;  %6073 = vmatpush.bf16.msra.mxu0 %v8012_v63  ;;  %v8380_v4 = vor.u32 %v10004_v39, %v8379_v10  ;;  %v10060_v63 = vld [vmem:[#allocation7 + $0x4d4] sm:$0xf0]  ;;  %v8587_v39 = vld [vmem:[#allocation7 + $0x4a8] sm:$0xf] }
 0x27b   :  { %6087 = vmatpush.bf16.msra.mxu1 %v8140_v14  ;;  %v10092_v14 = vld [vmem:[#allocation7 + $0x5d4] sm:$0xf0]  ;;  %v8604_v12 = vor.u32 %v10060_v63, %v8603_v25  ;;  %v8588_v11 = vor.u32 %v10056_v6, %v8587_v39  ;;  %v8699_v28 = vld [vmem:[#allocation7 + $0x588] sm:$0xf] }
 0x27c   :  { %6101 = vmatpush.bf16.msra.mxu2 %v8268_v1  ;;  %v8859_v1 = vld [vmem:[#allocation7 + $0x6c8] sm:$0xf]  ;;  %v8732_v3 = vor.u32 %v10092_v14, %v8731_v61  ;;  %v10120_v8 = vld [vmem:[#allocation7 + $0x6b4] sm:$0xf0]  ;;  %v5839_v61 = vadd.f32 %v5838_v24, %v5825_v35 }
 0x27d   :  { %v8860_v10 = vor.u32 %v10124_v45, %v8859_v1  ;;  %v8844_v26 = vor.u32 %v10120_v8, %v8843_v22  ;;  %v8827_v25 = vld [vmem:[#allocation7 + $0x688] sm:$0xf]  ;;  %v10116_v63 = vld [vmem:[#allocation7 + $0x694] sm:$0xf0] }
 0x27e   :  { %6115 = vmatpush.bf16.msra.mxu3 %v8396_v13  ;;  %6074 = vmatpush.bf16.msra.mxu0 %v7996_v21  ;;  %v10156_v13 = vld [vmem:[#allocation7 + $0x7d4] sm:$0xf0]  ;;  %v8955_v1 = vld [vmem:[#allocation7 + $0x788] sm:$0xf] }
 0x27f   :  { %6088 = vmatpush.bf16.msra.mxu1 %v8124_v17  ;;  %v8988_v54 = vor.u32 %v10156_v13, %v8987_v47  ;;  %v10088_v21 = vld [vmem:[#allocation7 + $0x5b4] sm:$0xf0]  ;;  %v11274_v47 = vpop.f32.mrf.mxu3  ;;  %v8683_v6 = vld [vmem:[#allocation7 + $0x568] sm:$0xf] }
 0x280   :  { %6102 = vmatpush.bf16.msra.mxu2 %v8252_v50  ;;  %v10152_v17 = vld [vmem:[#allocation7 + $0x7b4] sm:$0xf0]  ;;  %v11269_v50 = vpop.f32.mrf.mxu1  ;;  %v5852_v14 = vpop.f32.mrf.mxu0  ;;  %v8939_v22 = vld [vmem:[#allocation7 + $0x768] sm:$0xf] }
 0x281   :  { %6075 = vmatmul.bf16.vlgmr.msra.gmra.mxu0 %v11077_v33  ;;  %v10148_v45 = vld [vmem:[#allocation7 + $0x794] sm:$0xf0] }
 0x282   :  { %6116 = vmatpush.bf16.msra.mxu3 %v8380_v4  ;;  %6123 = vmatpush.bf16.msrb.mxu0 %v8620_v44  ;;  %v8571_v4 = vld [vmem:[#allocation7 + $0x488] sm:$0xf]  ;;  %v10052_v44 = vld [vmem:[#allocation7 + $0x494] sm:$0xf0] }
 0x283   :  { %6137 = vmatpush.bf16.msrb.mxu1 %v8748_v5  ;;  %6103 = vmatmul.bf16.vlgmr.msra.gmra.mxu2 %v11083_v52  ;;  %v8972_v5 = vor.u32 %v10152_v17, %v8971_v27  ;;  %v8572_v13 = vor.u32 %v10052_v44, %v8571_v4  ;;  %v10048_v39 = vld [vmem:[#allocation7 + $0x474] sm:$0xf0]  ;;  %v8667_v44 = vld [vmem:[#allocation7 + $0x548] sm:$0xf] }
 0x284   :  { %6151 = vmatpush.bf16.msrb.mxu2 %v8876_v31  ;;  %6089 = vmatmul.bf16.vlgmr.msra.gmra.mxu1 %v11079_v60  ;;  %v10084_v31 = vld [vmem:[#allocation7 + $0x594] sm:$0xf0] }
 0x285   :  { %6117 = vmatmul.bf16.vlgmr.msra.gmra.mxu3 %v11086_v19  ;;  %v8700_v38 = vor.u32 %v10084_v31, %v8699_v28  ;;  %v10112_v24 = vld [vmem:[#allocation7 + $0x674] sm:$0xf0] }
 0x286   :  { %6165 = vmatpush.bf16.msrb.mxu3 %v9004_v56  ;;  %6124 = vmatpush.bf16.msrb.mxu0 %v8604_v12  ;;  %v8716_v56 = vor.u32 %v10088_v21, %v8715_v49  ;;  %v5853_v12 = vadd.f32 %v5852_v14, %v5839_v61  ;;  %v8956_v49 = vor.u32 %v10148_v45, %v8955_v1  ;;  %v8811_v21 = vld [vmem:[#allocation7 + $0x668] sm:$0xf]  ;;  %v10144_v8 = vld [vmem:[#allocation7 + $0x774] sm:$0xf0] }
 0x287   :  { %6138 = vmatpush.bf16.msrb.mxu1 %v8732_v3  ;;  %v8828_v3 = vor.u32 %v10116_v63, %v8827_v25  ;;  %v10044_v4 = vld [vmem:[#allocation7 + $0x454] sm:$0xf0]  ;;  %v8940_v28 = vor.u32 %v10144_v8, %v8939_v22  ;;  %v8795_v25 = vld [vmem:[#allocation7 + $0x648] sm:$0xf] }
 0x288   :  { %6152 = vmatpush.bf16.msrb.mxu2 %v8860_v10  ;;  %v8555_v10 = vld [vmem:[#allocation7 + $0x468] sm:$0xf]  ;;  %v5866_v35 = vpop.f32.mrf.mxu1  ;;  %v10076_v31 = vld [vmem:[#allocation7 + $0x554] sm:$0xf0]  ;;  %v5894_v45 = vpop.f32.mrf.mxu3 }
 0x289   :  { %v8556_v27 = vor.u32 %v10048_v39, %v8555_v10  ;;  %v5867_v17 = vadd.f32 %v5866_v35, %v5853_v12  ;;  %v10108_v63 = vld [vmem:[#allocation7 + $0x654] sm:$0xf0]  ;;  %v8923_v14 = vld [vmem:[#allocation7 + $0x748] sm:$0xf] }
 0x28a   :  { %6166 = vmatpush.bf16.msrb.mxu3 %v8988_v54  ;;  %6125 = vmatpush.bf16.msrb.mxu0 %v8588_v11  ;;  %v10080_v54 = vld [vmem:[#allocation7 + $0x574] sm:$0xf0]  ;;  %v8523_v10 = vld [vmem:[#allocation7 + $0x428] sm:$0xf] }
 0x28b   :  { %6139 = vmatpush.bf16.msrb.mxu1 %v8716_v56  ;;  %v8684_v11 = vor.u32 %v10080_v54, %v8683_v6  ;;  %v8812_v56 = vor.u32 %v10112_v24, %v8811_v21  ;;  %v10140_v1 = vld [vmem:[#allocation7 + $0x754] sm:$0xf0]  ;;  %v8651_v6 = vld [vmem:[#allocation7 + $0x528] sm:$0xf] }
 0x28c   :  { %6153 = vmatpush.bf16.msrb.mxu2 %v8844_v26  ;;  %v8539_v26 = vld [vmem:[#allocation7 + $0x448] sm:$0xf]  ;;  %v10040_v39 = vld [vmem:[#allocation7 + $0x434] sm:$0xf0] }
 0x28d   :  { %v10072_v54 = vld [vmem:[#allocation7 + $0x534] sm:$0xf0]  ;;  %v8779_v21 = vld [vmem:[#allocation7 + $0x628] sm:$0xf] }
 0x28e   :  { %6167 = vmatpush.bf16.msrb.mxu3 %v8972_v5  ;;  %6126 = vmatpush.bf16.msrb.mxu0 %v8572_v13  ;;  %v5880_v5 = vpop.f32.mrf.mxu2  ;;  %v8540_v13 = vor.u32 %v10044_v4, %v8539_v26  ;;  %v10104_v24 = vld [vmem:[#allocation7 + $0x634] sm:$0xf0]  ;;  %v8907_v8 = vld [vmem:[#allocation7 + $0x728] sm:$0xf] }
 0x28f   :  { %6140 = vmatpush.bf16.msrb.mxu1 %v8700_v38  ;;  %v5881_v61 = vadd.f32 %v5880_v5, %v5867_v17  ;;  %v8668_v38 = vor.u32 %v10076_v31, %v8667_v44  ;;  %v10136_v35 = vld [vmem:[#allocation7 + $0x734] sm:$0xf0]  ;;  %v8507_v17 = vld [vmem:[#allocation7 + $0x408] sm:$0xf]  ;;  %v8780_v26 = vor.u32 %v10104_v24, %v8779_v21 }
 0x290   :  { %6154 = vmatpush.bf16.msrb.mxu2 %v8828_v3  ;;  %v8796_v3 = vor.u32 %v10108_v63, %v8795_v25  ;;  %v8635_v4 = vld [vmem:[#allocation7 + $0x508] sm:$0xf]  ;;  %v10068_v44 = vld [vmem:[#allocation7 + $0x514] sm:$0xf0]  ;;  %v8908_v5 = vor.u32 %v10136_v35, %v8907_v8 }
 0x291   :  { %v5895_v12 = vadd.f32 %v5894_v45, %v5881_v61  ;;  %v10100_v31 = vld [vmem:[#allocation7 + $0x614] sm:$0xf0]  ;;  %v8891_v25 = vld [vmem:[#allocation7 + $0x708] sm:$0xf] }
 0x292   :  { %6168 = vmatpush.bf16.msrb.mxu3 %v8956_v49  ;;  %6127 = vmatpush.bf16.msrb.mxu0 %v8556_v27  ;;  %v8924_v49 = vor.u32 %v10140_v1, %v8923_v14  ;;  %v8524_v27 = vor.u32 %v10040_v39, %v8523_v10  ;;  %v10132_v63 = vld [vmem:[#allocation7 + $0x714] sm:$0xf0]  ;;  %v9259_v14 = vld [vmem:[#allocation7 + $0x9e8] sm:$0xf] }
 0x293   :  { %6141 = vmatpush.bf16.msrb.mxu1 %v8684_v11  ;;  %v11277_v22 = vadd.f32 %v5895_v12, %v11021_v36  ;;  %v10036_v11 = vld [vmem:[#allocation7 + $0x414] sm:$0xf0]  ;;  %v9131_v36 = vld [vmem:[#allocation7 + $0x8e8] sm:$0xf] }
 0x294   :  { %6155 = vmatpush.bf16.msrb.mxu2 %v8812_v56  ;;  %v8652_v56 = vor.u32 %v10072_v54, %v8651_v6  ;;  %v10192_v61 = vld [vmem:[#allocation7 + $0x8f4] sm:$0xf0]  ;;  %v8508_v1 = vor.u32 %v10036_v11, %v8507_v17  ;;  %v9515_v10 = vld [vmem:[#allocation7 + $0xbe8] sm:$0xf]  ;;  %v8892_v6 = vor.u32 %v10132_v63, %v8891_v25 }
 0x295   :  { %v10224_v45 = vld [vmem:[#allocation7 + $0x9f4] sm:$0xf0]  ;;  %v9115_v24 = vld [vmem:[#allocation7 + $0x8c8] sm:$0xf] }
 0x296   :  { %6169 = vmatpush.bf16.msrb.mxu3 %v8940_v28  ;;  %6128 = vmatpush.bf16.msrb.mxu0 %v8540_v13  ;;  %v8763_v28 = vld [vmem:[#allocation7 + $0x608] sm:$0xf]  ;;  %v10256_v12 = vld [vmem:[#allocation7 + $0xaf4] sm:$0xf0]  ;;  %v9260_v54 = vor.u32 %v10224_v45, %v9259_v14 }
 0x297   :  { %6142 = vmatpush.bf16.msrb.mxu1 %v8668_v38  ;;  %v9387_v13 = vld [vmem:[#allocation7 + $0xae8] sm:$0xf]  ;;  %v8636_v38 = vor.u32 %v10068_v44, %v8635_v4  ;;  %v10288_v39 = vld [vmem:[#allocation7 + $0xbf4] sm:$0xf0] }
 0x298   :  { %6156 = vmatpush.bf16.msrb.mxu2 %v8796_v3  ;;  %v8764_v3 = vor.u32 %v10100_v31, %v8763_v28  ;;  %v9388_v21 = vor.u32 %v10256_v12, %v9387_v13  ;;  %v10188_v8 = vld [vmem:[#allocation7 + $0x8d4] sm:$0xf0]  ;;  %v9243_v35 = vld [vmem:[#allocation7 + $0x9c8] sm:$0xf] }
 0x299   :  { %v10220_v17 = vld [vmem:[#allocation7 + $0x9d4] sm:$0xf0]  ;;  %v9371_v11 = vld [vmem:[#allocation7 + $0xac8] sm:$0xf]  ;;  %v9116_v4 = vor.u32 %v10188_v8, %v9115_v24 }
 0x29a   :  { %6170 = vmatpush.bf16.msrb.mxu3 %v8924_v49  ;;  %6129 = vmatpush.bf16.msrb.mxu0 %v8524_v27  ;;  %v9132_v49 = vor.u32 %v10192_v61, %v9131_v36  ;;  %v9516_v27 = vor.u32 %v10288_v39, %v9515_v10  ;;  %v9244_v44 = vor.u32 %v10220_v17, %v9243_v35  ;;  %v10184_v31 = vld [vmem:[#allocation7 + $0x8b4] sm:$0xf0]  ;;  %v9227_v25 = vld [vmem:[#allocation7 + $0x9a8] sm:$0xf] }
 0x29b   :  { %6143 = vmatpush.bf16.msrb.mxu1 %v8652_v56  ;;  %v9499_v56 = vld [vmem:[#allocation7 + $0xbc8] sm:$0xf]  ;;  %v9372_v28 = vor.u32 %v10252_v46, %v9371_v11  ;;  %v10216_v36 = vld [vmem:[#allocation7 + $0x9b4] sm:$0xf0] }
 0x29c   :  { %6157 = vmatpush.bf16.msrb.mxu2 %v8780_v26  ;;  %v10284_v26 = vld [vmem:[#allocation7 + $0xbd4] sm:$0xf0]  ;;  %v9355_v61 = vld [vmem:[#allocation7 + $0xaa8] sm:$0xf]  ;;  %v9228_v13 = vor.u32 %v10216_v36, %v9227_v25 }
 0x29d   :  { %v9500_v63 = vor.u32 %v10284_v26, %v9499_v56  ;;  %v10248_v14 = vld [vmem:[#allocation7 + $0xab4] sm:$0xf0]  ;;  %v9211_v10 = vld [vmem:[#allocation7 + $0x988] sm:$0xf] }
 0x29e   :  { %6171 = vmatpush.bf16.msrb.mxu3 %v8908_v5  ;;  %6130 = vmatpush.bf16.msrb.mxu0 %v8508_v1  ;;  %v9099_v5 = vld [vmem:[#allocation7 + $0x8a8] sm:$0xf]  ;;  %v10280_v45 = vld [vmem:[#allocation7 + $0xbb4] sm:$0xf0]  ;;  %v9356_v12 = vor.u32 %v10248_v14, %v9355_v61 }
 0x29f   :  { %6144 = vmatpush.bf16.msrb.mxu1 %v8636_v38  ;;  %v9483_v1 = vld [vmem:[#allocation7 + $0xba8] sm:$0xf]  ;;  %v9100_v46 = vor.u32 %v10184_v31, %v9099_v5  ;;  %v10276_v24 = vld [vmem:[#allocation7 + $0xb94] sm:$0xf0] }
 0x2a0   :  { %6158 = vmatpush.bf16.msrb.mxu2 %v8764_v3  ;;  %v9083_v38 = vld [vmem:[#allocation7 + $0x888] sm:$0xf]  ;;  %v10180_v3 = vld [vmem:[#allocation7 + $0x894] sm:$0xf0]  ;;  %v9484_v39 = vor.u32 %v10280_v45, %v9483_v1 }
 0x2a1   :  { %6131 = vmatmul.bf16.vlgmr.msrb.gmra.mxu0 %v11102_v42  ;;  %v9084_v8 = vor.u32 %v10180_v3, %v9083_v38  ;;  %v9067_v17 = vld [vmem:[#allocation7 + $0x868] sm:$0xf]  ;;  %v10176_v11 = vld [vmem:[#allocation7 + $0x874] sm:$0xf0] }
 0x2a2   :  { %6172 = vmatpush.bf16.msrb.mxu3 %v8892_v6  ;;  %6179 = vmatpush.bf16.msra.mxu0 %v9132_v49  ;;  %v10212_v6 = vld [vmem:[#allocation7 + $0x994] sm:$0xf0]  ;;  %v9339_v49 = vld [vmem:[#allocation7 + $0xa88] sm:$0xf]  ;;  %v9068_v25 = vor.u32 %v10176_v11, %v9067_v17 }
 0x2a3   :  { %6193 = vmatpush.bf16.msra.mxu1 %v9260_v54  ;;  %6159 = vmatmul.bf16.vlgmr.msrb.gmra.mxu2 %v11110_v0  ;;  %v10244_v54 = vld [vmem:[#allocation7 + $0xa94] sm:$0xf0]  ;;  %v9212_v35 = vor.u32 %v10212_v6, %v9211_v10  ;;  %v9195_v56 = vld [vmem:[#allocation7 + $0x968] sm:$0xf]  ;;  %v10002_v0 = vld [vmem:[#allocation7 + $0x30c] sm:$0xf] }
 0x2a4   :  { %6207 = vmatpush.bf16.msra.mxu2 %v9388_v21  ;;  %6145 = vmatmul.bf16.vlgmr.msrb.gmra.mxu1 %v11106_v59  ;;  %v9467_v21 = vld [vmem:[#allocation7 + $0xb88] sm:$0xf]  ;;  %v10272_v31 = vld [vmem:[#allocation7 + $0xb74] sm:$0xf0]  ;;  %v8381_v59 = vld [vmem:[#allocation7 + $0x318] sm:$0xf0] }
 0x2a5   :  { %6173 = vmatmul.bf16.vlgmr.msrb.gmra.mxu3 %v11116_v57  ;;  %v9468_v26 = vor.u32 %v10276_v24, %v9467_v21  ;;  %v9451_v5 = vld [vmem:[#allocation7 + $0xb68] sm:$0xf]  ;;  %v10172_v14 = vld [vmem:[#allocation7 + $0x854] sm:$0xf0] }
 0x2a6   :  { %6221 = vmatpush.bf16.msra.mxu3 %v9516_v27  ;;  %6180 = vmatpush.bf16.msra.mxu0 %v9116_v4  ;;  %v9340_v27 = vor.u32 %v10244_v54, %v9339_v49  ;;  %v10208_v4 = vld [vmem:[#allocation7 + $0x974] sm:$0xf0]  ;;  %v9051_v61 = vld [vmem:[#allocation7 + $0x848] sm:$0xf]  ;;  %v9452_v45 = vor.u32 %v10272_v31, %v9451_v5 }
 0x2a7   :  { %6194 = vmatpush.bf16.msra.mxu1 %v9244_v44  ;;  %v9323_v44 = vld [vmem:[#allocation7 + $0xa68] sm:$0xf]  ;;  %v10268_v3 = vld [vmem:[#allocation7 + $0xb54] sm:$0xf0]  ;;  %v9052_v10 = vor.u32 %v10172_v14, %v9051_v61 }
 0x2a8   :  { %6208 = vmatpush.bf16.msra.mxu2 %v9372_v28  ;;  %v10240_v28 = vld [vmem:[#allocation7 + $0xa74] sm:$0xf0]  ;;  %v9179_v1 = vld [vmem:[#allocation7 + $0x948] sm:$0xf] }
 0x2a9   :  { %v9324_v36 = vor.u32 %v10240_v28, %v9323_v44  ;;  %v9435_v38 = vld [vmem:[#allocation7 + $0xb48] sm:$0xf]  ;;  %v10168_v54 = vld [vmem:[#allocation7 + $0x834] sm:$0xf0] }
 0x2aa   :  { %6222 = vmatpush.bf16.msra.mxu3 %v9500_v63  ;;  %6181 = vmatpush.bf16.msra.mxu0 %v9100_v46  ;;  %v9196_v63 = vor.u32 %v10208_v4, %v9195_v56  ;;  %v10204_v46 = vld [vmem:[#allocation7 + $0x954] sm:$0xf0]  ;;  %v9035_v49 = vld [vmem:[#allocation7 + $0x828] sm:$0xf]  ;;  %v9436_v24 = vor.u32 %v10268_v3, %v9435_v38  ;;  %v8237_v38 = vld [vmem:[#allocation7 + $0x1f8] sm:$0xf0] }
 0x2ab   :  { %6195 = vmatpush.bf16.msra.mxu1 %v9228_v13  ;;  %v9307_v13 = vld [vmem:[#allocation7 + $0xa48] sm:$0xf]  ;;  %v10264_v11 = vld [vmem:[#allocation7 + $0xb34] sm:$0xf0]  ;;  %v9036_v56 = vor.u32 %v10168_v54, %v9035_v49  ;;  %v9998_v3 = vld [vmem:[#allocation7 + $0x2ec] sm:$0xf] }
 0x2ac   :  { %6209 = vmatpush.bf16.msra.mxu2 %v9356_v12  ;;  %v10236_v12 = vld [vmem:[#allocation7 + $0xa54] sm:$0xf0]  ;;  %v9163_v21 = vld [vmem:[#allocation7 + $0x928] sm:$0xf]  ;;  %v10030_v49 = vld [vmem:[#allocation7 + $0x3ec] sm:$0xf] }
 0x2ad   :  { %v9308_v6 = vor.u32 %v10236_v12, %v9307_v13  ;;  %v9419_v17 = vld [vmem:[#allocation7 + $0xb28] sm:$0xf]  ;;  %v10164_v4 = vld [vmem:[#allocation7 + $0x814] sm:$0xf0]  ;;  %v9966_v13 = vld [vmem:[#allocation7 + $0x1ec] sm:$0xf] }
 0x2ae   :  { %6223 = vmatpush.bf16.msra.mxu3 %v9484_v39  ;;  %6182 = vmatpush.bf16.msra.mxu0 %v9084_v8  ;;  %v9180_v39 = vor.u32 %v10204_v46, %v9179_v1  ;;  %v10200_v8 = vld [vmem:[#allocation7 + $0x934] sm:$0xf0]  ;;  %v9147_v5 = vld [vmem:[#allocation7 + $0x908] sm:$0xf]  ;;  %v11283_v1 = vpop.f32.mrf.mxu0  ;;  %v8109_v46 = vld [vmem:[#allocation7 + $0xf8] sm:$0xf0] }
 0x2af   :  { %6196 = vmatpush.bf16.msra.mxu1 %v9212_v35  ;;  %v9291_v35 = vld [vmem:[#allocation7 + $0xa28] sm:$0xf]  ;;  %v9164_v44 = vor.u32 %v10200_v8, %v9163_v21  ;;  %v10196_v31 = vld [vmem:[#allocation7 + $0x914] sm:$0xf0]  ;;  %v8493_v54 = vld [vmem:[#allocation7 + $0x3f8] sm:$0xf0]  ;;  %v11285_v21 = vpop.f32.mrf.mxu1 }
 0x2b0   :  { %6210 = vmatpush.bf16.msra.mxu2 %v9340_v27  ;;  %v10232_v27 = vld [vmem:[#allocation7 + $0xa34] sm:$0xf0]  ;;  %v9403_v61 = vld [vmem:[#allocation7 + $0xb08] sm:$0xf] }
 0x2b1   :  { %v9292_v28 = vor.u32 %v10232_v27, %v9291_v35  ;;  %v10260_v14 = vld [vmem:[#allocation7 + $0xb14] sm:$0xf0]  ;;  %v8240_v35 = vor.u32 %v9966_v13, %v8237_v38  ;;  %v9958_v13 = vld [vmem:[#allocation7 + $0x1ac] sm:$0xf]  ;;  %v8205_v38 = vld [vmem:[#allocation7 + $0x1b8] sm:$0xf0] }
 0x2b2   :  { %6224 = vmatpush.bf16.msra.mxu3 %v9468_v26  ;;  %6183 = vmatpush.bf16.msra.mxu0 %v9068_v25  ;;  %v9019_v26 = vld [vmem:[#allocation7 + $0x808] sm:$0xf] }
 0x2b3   :  { %6197 = vmatpush.bf16.msra.mxu1 %v9196_v63  ;;  %v9275_v25 = vld [vmem:[#allocation7 + $0xa08] sm:$0xf]  ;;  %v9420_v63 = vor.u32 %v10264_v11, %v9419_v17  ;;  %v9020_v12 = vor.u32 %v10164_v4, %v9019_v26  ;;  %v9930_v17 = vld [vmem:[#allocation7 + $0xcc] sm:$0xf]  ;;  %v8093_v11 = vld [vmem:[#allocation7 + $0xd8] sm:$0xf0]  ;;  %v8496_v26 = vor.u32 %v10030_v49, %v8493_v54  ;;  %v8208_v54 = vor.u32 %v9958_v13, %v8205_v38 }
 0x2b4   :  { %6211 = vmatpush.bf16.msra.mxu2 %v9324_v36  ;;  %v10228_v36 = vld [vmem:[#allocation7 + $0xa14] sm:$0xf0]  ;;  %v8221_v4 = vld [vmem:[#allocation7 + $0x1d8] sm:$0xf0]  ;;  %v9950_v13 = vld [vmem:[#allocation7 + $0x16c] sm:$0xf] }
 0x2b5   :  { %v8173_v38 = vld [vmem:[#allocation7 + $0x178] sm:$0xf0] }
 0x2b6   :  { %6225 = vmatpush.bf16.msra.mxu3 %v9452_v45  ;;  %6184 = vmatpush.bf16.msra.mxu0 %v9052_v10  ;;  %v9934_v45 = vld [vmem:[#allocation7 + $0xec] sm:$0xf]  ;;  %v8365_v10 = vld [vmem:[#allocation7 + $0x2f8] sm:$0xf0] }
 0x2b7   :  { %6198 = vmatpush.bf16.msra.mxu1 %v9180_v39  ;;  %v9148_v39 = vor.u32 %v10196_v31, %v9147_v5  ;;  %v8112_v8 = vor.u32 %v9934_v45, %v8109_v46  ;;  %v8368_v27 = vor.u32 %v9998_v3, %v8365_v10  ;;  %v8477_v5 = vld [vmem:[#allocation7 + $0x3d8] sm:$0xf0]  ;;  %v11287_v31 = vpop.f32.mrf.mxu2  ;;  %v9926_v45 = vld [vmem:[#allocation7 + $0xac] sm:$0xf]  ;;  %v11296_v49 = vpop.f32.mrf.mxu1 }
 0x2b8   :  { %6212 = vmatpush.bf16.msra.mxu2 %v9308_v6  ;;  %v9276_v6 = vor.u32 %v10228_v36, %v9275_v25  ;;  %v8096_v25 = vor.u32 %v9930_v17, %v8093_v11  ;;  %v11291_v36 = vpop.f32.mrf.mxu0  ;;  %v8077_v46 = vld [vmem:[#allocation7 + $0xb8] sm:$0xf0]  ;;  %v9990_v3 = vld [vmem:[#allocation7 + $0x2ac] sm:$0xf] }
 0x2b9   :  { %v8333_v10 = vld [vmem:[#allocation7 + $0x2b8] sm:$0xf0] }
 0x2ba   :  { %6226 = vmatpush.bf16.msra.mxu3 %v9436_v24  ;;  %6185 = vmatpush.bf16.msra.mxu0 %v9036_v56  ;;  %v9404_v24 = vor.u32 %v10260_v14, %v9403_v61  ;;  %v9962_v56 = vld [vmem:[#allocation7 + $0x1cc] sm:$0xf]  ;;  %v8189_v11 = vld [vmem:[#allocation7 + $0x198] sm:$0xf0] }
 0x2bb   :  { %6199 = vmatpush.bf16.msra.mxu1 %v9164_v44  ;;  %v8349_v44 = vld [vmem:[#allocation7 + $0x2d8] sm:$0xf0]  ;;  %v8224_v61 = vor.u32 %v9962_v56, %v8221_v4  ;;  %v9986_v56 = vld [vmem:[#allocation7 + $0x28c] sm:$0xf] }
 0x2bc   :  { %6213 = vmatpush.bf16.msra.mxu2 %v9292_v28  ;;  %v10026_v28 = vld [vmem:[#allocation7 + $0x3cc] sm:$0xf]  ;;  %v8352_v14 = vor.u32 %v9994_v7, %v8349_v44  ;;  %v8080_v7 = vor.u32 %v9926_v45, %v8077_v46  ;;  %v8445_v44 = vld [vmem:[#allocation7 + $0x398] sm:$0xf0] }
 0x2bd   :  { %v10018_v4 = vld [vmem:[#allocation7 + $0x38c] sm:$0xf]  ;;  %v8045_v46 = vld [vmem:[#allocation7 + $0x78] sm:$0xf0] }
 0x2be   :  { %6227 = vmatpush.bf16.msra.mxu3 %v9420_v63  ;;  %6186 = vmatpush.bf16.msra.mxu0 %v9020_v12  ;;  %v11289_v63 = vpop.f32.mrf.mxu3  ;;  %v8480_v12 = vor.u32 %v10026_v28, %v8477_v5  ;;  %v9918_v45 = vld [vmem:[#allocation7 + $0x6c] sm:$0xf] }
 0x2bf   :  { %6200 = vmatpush.bf16.msra.mxu1 %v9148_v39  ;;  %11480 = vst [vmem:[#allocation45_spill] sm:$0xff] %v11289_v63  ;;  %v10022_v39 = vld [vmem:[#allocation7 + $0x3ac] sm:$0xf]  ;;  %v11299_v28 = vpop.f32.mrf.mxu2  ;;  %v8605_v63 = vld [vmem:[#allocation7 + $0x4d8] sm:$0xf0] }
 0x2c0   :  { %6214 = vmatpush.bf16.msra.mxu2 %v9276_v6  ;;  %v8461_v6 = vld [vmem:[#allocation7 + $0x3b8] sm:$0xf0] }
 0x2c1   :  { %6187 = vmatmul.bf16.vlgmr.msra.gmra.mxu0 %v11199_v40  ;;  %v8464_v17 = vor.u32 %v10022_v39, %v8461_v6  ;;  %v11303_v39 = vld [vmem:[#allocation11] sm:$0xf]  ;;  %v10010_v40 = vld [vmem:[#allocation7 + $0x34c] sm:$0xf] }
 0x2c2   :  { %6228 = vmatpush.bf16.msra.mxu3 %v9404_v24  ;;  %6235 = vmatpush.bf16.msrb.mxu0 %v8112_v8  ;;  %v8336_v24 = vor.u32 %v9990_v3, %v8333_v10  ;;  %v9922_v8 = vld [vmem:[#allocation7 + $0x8c] sm:$0xf]  ;;  %v8301_v10 = vld [vmem:[#allocation7 + $0x278] sm:$0xf0]  ;;  %11481 = vst [vmem:[#allocation46_spill] sm:$0xff] %v11303_v39  ;;  %v3780_v6 = vperm.slane %v11303_v39, 1 }
 0x2c3   :  { %6249 = vmatpush.bf16.msrb.mxu1 %v8240_v35  ;;  %6215 = vmatmul.bf16.vlgmr.msra.gmra.mxu2 %v11205_v53  ;;  %v8061_v35 = vld [vmem:[#allocation7 + $0x98] sm:$0xf0]  ;;  %v9982_v3 = vld [vmem:[#allocation7 + $0x26c] sm:$0xf] }
 0x2c4   :  { %6263 = vmatpush.bf16.msrb.mxu2 %v8368_v27  ;;  %6201 = vmatmul.bf16.vlgmr.msra.gmra.mxu1 %v11201_v9  ;;  %v9954_v27 = vld [vmem:[#allocation7 + $0x18c] sm:$0xf]  ;;  %v8064_v5 = vor.u32 %v9922_v8, %v8061_v35  ;;  %v8429_v35 = vld [vmem:[#allocation7 + $0x378] sm:$0xf0]  ;;  %v5909_v9 = vadd.f32 %v11291_v36, %v3780_v6 }
 0x2c5   :  { %6229 = vmatmul.bf16.vlgmr.msra.gmra.mxu3 %v11208_v16  ;;  %v10014_v8 = vld [vmem:[#allocation7 + $0x36c] sm:$0xf]  ;;  %v8285_v53 = vld [vmem:[#allocation7 + $0x258] sm:$0xf0] }
 0x2c6   :  { %6277 = vmatpush.bf16.msrb.mxu3 %v8496_v26  ;;  %6236 = vmatpush.bf16.msrb.mxu0 %v8096_v25  ;;  %v8317_v26 = vld [vmem:[#allocation7 + $0x298] sm:$0xf0]  ;;  %v11301_v25 = vpop.f32.mrf.mxu3  ;;  %v9978_v16 = vld [vmem:[#allocation7 + $0x24c] sm:$0xf]  ;;  %v5923_v36 = vadd.f32 %v11296_v49, %v5909_v9 }
 0x2c7   :  { %6250 = vmatpush.bf16.msrb.mxu1 %v8224_v61  ;;  %v8192_v61 = vor.u32 %v9954_v27, %v8189_v11  ;;  %v8304_v27 = vor.u32 %v9982_v3, %v8301_v10  ;;  %v9914_v11 = vld [vmem:[#allocation7 + $0x4c] sm:$0xf]  ;;  %v8413_v39 = vld [vmem:[#allocation7 + $0x358] sm:$0xf0] }
 0x2c8   :  { %6264 = vmatpush.bf16.msrb.mxu2 %v8352_v14  ;;  %v8320_v14 = vor.u32 %v9986_v56, %v8317_v26  ;;  %v8029_v56 = vld [vmem:[#allocation7 + $0x58] sm:$0xf0]  ;;  %v11306_v26 = vpop.f32.mrf.mxu1  ;;  %v9974_v10 = vld [vmem:[#allocation7 + $0x22c] sm:$0xf] }
 0x2c9   :  { %v8141_v3 = vld [vmem:[#allocation7 + $0x138] sm:$0xf0] }
 0x2ca   :  { %6278 = vmatpush.bf16.msrb.mxu3 %v8480_v12  ;;  %6237 = vmatpush.bf16.msrb.mxu0 %v8080_v7  ;;  %v8448_v12 = vor.u32 %v10018_v4, %v8445_v44  ;;  %v5910_v7 = vpop.f32.mrf.mxu0  ;;  %v8432_v4 = vor.u32 %v10014_v8, %v8429_v35  ;;  %v8157_v44 = vld [vmem:[#allocation7 + $0x158] sm:$0xf0] }
 0x2cb   :  { %6251 = vmatpush.bf16.msrb.mxu1 %v8208_v54  ;;  %v8048_v54 = vor.u32 %v9918_v45, %v8045_v46  ;;  %v9910_v45 = vld [vmem:[#allocation7 + $0x2c] sm:$0xf]  ;;  %v8013_v46 = vld [vmem:[#allocation7 + $0x38] sm:$0xf0]  ;;  %v5911_v42 = vadd.f32 %v5910_v7, %v3780_v6 }
 0x2cc   :  { %6265 = vmatpush.bf16.msrb.mxu2 %v8336_v24  ;;  %v8176_v24 = vor.u32 %v9950_v13, %v8173_v38  ;;  %v9942_v13 = vld [vmem:[#allocation7 + $0x12c] sm:$0xf]  ;;  %v11309_v38 = vpop.f32.mrf.mxu2  ;;  %v8269_v8 = vld [vmem:[#allocation7 + $0x238] sm:$0xf0] }
 0x2cd   :  { %v8253_v49 = vld [vmem:[#allocation7 + $0x218] sm:$0xf0]  ;;  %v5925_v7 = vadd.f32 %v11306_v26, %v5911_v42  ;;  %v10154_v42 = vld [vmem:[#allocation7 + $0x7cc] sm:$0xf] }
 0x2ce   :  { %6279 = vmatpush.bf16.msrb.mxu3 %v8464_v17  ;;  %6238 = vmatpush.bf16.msrb.mxu0 %v8064_v5  ;;  %v9946_v17 = vld [vmem:[#allocation7 + $0x14c] sm:$0xf]  ;;  %v8032_v5 = vor.u32 %v9914_v11, %v8029_v56  ;;  %v11312_v35 = vpop.f32.mrf.mxu3  ;;  %v5937_v56 = vadd.f32 %v11299_v28, %v5923_v36  ;;  %v8749_v28 = vld [vmem:[#allocation7 + $0x5f8] sm:$0xf0] }
 0x2cf   :  { %6252 = vmatpush.bf16.msrb.mxu1 %v8192_v61  ;;  %v8160_v61 = vor.u32 %v9946_v17, %v8157_v44  ;;  %v10006_v11 = vld [vmem:[#allocation7 + $0x32c] sm:$0xf]  ;;  %v8144_v17 = vor.u32 %v9942_v13, %v8141_v3  ;;  %v8989_v26 = vld [vmem:[#allocation7 + $0x7d8] sm:$0xf0] }
 0x2d0   :  { %6266 = vmatpush.bf16.msrb.mxu2 %v8320_v14  ;;  %v8288_v14 = vor.u32 %v9978_v16, %v8285_v53  ;;  %v9906_v53 = vld [vmem:[#allocation7 + $0xc] sm:$0xf]  ;;  %v7997_v16 = vld [vmem:[#allocation7 + $0x18] sm:$0xf0]  ;;  %v5978_v57 = vpop.f32.mrf.mxu1  ;;  %v5951_v13 = vadd.f32 %v11301_v25, %v5937_v56  ;;  %v5799_v56 = vadd.f32 %v11264_v43, %v11257_v37 }
 0x2d1   :  { %v9970_v44 = vld [vmem:[#allocation7 + $0x20c] sm:$0xf]  ;;  %v8000_v51 = vor.u32 %v9906_v53, %v7997_v16  ;;  %v8589_v43 = vld [vmem:[#allocation7 + $0x4b8] sm:$0xf0] }
 0x2d2   :  { %6280 = vmatpush.bf16.msrb.mxu3 %v8448_v12  ;;  %6239 = vmatpush.bf16.msrb.mxu0 %v8048_v54  ;;  %v8416_v12 = vor.u32 %v10010_v40, %v8413_v39  ;;  %v5964_v54 = vpop.f32.mrf.mxu0  ;;  %v8272_v40 = vor.u32 %v9974_v10, %v8269_v8  ;;  %v9938_v39 = vld [vmem:[#allocation7 + $0x10c] sm:$0xf]  ;;  %v8256_v10 = vor.u32 %v9970_v44, %v8253_v49  ;;  %v9005_v8 = vld [vmem:[#allocation7 + $0x7f8] sm:$0xf0] }
 0x2d3   :  { %6253 = vmatpush.bf16.msrb.mxu1 %v8176_v24  ;;  %v8397_v24 = vld [vmem:[#allocation7 + $0x338] sm:$0xf0]  ;;  %v10090_v25 = vld [vmem:[#allocation7 + $0x5cc] sm:$0xf] }
 0x2d4   :  { %6267 = vmatpush.bf16.msrb.mxu2 %v8304_v27  ;;  %v8016_v27 = vor.u32 %v9910_v45, %v8013_v46  ;;  %v8400_v9 = vor.u32 %v10006_v11, %v8397_v24  ;;  %v8621_v45 = vld [vmem:[#allocation7 + $0x4f8] sm:$0xf0]  ;;  %v10094_v46 = vld [vmem:[#allocation7 + $0x5ec] sm:$0xf]  ;;  %v5992_v36 = vpop.f32.mrf.mxu2  ;;  %v8384_v11 = vor.u32 %v10002_v0, %v8381_v59  ;;  %v5965_v24 = vadd.f32 %v5964_v54, %v5951_v13 }
 0x2d5   :  { %v8752_v53 = vor.u32 %v10094_v46, %v8749_v28  ;;  %v5939_v59 = vadd.f32 %v11309_v38, %v5925_v7  ;;  %v8608_v54 = vor.u32 %v10058_v30, %v8605_v63  ;;  %v10086_v49 = vld [vmem:[#allocation7 + $0x5ac] sm:$0xf]  ;;  %v8992_v28 = vor.u32 %v10154_v42, %v8989_v26  ;;  %v8717_v30 = vld [vmem:[#allocation7 + $0x5b8] sm:$0xf0] }
 0x2d6   :  { %6281 = vmatpush.bf16.msrb.mxu3 %v8432_v4  ;;  %6240 = vmatpush.bf16.msrb.mxu0 %v8032_v5  ;;  %v8125_v4 = vld [vmem:[#allocation7 + $0x118] sm:$0xf0]  ;;  %v10062_v5 = vld [vmem:[#allocation7 + $0x4ec] sm:$0xf]  ;;  %v5979_v44 = vadd.f32 %v5978_v57, %v5965_v24 }
 0x2d7   :  { %6254 = vmatpush.bf16.msrb.mxu1 %v8160_v61  ;;  %v10126_v61 = vld [vmem:[#allocation7 + $0x6ec] sm:$0xf]  ;;  %v8128_v3 = vor.u32 %v9938_v39, %v8125_v4  ;;  %v8624_v6 = vor.u32 %v10062_v5, %v8621_v45  ;;  %v8861_v4 = vld [vmem:[#allocation7 + $0x6d8] sm:$0xf0]  ;;  %v11482_v5 = vperm.slane %v10886_v41, 0  ;;  %v5813_v45 = vadd.f32 %v11269_v50, %v5799_v56 }
 0x2d8   :  { %6268 = vmatpush.bf16.msrb.mxu2 %v8288_v14  ;;  %v8877_v14 = vld [vmem:[#allocation7 + $0x6f8] sm:$0xf0]  ;;  %v10122_v39 = vld [vmem:[#allocation7 + $0x6cc] sm:$0xf]  ;;  %v5980_v46 = vpop.f32.mrf.mxu1 }
 0x2d9   :  { %v8880_v16 = vor.u32 %v10126_v61, %v8877_v14  ;;  %v8864_v37 = vor.u32 %v10122_v39, %v8861_v4  ;;  %v2909_v38 = vadd.f32 %v10953_v18, %v11482_v5  ;;  %v10118_v57 = vld [vmem:[#allocation7 + $0x6ac] sm:$0xf]  ;;  %v8845_v63 = vld [vmem:[#allocation7 + $0x6b8] sm:$0xf0]  ;;  %v5953_v61 = vadd.f32 %v11312_v35, %v5939_v59 }
 0x2da   :  { %6282 = vmatpush.bf16.msrb.mxu3 %v8416_v12  ;;  %6241 = vmatpush.bf16.msrb.mxu0 %v8016_v27  ;;  %v10158_v12 = vld [vmem:[#allocation7 + $0x7ec] sm:$0xf]  ;;  %v11317_v27 = vpop.f32.mrf.mxu3  ;;  %v5966_v0 = vpop.f32.mrf.mxu0  ;;  %v5993_v14 = vadd.f32 %v5992_v36, %v5979_v44  ;;  %v5827_v18 = vadd.f32 %v11272_v29, %v5813_v45  ;;  %v8573_v35 = vld [vmem:[#allocation7 + $0x498] sm:$0xf0] }
 0x2db   :  { %6255 = vmatpush.bf16.msrb.mxu1 %v8144_v17  ;;  %v9008_v17 = vor.u32 %v10158_v12, %v9005_v8  ;;  %v10150_v13 = vld [vmem:[#allocation7 + $0x7ac] sm:$0xf]  ;;  %v8720_v12 = vor.u32 %v10086_v49, %v8717_v30  ;;  %v8848_v8 = vor.u32 %v10118_v57, %v8845_v63  ;;  %v8829_v24 = vld [vmem:[#allocation7 + $0x698] sm:$0xf0] }
 0x2dc   :  { %6269 = vmatpush.bf16.msrb.mxu2 %v8272_v40  ;;  %v8733_v40 = vld [vmem:[#allocation7 + $0x5d8] sm:$0xf0]  ;;  %v10082_v36 = vld [vmem:[#allocation7 + $0x58c] sm:$0xf]  ;;  %v5994_v29 = vpop.f32.mrf.mxu2 }
 0x2dd   :  { %v10114_v7 = vld [vmem:[#allocation7 + $0x68c] sm:$0xf]  ;;  %v8941_v5 = vld [vmem:[#allocation7 + $0x778] sm:$0xf0] }
 0x2de   :  { %6283 = vmatpush.bf16.msrb.mxu3 %v8400_v9  ;;  %6242 = vmatpush.bf16.msrb.mxu0 %v8000_v51  ;;  %v8736_v9 = vor.u32 %v10090_v25, %v8733_v40  ;;  %v10054_v51 = vld [vmem:[#allocation7 + $0x4ac] sm:$0xf]  ;;  %v5841_v40 = vadd.f32 %v11274_v47, %v5827_v18  ;;  %v8797_v18 = vld [vmem:[#allocation7 + $0x658] sm:$0xf0] }
 0x2df   :  { %6256 = vmatpush.bf16.msrb.mxu1 %v8128_v3  ;;  %v8973_v3 = vld [vmem:[#allocation7 + $0x7b8] sm:$0xf0]  ;;  %v8592_v50 = vor.u32 %v10054_v51, %v8589_v43  ;;  %v10146_v56 = vld [vmem:[#allocation7 + $0x78c] sm:$0xf] }
 0x2e0   :  { %6270 = vmatpush.bf16.msrb.mxu2 %v8256_v10  ;;  %v5967_v10 = vadd.f32 %v5966_v0, %v5953_v61  ;;  %v10046_v59 = vld [vmem:[#allocation7 + $0x46c] sm:$0xf]  ;;  %v8557_v0 = vld [vmem:[#allocation7 + $0x478] sm:$0xf0] }
 0x2e1   :  { %6243 = vmatmul.bf16.vlgmr.msrb.gmra.mxu0 %v11077_v33  ;;  %v10050_v33 = vld [vmem:[#allocation7 + $0x48c] sm:$0xf]  ;;  %v6034_v44 = vpop.f32.mrf.mxu1  ;;  %v8813_v51 = vld [vmem:[#allocation7 + $0x678] sm:$0xf0] }
 0x2e2   :  { %6284 = vmatpush.bf16.msrb.mxu3 %v8384_v11  ;;  %6291 = vmatpush.bf16.msra.mxu0 %v8624_v6  ;;  %v8701_v11 = vld [vmem:[#allocation7 + $0x598] sm:$0xf0]  ;;  %v6020_v25 = vpop.f32.mrf.mxu0  ;;  %v8576_v39 = vor.u32 %v10050_v33, %v8573_v35  ;;  %v5981_v4 = vadd.f32 %v5980_v46, %v5967_v10  ;;  %v10078_v42 = vld [vmem:[#allocation7 + $0x56c] sm:$0xf] }
 0x2e3   :  { %6305 = vmatpush.bf16.msra.mxu1 %v8752_v53  ;;  %6271 = vmatmul.bf16.vlgmr.msrb.gmra.mxu2 %v11083_v52  ;;  %v11483_v52 = vperm.slane %v10886_v41, 1  ;;  %v6007_v53 = vadd.f32 %v11317_v27, %v5993_v14  ;;  %v10142_v49 = vld [vmem:[#allocation7 + $0x76c] sm:$0xf]  ;;  %v8925_v35 = vld [vmem:[#allocation7 + $0x758] sm:$0xf0] }
 0x2e4   :  { %6319 = vmatpush.bf16.msra.mxu2 %v8880_v16  ;;  %6257 = vmatmul.bf16.vlgmr.msrb.gmra.mxu1 %v11079_v60  ;;  %v2923_v60 = vadd.f32 %v10969_v2, %v2909_v38  ;;  %v6008_v16 = vpop.f32.mrf.mxu3  ;;  %v8704_v2 = vor.u32 %v10082_v36, %v8701_v11  ;;  %v5995_v43 = vadd.f32 %v5994_v29, %v5981_v4  ;;  %v10042_v45 = vld [vmem:[#allocation7 + $0x44c] sm:$0xf] }
 0x2e5   :  { %6285 = vmatmul.bf16.vlgmr.msrb.gmra.mxu3 %v11086_v19  ;;  %v2993_v6 = vadd.f32 %v11091_v58, %v11483_v52  ;;  %v8976_v19 = vor.u32 %v10150_v13, %v8973_v3  ;;  %v6021_v41 = vadd.f32 %v6020_v25, %v6007_v53  ;;  %v8832_v58 = vor.u32 %v10114_v7, %v8829_v24  ;;  %v10074_v30 = vld [vmem:[#allocation7 + $0x54c] sm:$0xf]  ;;  %v8653_v53 = vld [vmem:[#allocation7 + $0x538] sm:$0xf0] }
 0x2e6   :  { %6333 = vmatpush.bf16.msra.mxu3 %v9008_v17  ;;  %6292 = vmatpush.bf16.msra.mxu0 %v8608_v54  ;;  %v8957_v17 = vld [vmem:[#allocation7 + $0x798] sm:$0xf0]  ;;  %v2937_v26 = vadd.f32 %v11002_v23, %v2923_v60  ;;  %v5855_v54 = vadd.f32 %v11283_v1, %v5841_v40  ;;  %v8560_v38 = vor.u32 %v10046_v59, %v8557_v0  ;;  %v6048_v13 = vpop.f32.mrf.mxu2  ;;  %v10106_v3 = vld [vmem:[#allocation7 + $0x64c] sm:$0xf]  ;;  %v6411_v25 = vmax.f32 %v11277_v22, 0.0 }
 0x2e7   :  { %6306 = vmatpush.bf16.msra.mxu1 %v8736_v9  ;;  %v3007_v27 = vadd.f32 %v11093_v34, %v2993_v6  ;;  %v8960_v47 = vor.u32 %v10146_v56, %v8957_v17  ;;  %v8685_v9 = vld [vmem:[#allocation7 + $0x578] sm:$0xf0]  ;;  %v6035_v46 = vadd.f32 %v6034_v44, %v6021_v41  ;;  %v8944_v14 = vor.u32 %v10142_v49, %v8941_v5  ;;  %v10038_v52 = vld [vmem:[#allocation7 + $0x42c] sm:$0xf] }
 0x2e8   :  { %6320 = vmatpush.bf16.msra.mxu2 %v8864_v37  ;;  %v10110_v37 = vld [vmem:[#allocation7 + $0x66c] sm:$0xf]  ;;  %v8688_v23 = vor.u32 %v10078_v42, %v8685_v9  ;;  %v8541_v34 = vld [vmem:[#allocation7 + $0x458] sm:$0xf0]  ;;  %v2951_v57 = vadd.f32 %v11017_v20, %v2937_v26  ;;  %v5869_v61 = vadd.f32 %v11285_v21, %v5855_v54  ;;  %v8800_v60 = vor.u32 %v10106_v3, %v8797_v18 }
 0x2e9   :  { %v8669_v1 = vld [vmem:[#allocation7 + $0x558] sm:$0xf0]  ;;  %v3021_v63 = vadd.f32 %v11098_v48, %v3007_v27  ;;  %v6049_v33 = vadd.f32 %v6048_v13, %v6035_v46  ;;  %v8544_v11 = vor.u32 %v10042_v45, %v8541_v34  ;;  %v10070_v29 = vld [vmem:[#allocation7 + $0x52c] sm:$0xf]  ;;  %v6036_v41 = vpop.f32.mrf.mxu1 }
 0x2ea   :  { %6334 = vmatpush.bf16.msra.mxu3 %v8992_v28  ;;  %6293 = vmatpush.bf16.msra.mxu0 %v8592_v50  ;;  %v8816_v28 = vor.u32 %v10110_v37, %v8813_v51  ;;  %v6009_v50 = vadd.f32 %v6008_v16, %v5995_v43  ;;  %v5883_v36 = vadd.f32 %v11287_v31, %v5869_v61  ;;  %v8525_v6 = vld [vmem:[#allocation7 + $0x438] sm:$0xf0]  ;;  %v10102_v16 = vld [vmem:[#allocation7 + $0x62c] sm:$0xf] }
 0x2eb   :  { %6307 = vmatpush.bf16.msra.mxu1 %v8720_v12  ;;  %v6022_v12 = vpop.f32.mrf.mxu0  ;;  %v8672_v20 = vor.u32 %v10074_v30, %v8669_v1  ;;  %v3035_v7 = vadd.f32 %v11112_v55, %v3021_v63  ;;  %v8781_v31 = vld [vmem:[#allocation7 + $0x638] sm:$0xf0]  ;;  %v10134_v17 = vld [vmem:[#allocation7 + $0x72c] sm:$0xf]  ;;  %v8656_v26 = vor.u32 %v10070_v29, %v8653_v53 }
 0x2ec   :  { %6321 = vmatpush.bf16.msra.mxu2 %v8848_v8  ;;  %v6062_v10 = vpop.f32.mrf.mxu3  ;;  %v10138_v8 = vld [vmem:[#allocation7 + $0x74c] sm:$0xf]  ;;  %v6023_v21 = vadd.f32 %v6022_v12, %v6009_v50  ;;  %v8909_v40 = vld [vmem:[#allocation7 + $0x738] sm:$0xf0]  ;;  %v8784_v22 = vor.u32 %v10102_v16, %v8781_v31 }
 0x2ed   :  { %v6063_v48 = vadd.f32 %v6062_v10, %v6049_v33  ;;  %v8928_v24 = vor.u32 %v10138_v8, %v8925_v35  ;;  %v8509_v55 = vld [vmem:[#allocation7 + $0x418] sm:$0xf0]  ;;  %v10066_v59 = vld [vmem:[#allocation7 + $0x50c] sm:$0xf] }
 0x2ee   :  { %6335 = vmatpush.bf16.msra.mxu3 %v8976_v19  ;;  %6294 = vmatpush.bf16.msra.mxu0 %v8576_v39  ;;  %v2965_v19 = vadd.f32 %v11075_v62, %v2951_v57  ;;  %v3049_v39 = vadd.f32 %v11127_v15, %v3035_v7  ;;  %v8528_v62 = vor.u32 %v10038_v52, %v8525_v6  ;;  %v8637_v27 = vld [vmem:[#allocation7 + $0x518] sm:$0xf0]  ;;  %v11485_v54 = vld [vmem:[#allocation20_spill] sm:$0xff] }
 0x2ef   :  { %6308 = vmatpush.bf16.msra.mxu1 %v8704_v2  ;;  %v6404_v56 = vadd.f32 %v6063_v48, %v11096_v32  ;;  %v11484_v2 = vld [vmem:[#allocation45_spill] sm:$0xff]  ;;  %v6037_v42 = vadd.f32 %v6036_v41, %v6023_v21  ;;  %v10098_v32 = vld [vmem:[#allocation7 + $0x60c] sm:$0xf]  ;;  %v8912_v15 = vor.u32 %v10134_v17, %v8909_v40  ;;  %v8765_v9 = vld [vmem:[#allocation7 + $0x618] sm:$0xf0] }
 0x2f0   :  { %6322 = vmatpush.bf16.msra.mxu2 %v8832_v58  ;;  %v5897_v4 = vadd.f32 %v11484_v2, %v5883_v36  ;;  %v10034_v58 = vld [vmem:[#allocation7 + $0x40c] sm:$0xf]  ;;  %v2979_v44 = vadd.f32 %v11485_v54, %v2965_v19  ;;  %v8893_v51 = vld [vmem:[#allocation7 + $0x718] sm:$0xf0]  ;;  %v8768_v13 = vor.u32 %v10098_v32, %v8765_v9  ;;  %v11487_v17 = vld [vmem:[#allocation21_spill] sm:$0xff] }
 0x2f1   :  { %v6412_v0 = vmax.f32 %v6404_v56, 0.0  ;;  %v10130_v37 = vld [vmem:[#allocation7 + $0x70c] sm:$0xf]  ;;  %v11486_v46 = vld [vmem:[#allocation26_spill] sm:$0xff]  ;;  %v8512_v30 = vor.u32 %v10034_v58, %v8509_v55 }
 0x2f2   :  { %6336 = vmatpush.bf16.msra.mxu3 %v8960_v47  ;;  %6295 = vmatpush.bf16.msra.mxu0 %v8560_v38  ;;  %v6050_v47 = vpop.f32.mrf.mxu2  ;;  %v10190_v5 = vld [vmem:[#allocation7 + $0x8ec] sm:$0xf]  ;;  %v9133_v38 = vld [vmem:[#allocation7 + $0x8f8] sm:$0xf0]  ;;  %v8896_v50 = vor.u32 %v10130_v37, %v8893_v51 }
 0x2f3   :  { %6309 = vmatpush.bf16.msra.mxu1 %v8688_v23  ;;  %v6419_v43 = vpack.c.bf16 %v6412_v0, %v6411_v25  ;;  %v6051_v49 = vadd.f32 %v6050_v47, %v6037_v42  ;;  %v10222_v45 = vld [vmem:[#allocation7 + $0x9ec] sm:$0xf]  ;;  %v3063_v23 = vadd.f32 %v11486_v46, %v3049_v39  ;;  %v9261_v1 = vld [vmem:[#allocation7 + $0x9f8] sm:$0xf0]  ;;  %v9136_v33 = vor.u32 %v10190_v5, %v9133_v38 }
 0x2f4   :  { %6323 = vmatpush.bf16.msra.mxu2 %v8816_v28  ;;  %v6407_v28 = vadd.f32 %v5897_v4, %v2979_v44  ;;  %v6064_v34 = vpop.f32.mrf.mxu3  ;;  %v10254_v57 = vld [vmem:[#allocation7 + $0xaec] sm:$0xf]  ;;  %v9389_v63 = vld [vmem:[#allocation7 + $0xaf8] sm:$0xf0]  ;;  %v9264_v12 = vor.u32 %v10222_v45, %v9261_v1 }
 0x2f5   :  { %6423 = vst [vmem:[#allocation14] sm:$0xff] %v6419_v43  ;;  %v6065_v61 = vadd.f32 %v6064_v34, %v6051_v49  ;;  %v10286_v3 = vld [vmem:[#allocation7 + $0xbec] sm:$0xf]  ;;  %v9517_v18 = vld [vmem:[#allocation7 + $0xbf8] sm:$0xf0]  ;;  %v9392_v8 = vor.u32 %v10254_v57, %v9389_v63 }
 0x2f6   :  { %6337 = vmatpush.bf16.msra.mxu3 %v8944_v14  ;;  %6296 = vmatpush.bf16.msra.mxu0 %v8544_v11  ;;  %v8640_v14 = vor.u32 %v10066_v59, %v8637_v27  ;;  %v10186_v35 = vld [vmem:[#allocation7 + $0x8cc] sm:$0xf]  ;;  %v9117_v36 = vld [vmem:[#allocation7 + $0x8d8] sm:$0xf0]  ;;  %v6415_v52 = vmax.f32 %v6407_v28, 0.0 }
 0x2f7   :  { %6310 = vmatpush.bf16.msra.mxu1 %v8672_v20  ;;  %v6408_v10 = vadd.f32 %v6065_v61, %v3063_v23  ;;  %v10218_v11 = vld [vmem:[#allocation7 + $0x9cc] sm:$0xf]  ;;  %v9520_v20 = vor.u32 %v10286_v3, %v9517_v18  ;;  %v9245_v48 = vld [vmem:[#allocation7 + $0x9d8] sm:$0xf0]  ;;  %v9120_v7 = vor.u32 %v10186_v35, %v9117_v36 }
 0x2f8   :  { %6324 = vmatpush.bf16.msra.mxu2 %v8800_v60  ;;  %v10250_v21 = vld [vmem:[#allocation7 + $0xacc] sm:$0xf]  ;;  %v9373_v60 = vld [vmem:[#allocation7 + $0xad8] sm:$0xf0]  ;;  %v9248_v53 = vor.u32 %v10218_v11, %v9245_v48 }
 0x2f9   :  { %v6416_v6 = vmax.f32 %v6408_v10, 0.0  ;;  %v10282_v29 = vld [vmem:[#allocation7 + $0xbcc] sm:$0xf]  ;;  %v9501_v19 = vld [vmem:[#allocation7 + $0xbd8] sm:$0xf0]  ;;  %v9376_v16 = vor.u32 %v10250_v21, %v9373_v60 }
 0x2fa   :  { %6338 = vmatpush.bf16.msra.mxu3 %v8928_v24  ;;  %6297 = vmatpush.bf16.msra.mxu0 %v8528_v62  ;;  %v10182_v31 = vld [vmem:[#allocation7 + $0x8ac] sm:$0xf]  ;;  %v9101_v25 = vld [vmem:[#allocation7 + $0x8b8] sm:$0xf0]  ;;  %v9504_v40 = vor.u32 %v10282_v29, %v9501_v19  ;;  %v11489_v62 = vld [vmem:[#allocation23_spill] sm:$0xff] }
 0x2fb   :  { %6311 = vmatpush.bf16.msra.mxu1 %v8656_v26  ;;  %v6421_v24 = vpack.c.bf16 %v6416_v6, %v6415_v52  ;;  %v10214_v56 = vld [vmem:[#allocation7 + $0x9ac] sm:$0xf]  ;;  %v9229_v39 = vld [vmem:[#allocation7 + $0x9b8] sm:$0xf0]  ;;  %v9104_v0 = vor.u32 %v10182_v31, %v9101_v25 }
 0x2fc   :  { %6325 = vmatpush.bf16.msra.mxu2 %v8784_v22  ;;  %v10246_v2 = vld [vmem:[#allocation7 + $0xaac] sm:$0xf]  ;;  %v9357_v4 = vld [vmem:[#allocation7 + $0xab8] sm:$0xf0]  ;;  %v9232_v22 = vor.u32 %v10214_v56, %v9229_v39 }
 0x2fd   :  { %6425 = vst [vmem:[#allocation14 + $0x10] sm:$0xff] %v6421_v24  ;;  %v11488_v41 = vld [vmem:[#allocation22_spill] sm:$0xff]  ;;  %v10278_v58 = vld [vmem:[#allocation7 + $0xbac] sm:$0xf]  ;;  %v9360_v27 = vor.u32 %v10246_v2, %v9357_v4 }
 0x2fe   :  { %6339 = vmatpush.bf16.msra.mxu3 %v8912_v15  ;;  %6298 = vmatpush.bf16.msra.mxu0 %v8512_v30  ;;  %v9485_v55 = vld [vmem:[#allocation7 + $0xbb8] sm:$0xf0]  ;;  %v11490_v59 = vld [vmem:[#allocation24_spill] sm:$0xff]  ;;  %v6076_v51 = vpop.f32.mrf.mxu0 }
 0x2ff   :  { %6312 = vmatpush.bf16.msra.mxu1 %v8640_v14  ;;  %v11491_v42 = vld [vmem:[#allocation46_spill] sm:$0xff]  ;;  %v10178_v32 = vld [vmem:[#allocation7 + $0x88c] sm:$0xf]  ;;  %v9488_v15 = vor.u32 %v10278_v58, %v9485_v55 }
 0x300   :  { %6326 = vmatpush.bf16.msra.mxu2 %v8768_v13  ;;  %v3781_v26 = vperm.slane %v11491_v42, 2  ;;  %v9085_v54 = vld [vmem:[#allocation7 + $0x898] sm:$0xf0]  ;;  %v10210_v44 = vld [vmem:[#allocation7 + $0x98c] sm:$0xf] }
 0x301   :  { %6299 = vmatmul.bf16.vlgmr.msra.gmra.mxu0 %v11487_v17  ;;  %v9213_v47 = vld [vmem:[#allocation7 + $0x998] sm:$0xf0]  ;;  %v10242_v9 = vld [vmem:[#allocation7 + $0xa8c] sm:$0xf]  ;;  %v6090_v38 = vpop.f32.mrf.mxu1  ;;  %v9088_v45 = vor.u32 %v10178_v32, %v9085_v54 }
 0x302   :  { %6340 = vmatpush.bf16.msra.mxu3 %v8896_v50  ;;  %6347 = vmatpush.bf16.msrb.mxu0 %v9136_v33  ;;  %v9341_v37 = vld [vmem:[#allocation7 + $0xa98] sm:$0xf0]  ;;  %v10274_v43 = vld [vmem:[#allocation7 + $0xb8c] sm:$0xf]  ;;  %v6077_v5 = vadd.f32 %v6076_v51, %v3781_v26  ;;  %v9216_v46 = vor.u32 %v10210_v44, %v9213_v47 }
 0x303   :  { %6361 = vmatpush.bf16.msrb.mxu1 %v9264_v12  ;;  %6327 = vmatmul.bf16.vlgmr.msra.gmra.mxu2 %v11489_v62  ;;  %v9469_v49 = vld [vmem:[#allocation7 + $0xb98] sm:$0xf0]  ;;  %v9344_v23 = vor.u32 %v10242_v9, %v9341_v37  ;;  %v10174_v28 = vld [vmem:[#allocation7 + $0x86c] sm:$0xf] }
 0x304   :  { %6375 = vmatpush.bf16.msrb.mxu2 %v9392_v8  ;;  %6313 = vmatmul.bf16.vlgmr.msra.gmra.mxu1 %v11488_v41  ;;  %v9069_v34 = vld [vmem:[#allocation7 + $0x878] sm:$0xf0]  ;;  %v10206_v30 = vld [vmem:[#allocation7 + $0x96c] sm:$0xf]  ;;  %v6091_v1 = vadd.f32 %v6090_v38, %v6077_v5  ;;  %v9472_v57 = vor.u32 %v10274_v43, %v9469_v49 }
 0x305   :  { %6341 = vmatmul.bf16.vlgmr.msra.gmra.mxu3 %v11490_v59  ;;  %v9197_v63 = vld [vmem:[#allocation7 + $0x978] sm:$0xf0]  ;;  %v10238_v61 = vld [vmem:[#allocation7 + $0xa6c] sm:$0xf]  ;;  %v9072_v18 = vor.u32 %v10174_v28, %v9069_v34  ;;  %v11493_v28 = vld [vmem:[#allocation29_spill] sm:$0xff] }
 0x306   :  { %6389 = vmatpush.bf16.msrb.mxu3 %v9520_v20  ;;  %6348 = vmatpush.bf16.msrb.mxu0 %v9120_v7  ;;  %v9325_v14 = vld [vmem:[#allocation7 + $0xa78] sm:$0xf0]  ;;  %v10270_v13 = vld [vmem:[#allocation7 + $0xb6c] sm:$0xf]  ;;  %v9200_v50 = vor.u32 %v10206_v30, %v9197_v63  ;;  %v6104_v36 = vpop.f32.mrf.mxu2  ;;  %v6078_v52 = vpop.f32.mrf.mxu0  ;;  %v11494_v34 = vld [vmem:[#allocation31_spill] sm:$0xff] }
 0x307   :  { %6362 = vmatpush.bf16.msrb.mxu1 %v9248_v53  ;;  %v9453_v3 = vld [vmem:[#allocation7 + $0xb78] sm:$0xf0]  ;;  %v9328_v33 = vor.u32 %v10238_v61, %v9325_v14  ;;  %v10170_v10 = vld [vmem:[#allocation7 + $0x84c] sm:$0xf]  ;;  %v6105_v21 = vadd.f32 %v6104_v36, %v6091_v1  ;;  %v6079_v19 = vadd.f32 %v6078_v52, %v3781_v26  ;;  %v11496_v52 = vld [vmem:[#allocation35_spill] sm:$0xff] }
 0x308   :  { %6376 = vmatpush.bf16.msrb.mxu2 %v9376_v16  ;;  %v9053_v12 = vld [vmem:[#allocation7 + $0x858] sm:$0xf0]  ;;  %v10202_v8 = vld [vmem:[#allocation7 + $0x94c] sm:$0xf]  ;;  %v9456_v35 = vor.u32 %v10270_v13, %v9453_v3  ;;  %v6118_v60 = vpop.f32.mrf.mxu3 }
 0x309   :  { %v9181_v11 = vld [vmem:[#allocation7 + $0x958] sm:$0xf0]  ;;  %v10234_v20 = vld [vmem:[#allocation7 + $0xa4c] sm:$0xf]  ;;  %v9056_v7 = vor.u32 %v10170_v10, %v9053_v12  ;;  %v6119_v24 = vadd.f32 %v6118_v60, %v6105_v21  ;;  %v6092_v53 = vpop.f32.mrf.mxu1 }
 0x30a   :  { %6390 = vmatpush.bf16.msrb.mxu3 %v9504_v40  ;;  %6349 = vmatpush.bf16.msrb.mxu0 %v9104_v0  ;;  %v9309_v48 = vld [vmem:[#allocation7 + $0xa58] sm:$0xf0]  ;;  %v10266_v6 = vld [vmem:[#allocation7 + $0xb4c] sm:$0xf]  ;;  %v9184_v16 = vor.u32 %v10202_v8, %v9181_v11  ;;  %v6093_v40 = vadd.f32 %v6092_v53, %v6079_v19 }
 0x30b   :  { %6363 = vmatpush.bf16.msrb.mxu1 %v9232_v22  ;;  %v9437_v29 = vld [vmem:[#allocation7 + $0xb58] sm:$0xf0]  ;;  %v9312_v31 = vor.u32 %v10234_v20, %v9309_v48  ;;  %v10166_v25 = vld [vmem:[#allocation7 + $0x82c] sm:$0xf] }
 0x30c   :  { %6377 = vmatpush.bf16.msrb.mxu2 %v9360_v27  ;;  %v9037_v56 = vld [vmem:[#allocation7 + $0x838] sm:$0xf0]  ;;  %v10198_v17 = vld [vmem:[#allocation7 + $0x92c] sm:$0xf]  ;;  %v9440_v39 = vor.u32 %v10266_v6, %v9437_v29 }
 0x30d   :  { %v9165_v2 = vld [vmem:[#allocation7 + $0x938] sm:$0xf0]  ;;  %v10230_v4 = vld [vmem:[#allocation7 + $0xa2c] sm:$0xf]  ;;  %v9040_v55 = vor.u32 %v10166_v25, %v9037_v56  ;;  %v3782_v56 = vperm.slane %v11491_v42, 3 }
 0x30e   :  { %6391 = vmatpush.bf16.msrb.mxu3 %v9488_v15  ;;  %6350 = vmatpush.bf16.msrb.mxu0 %v9088_v45  ;;  %v9293_v41 = vld [vmem:[#allocation7 + $0xa38] sm:$0xf0]  ;;  %v10262_v62 = vld [vmem:[#allocation7 + $0xb2c] sm:$0xf]  ;;  %v9168_v59 = vor.u32 %v10198_v17, %v9165_v2  ;;  %v6106_v54 = vpop.f32.mrf.mxu2 }
 0x30f   :  { %6364 = vmatpush.bf16.msrb.mxu1 %v9216_v46  ;;  %v9421_v58 = vld [vmem:[#allocation7 + $0xb38] sm:$0xf0]  ;;  %v9296_v0 = vor.u32 %v10230_v4, %v9293_v41  ;;  %v10162_v26 = vld [vmem:[#allocation7 + $0x80c] sm:$0xf]  ;;  %v6107_v9 = vadd.f32 %v6106_v54, %v6093_v40 }
 0x310   :  { %6378 = vmatpush.bf16.msrb.mxu2 %v9344_v23  ;;  %v9021_v22 = vld [vmem:[#allocation7 + $0x818] sm:$0xf0]  ;;  %v10194_v27 = vld [vmem:[#allocation7 + $0x90c] sm:$0xf]  ;;  %v9424_v32 = vor.u32 %v10262_v62, %v9421_v58  ;;  %v6120_v43 = vpop.f32.mrf.mxu3 }
 0x311   :  { %v9149_v44 = vld [vmem:[#allocation7 + $0x918] sm:$0xf0]  ;;  %v10226_v15 = vld [vmem:[#allocation7 + $0xa0c] sm:$0xf]  ;;  %v9024_v49 = vor.u32 %v10162_v26, %v9021_v22  ;;  %v6121_v5 = vadd.f32 %v6120_v43, %v6107_v9  ;;  %v11497_v9 = vld [vmem:[#allocation25_spill] sm:$0xff] }
 0x312   :  { %6392 = vmatpush.bf16.msrb.mxu3 %v9472_v57  ;;  %6351 = vmatpush.bf16.msrb.mxu0 %v9072_v18  ;;  %v9277_v47 = vld [vmem:[#allocation7 + $0xa18] sm:$0xf0]  ;;  %v10258_v37 = vld [vmem:[#allocation7 + $0xb0c] sm:$0xf]  ;;  %v9152_v38 = vor.u32 %v10194_v27, %v9149_v44 }
 0x313   :  { %6365 = vmatpush.bf16.msrb.mxu1 %v9200_v50  ;;  %v9405_v51 = vld [vmem:[#allocation7 + $0xb18] sm:$0xf0]  ;;  %v9280_v45 = vor.u32 %v10226_v15, %v9277_v47  ;;  %v11492_v23 = vld [vmem:[#allocation28_spill] sm:$0xff] }
 0x314   :  { %6379 = vmatpush.bf16.msrb.mxu2 %v9328_v33  ;;  %v9408_v46 = vor.u32 %v10258_v37, %v9405_v51  ;;  %v11495_v30 = vld [vmem:[#allocation32_spill] sm:$0xff]  ;;  %v11498_v37 = vperm.slane %v11497_v9, 2  ;;  %v11499_v51 = vld [vmem:[#allocation27_spill] sm:$0xff] }
 0x316   :  { %6393 = vmatpush.bf16.msrb.mxu3 %v9456_v35  ;;  %6352 = vmatpush.bf16.msrb.mxu0 %v9056_v7  ;;  %v3077_v43 = vadd.f32 %v11499_v51, %v11498_v37 }
 0x317   :  { %6366 = vmatpush.bf16.msrb.mxu1 %v9184_v16 }
 0x318   :  { %6380 = vmatpush.bf16.msrb.mxu2 %v9312_v31 }
 0x31a   :  { %6394 = vmatpush.bf16.msrb.mxu3 %v9440_v39  ;;  %6353 = vmatpush.bf16.msrb.mxu0 %v9040_v55 }
 0x31b   :  { %6367 = vmatpush.bf16.msrb.mxu1 %v9168_v59 }
 0x31c   :  { %6381 = vmatpush.bf16.msrb.mxu2 %v9296_v0 }
 0x31e   :  { %6395 = vmatpush.bf16.msrb.mxu3 %v9424_v32  ;;  %6354 = vmatpush.bf16.msrb.mxu0 %v9024_v49  ;;  %v6132_v1 = vpop.f32.mrf.mxu0 }
 0x31f   :  { %6368 = vmatpush.bf16.msrb.mxu1 %v9152_v38  ;;  %v6133_v61 = vadd.f32 %v6132_v1, %v6119_v24 }
 0x320   :  { %6382 = vmatpush.bf16.msrb.mxu2 %v9280_v45 }
 0x321   :  { %6355 = vmatmul.bf16.vlgmr.msrb.gmra.mxu0 %v11492_v23  ;;  %v6146_v57 = vpop.f32.mrf.mxu1 }
 0x322   :  { %6396 = vmatpush.bf16.msrb.mxu3 %v9408_v46  ;;  %6369 = vmatmul.bf16.vlgmr.msrb.gmra.mxu1 %v11493_v28  ;;  %v6147_v3 = vadd.f32 %v6146_v57, %v6133_v61  ;;  %v11500_v28 = vperm.slane %v11497_v9, 3  ;;  %v11502_v57 = vld [vmem:[#allocation30_spill] sm:$0xff] }
 0x323   :  { %6383 = vmatmul.bf16.vlgmr.msrb.gmra.mxu2 %v11494_v34  ;;  %v11501_v34 = vld [vmem:[#allocation38_spill] sm:$0xff] }
 0x325   :  { %6397 = vmatmul.bf16.vlgmr.msrb.gmra.mxu3 %v11495_v30  ;;  %v3161_v30 = vadd.f32 %v11501_v34, %v11500_v28 }
 0x326   :  { %v6160_v63 = vpop.f32.mrf.mxu2  ;;  %v6134_v13 = vpop.f32.mrf.mxu0 }
 0x327   :  { %v6161_v18 = vadd.f32 %v6160_v63, %v6147_v3  ;;  %v6135_v54 = vadd.f32 %v6134_v13, %v6121_v5  ;;  %v3091_v5 = vadd.f32 %v11502_v57, %v3077_v43 }
 0x328   :  { %v6174_v14 = vpop.f32.mrf.mxu3 }
 0x329   :  { %v6148_v50 = vpop.f32.mrf.mxu1  ;;  %v6175_v10 = vadd.f32 %v6174_v14, %v6161_v18 }
 0x32a   :  { %v6149_v49 = vadd.f32 %v6148_v50, %v6135_v54  ;;  %v11511_v54 = vld [vmem:[#allocation37_spill] sm:$0xff] }
 0x32e   :  { %v6162_v33 = vpop.f32.mrf.mxu2 }
 0x32f   :  { %v6163_v46 = vadd.f32 %v6162_v33, %v6149_v49 }
 0x330   :  { %v6176_v8 = vpop.f32.mrf.mxu3 }
 0x331   :  { %v6177_v13 = vadd.f32 %v6176_v8, %v6163_v46 }
 0x33e   :  { %v6188_v12 = vpop.f32.mrf.mxu0 }
 0x33f   :  { %v6189_v35 = vadd.f32 %v6188_v12, %v6175_v10  ;;  %v11503_v10 = vld [vmem:[#allocation39_spill] sm:$0xff] }
 0x340   :  { %v3175_v12 = vadd.f32 %v11503_v10, %v3161_v30 }
 0x341   :  { %v6202_v36 = vpop.f32.mrf.mxu1 }
 0x342   :  { %v6203_v11 = vadd.f32 %v6202_v36, %v6189_v35  ;;  %v11504_v35 = vld [vmem:[#allocation33_spill] sm:$0xff] }
 0x343   :  { %v3105_v36 = vadd.f32 %v11504_v35, %v3091_v5 }
 0x346   :  { %v6216_v20 = vpop.f32.mrf.mxu2  ;;  %v6190_v29 = vpop.f32.mrf.mxu0 }
 0x347   :  { %v6217_v48 = vadd.f32 %v6216_v20, %v6203_v11  ;;  %v6191_v33 = vadd.f32 %v6190_v29, %v6177_v13  ;;  %v11509_v29 = vld [vmem:[#allocation40_spill] sm:$0xff] }
 0x348   :  { %v6230_v21 = vpop.f32.mrf.mxu3 }
 0x349   :  { %v6231_v60 = vadd.f32 %v6230_v21, %v6217_v48  ;;  %v6204_v19 = vpop.f32.mrf.mxu1  ;;  %v11505_v48 = vld [vmem:[#allocation41_spill] sm:$0xff] }
 0x34a   :  { %v3189_v21 = vadd.f32 %v11505_v48, %v3175_v12 }
 0x34b   :  { %v11363_v6 = vadd.f32 %v6231_v60, %v11496_v52  ;;  %v11506_v52 = vld [vmem:[#allocation34_spill] sm:$0xff] }
 0x34e   :  { %v6218_v7 = vpop.f32.mrf.mxu2 }
 0x350   :  { %v11365_v24 = vpop.f32.mrf.mxu3 }
 0x35e   :  { %v6244_v53 = vpop.f32.mrf.mxu0 }
 0x35f   :  { %v6245_v39 = vadd.f32 %v6244_v53, %v3782_v56  ;;  %v3119_v53 = vadd.f32 %v11506_v52, %v3105_v36 }
 0x361   :  { %v6258_v16 = vpop.f32.mrf.mxu1 }
 0x362   :  { %v6259_v4 = vadd.f32 %v6258_v16, %v6245_v39  ;;  %v6205_v16 = vadd.f32 %v6204_v19, %v6191_v33 }
 0x366   :  { %v6272_v31 = vpop.f32.mrf.mxu2  ;;  %v6246_v17 = vpop.f32.mrf.mxu0 }
 0x367   :  { %v6273_v58 = vadd.f32 %v6272_v31, %v6259_v4  ;;  %v6247_v59 = vadd.f32 %v6246_v17, %v3782_v56  ;;  %v6219_v17 = vadd.f32 %v6218_v7, %v6205_v16 }
 0x368   :  { %v6286_v25 = vpop.f32.mrf.mxu3 }
 0x369   :  { %v6260_v40 = vpop.f32.mrf.mxu1  ;;  %v6287_v0 = vadd.f32 %v6286_v25, %v6273_v58  ;;  %v6233_v19 = vadd.f32 %v11365_v24, %v6219_v17 }
 0x36a   :  { %v6261_v22 = vadd.f32 %v6260_v40, %v6247_v59 }
 0x36e   :  { %v6274_v2 = vpop.f32.mrf.mxu2 }
 0x36f   :  { %v6275_v44 = vadd.f32 %v6274_v2, %v6261_v22  ;;  %v11507_v2 = vld [vmem:[#allocation42_spill] sm:$0xff] }
 0x370   :  { %v6288_v41 = vpop.f32.mrf.mxu3  ;;  %v3203_v4 = vadd.f32 %v11507_v2, %v3189_v21 }
 0x371   :  { %v6289_v38 = vadd.f32 %v6288_v41, %v6275_v44  ;;  %v11508_v41 = vld [vmem:[#allocation36_spill] sm:$0xff] }
 0x37e   :  { %v6300_v62 = vpop.f32.mrf.mxu0 }
 0x37f   :  { %v6301_v27 = vadd.f32 %v6300_v62, %v6287_v0  ;;  %v3133_v62 = vadd.f32 %v11508_v41, %v3119_v53 }
 0x381   :  { %v6314_v55 = vpop.f32.mrf.mxu1  ;;  %v3147_v7 = vadd.f32 %v11511_v54, %v3133_v62 }
 0x382   :  { %v6315_v47 = vadd.f32 %v6314_v55, %v6301_v27  ;;  %v11510_v55 = vld [vmem:[#allocation43_spill] sm:$0xff] }
 0x383   :  { %v3217_v59 = vadd.f32 %v11510_v55, %v3203_v4  ;;  %v6409_v37 = vadd.f32 %v6233_v19, %v3147_v7 }
 0x386   :  { %v6328_v26 = vpop.f32.mrf.mxu2  ;;  %v6302_v15 = vpop.f32.mrf.mxu0 }
 0x387   :  { %v6329_v45 = vadd.f32 %v6328_v26, %v6315_v47  ;;  %v6303_v23 = vadd.f32 %v6302_v15, %v6289_v38  ;;  %v6413_v26 = vmax.f32 %v11363_v6, 0.0  ;;  %v6417_v6 = vmax.f32 %v6409_v37, 0.0 }
 0x388   :  { %v6342_v32 = vpop.f32.mrf.mxu3 }
 0x389   :  { %v6316_v42 = vpop.f32.mrf.mxu1  ;;  %v6343_v63 = vadd.f32 %v6342_v32, %v6329_v45 }
 0x38a   :  { %v6317_v3 = vadd.f32 %v6316_v42, %v6303_v23  ;;  %v11512_v42 = vld [vmem:[#allocation44_spill] sm:$0xff] }
 0x38b   :  { %v3231_v9 = vadd.f32 %v11512_v42, %v3217_v59 }
 0x38e   :  { %v6330_v1 = vpop.f32.mrf.mxu2 }
 0x38f   :  { %v6331_v11 = vadd.f32 %v6330_v1, %v6317_v3 }
 0x390   :  { %v6344_v61 = vpop.f32.mrf.mxu3 }
 0x391   :  { %v6345_v31 = vadd.f32 %v6344_v61, %v6331_v11 }
 0x39e   :  { %v6356_v14 = vpop.f32.mrf.mxu0 }
 0x39f   :  { %v6357_v18 = vadd.f32 %v6356_v14, %v6343_v63  ;;  %v6370_v50 = vpop.f32.mrf.mxu1 }
 0x3a1   :  { %v6371_v20 = vadd.f32 %v6370_v50, %v6357_v18 }
 0x3a6   :  { %v6384_v60 = vpop.f32.mrf.mxu2  ;;  %v6358_v8 = vpop.f32.mrf.mxu0 }
 0x3a7   :  { %v6385_v25 = vadd.f32 %v6384_v60, %v6371_v20  ;;  %v6359_v39 = vadd.f32 %v6358_v8, %v6345_v31  ;;  %v6372_v0 = vpop.f32.mrf.mxu1 }
 0x3a8   :  { %v6398_v56 = vpop.f32.mrf.mxu3 }
 0x3a9   :  { %v6399_v40 = vadd.f32 %v6398_v56, %v6385_v25  ;;  %v6373_v27 = vadd.f32 %v6372_v0, %v6359_v39 }
 0x3ab   :  { %v6406_v58 = vadd.f32 %v6399_v40, %v11509_v29 }
 0x3ad   :  { %v6414_v22 = vmax.f32 %v6406_v58, 0.0 }
 0x3ae   :  { %v6386_v32 = vpop.f32.mrf.mxu2 }
 0x3af   :  { %v6420_v44 = vpack.c.bf16 %v6414_v22, %v6413_v26  ;;  %v6387_v15 = vadd.f32 %v6386_v32, %v6373_v27 }
 0x3b0   :  { %v6400_v47 = vpop.f32.mrf.mxu3 }
 0x3b1   :  { %6424 = vst [vmem:[#allocation14 + $0x8] sm:$0xff] %v6420_v44  ;;  %v6401_v51 = vadd.f32 %v6400_v47, %v6387_v15 }
 0x3b3   :  { %v6410_v43 = vadd.f32 %v6401_v51, %v3231_v9 }
 0x3b5   :  { %v6418_v24 = vmax.f32 %v6410_v43, 0.0 }
 0x3b7   :  { %v6422_v49 = vpack.c.bf16 %v6418_v24, %v6417_v6 }
 0x3b9   :  { %6426 = vst [vmem:[#allocation14 + $0x18] sm:$0xff] %v6422_v49 }
 0x3ba   :  { %6439 = dma.vmem_to_hbm [thread:$0]  %s6432_s6, 512, %s6434_s3, [#allocation4], %s10507_s9, %s10507_s9, %s10508_s10  }
 0x3bb   :  { %10504 = dma.done.wait [#allocation4], 512  }
 0x3bc   :  { %10505 = vsyncadd [#allocation4], 4294966784 }
 0x3bd   :  { %6444 = vsyncpa [#allocation3], 1 }
 0x3be   :  { %6445 = vsyncpa [#allocation6], 1 }
 0x3bf   :  { %6446 = vsyncpa [#allocation9], 1 }
 0x3c0   :  { %6447 = vsyncpa [#allocation12], 1 }
 0x3c1   :  { %6448 = vsyncpa [#allocation4], 1 }

</bundles_post_ra>
